<compile_context>
chip_gen: v7x
topology: tpu7x:2x2x1
jax: 0.10.0
libtpu: 0.0.40
codegen_flags: <defaults>
</compile_context>

<pallas_src>
import functools

import jax
import jax.numpy as jnp
from jax.experimental import pallas as pl
from jax.experimental.pallas import tpu as pltpu


def _ceil_to(n, m):
    return -(-n // m) * m


def _choose_tiling(B, t_pad, target_rows=1024):
    """Pick (b_tile, n_tiles): >=2 even tiles when B>=2 (v7x 2-TC sharding),
    ~target_rows rows per grid step otherwise.  B is padded to b_tile*n_tiles
    by the caller, so b_tile never has to divide B."""
    if B == 1:
        return 1, 1
    bt_target = max(1, target_rows // max(t_pad, 1))
    n_tiles = max(2, -(-B // bt_target))
    n_tiles += n_tiles % 2                       # even -> balanced on 2 TCs
    b_tile = -(-B // n_tiles)
    return b_tile, n_tiles


def _tcn_fused_kernel(*refs, layer_cfg, ksize, t_pad, t_valid, b_tile):
    """Fused TCN stack + mean/max pooling for one (b_tile*t_pad, C) row slab."""
    x_ref = refs[0]
    o_ref = refs[-1]
    w_refs = refs[1:-1]
    R = b_tile * t_pad

    # Memoized (trace-time) per-row in-sequence time index and causal masks,
    # keyed by channel width / shift.  Each mask is built once and reused by
    # both convs of a layer (and the pooling epilogue).
    row_t_memo = {}

    def row_t(width):
        if width not in row_t_memo:
            row_t_memo[width] = jax.lax.broadcasted_iota(
                jnp.int32, (b_tile, t_pad, width), 1).reshape(R, width)
        return row_t_memo[width]

    mask_memo = {}

    def causal_mask(shift, width):
        key = (shift, width)
        if key not in mask_memo:
            mask_memo[key] = row_t(width) >= shift
        return mask_memo[key]

    def causal_concat(a, dil, width):
        # a: (R, width) f32.  Returns (R, ksize*width) bf16 where column block
        # j holds `a` shifted by s_j = (ksize-1-j)*dil rows, zeroed for rows
        # with in-sequence time < s_j (no leakage across folded sequences).
        pieces = []
        for j in range(ksize):
            s = (ksize - 1 - j) * dil
            if s == 0:
                pieces.append(a.astype(jnp.bfloat16))
            elif s >= t_pad:
                pieces.append(jnp.zeros((R, width), jnp.bfloat16))
            else:
                rolled = pltpu.roll(a, shift=s, axis=0)
                pieces.append(
                    jnp.where(causal_mask(s, width), rolled, 0.0)
                    .astype(jnp.bfloat16))
        return jnp.concatenate(pieces, axis=-1)

    x = x_ref[0].astype(jnp.float32)                      # (R, c_in_pad)

    wi = 0
    for dil, c_prev, c_cur, has_ds in layer_cfg:
        xcat = causal_concat(x, dil, c_prev)              # (R, K*c_prev) bf16
        if has_ds:
            # Fused conv1 + downsample: N = 2*c_cur wide matmul.
            w1cat = w_refs[wi][...]                       # (K*c_prev, 2*c_cur)
            b1 = w_refs[wi + 1][...]
            bd = w_refs[wi + 2][...]
            w2 = w_refs[wi + 3][...]
            b2 = w_refs[wi + 4][...]
            wi += 5
            fused = jnp.dot(xcat, w1cat, preferred_element_type=jnp.float32)
            h = fused[:, :c_cur]
            res = fused[:, c_cur:] + bd
        else:
            w1 = w_refs[wi][...]                          # (K*c_prev, c_cur)
            b1 = w_refs[wi + 1][...]
            w2 = w_refs[wi + 2][...]
            b2 = w_refs[wi + 3][...]
            wi += 4
            h = jnp.dot(xcat, w1, preferred_element_type=jnp.float32)
            res = x                                       # identity residual

        h = jnp.maximum(h + b1, 0.0)                      # ReLU (dropout=id)
        hcat = causal_concat(h, dil, c_cur)
        h = jnp.dot(hcat, w2, preferred_element_type=jnp.float32)
        h = jnp.maximum(h + b2, 0.0)
        x = jnp.maximum(h + res, 0.0)                     # block ReLU

    # Fused mean+max pooling over the valid time steps (mask applied once).
    c_last = x.shape[-1]
    x3 = x.reshape(b_tile, t_pad, c_last)
    if t_pad == t_valid:
        pooled = jnp.max(x3, axis=1) + jnp.sum(x3, axis=1) * (1.0 / t_valid)
    else:
        tmask = row_t(c_last).reshape(b_tile, t_pad, c_last) < t_valid
        # x3 >= 0 after the final ReLU, so masking with 0.0 is exact for max.
        xm = jnp.where(tmask, x3, 0.0)
        pooled = jnp.max(xm, axis=1) + jnp.sum(xm, axis=1) * (1.0 / t_valid)

    o_ref[0] = pooled.astype(o_ref.dtype)


def tcn_model_forward(inputs, params, *, kernel_size):
    """inputs: PyTorch layout (B, 1, C, T) or (B, C, T).  Returns (B, C_last)."""
    if inputs.ndim == 4:
        inputs = jnp.squeeze(inputs, axis=1)
    x = jnp.transpose(inputs, (0, 2, 1)).astype(jnp.float32)   # (B, T, C)
    B, T, c_in = x.shape

    chan = [p[0].shape[2] for p in params]                     # c_out per layer
    widths = [_ceil_to(c, 128) for c in chan]                  # per-layer pad
    c_in_pad = _ceil_to(c_in, 128)
    c_last, c_last_pad = chan[-1], widths[-1]
    t_pad = _ceil_to(T, 8)
    b_tile, n_tiles = _choose_tiling(B, t_pad)
    B_pad = b_tile * n_tiles
    R = b_tile * t_pad

    # Pad batch / time / channels with zeros, fold batch tiles into rows.
    # The slab is streamed as bf16 (only used as MXU operand + f32 residual).
    x_pad = jnp.pad(x, ((0, B_pad - B), (0, t_pad - T), (0, c_in_pad - c_in)))
    x_pad = x_pad.astype(jnp.bfloat16).reshape(n_tiles, R, c_in_pad)

    # Flatten + zero-pad weights; pre-cast matmul operands to bf16.  For
    # downsample layers the 1x1 conv weight is embedded in the zero-shift tap
    # rows of an extra N-block so conv1 + residual share one matmul.
    flat_w = []
    in_specs = [pl.BlockSpec((1, R, c_in_pad), lambda g: (g, 0, 0))]
    layer_cfg = []
    c_prev = c_in_pad
    for i, (w1, b1, w2, b2, wd, bd) in enumerate(params):
        K, ci, co = w1.shape
        cw = widths[i]
        w1f = jnp.pad(w1, ((0, 0), (0, c_prev - ci), (0, cw - co))
                      ).reshape(K * c_prev, cw)
        w2f = jnp.pad(w2, ((0, 0), (0, cw - co), (0, cw - co))
                      ).reshape(K * cw, cw)
        b1p = jnp.pad(b1, ((0, 0), (0, cw - co)))
        b2p = jnp.pad(b2, ((0, 0), (0, cw - co)))
        has_ds = wd is not None
        if has_ds:
            wdp = jnp.pad(wd, ((0, c_prev - ci), (0, cw - co)))
            wd_ext = jnp.concatenate(
                [jnp.zeros(((K - 1) * c_prev, cw), jnp.float32), wdp], axis=0)
            w1cat = jnp.concatenate([w1f, wd_ext], axis=1)   # (K*c_prev, 2cw)
            bdp = jnp.pad(bd, ((0, 0), (0, cw - co)))
            flat_w += [w1cat.astype(jnp.bfloat16), b1p, bdp,
                       w2f.astype(jnp.bfloat16), b2p]
            in_specs += [
                pl.BlockSpec((K * c_prev, 2 * cw), lambda g: (0, 0)),
                pl.BlockSpec((1, cw), lambda g: (0, 0)),
                pl.BlockSpec((1, cw), lambda g: (0, 0)),
                pl.BlockSpec((K * cw, cw), lambda g: (0, 0)),
                pl.BlockSpec((1, cw), lambda g: (0, 0)),
            ]
        else:
            flat_w += [w1f.astype(jnp.bfloat16), b1p,
                       w2f.astype(jnp.bfloat16), b2p]
            in_specs += [
                pl.BlockSpec((K * c_prev, cw), lambda g: (0, 0)),
                pl.BlockSpec((1, cw), lambda g: (0, 0)),
                pl.BlockSpec((K * cw, cw), lambda g: (0, 0)),
                pl.BlockSpec((1, cw), lambda g: (0, 0)),
            ]
        layer_cfg.append((2 ** i, c_prev, cw, has_ds))
        c_prev = cw

    # Footprint-derived scoped-VMEM budget, capped below v7x's 64 MiB per-TC
    # VMEM (raise the cap for very large configs on 128 MiB v5e/v6e parts).
    max_w = max([c_in_pad] + widths)
    w_bytes = sum(int(a.size) * a.dtype.itemsize for a in flat_w)
    act_bytes = R * max_w * 4 * 6 + R * kernel_size * max_w * 2 * 2
    vmem_est = (2 * R * c_in_pad * 2 + 2 * b_tile * c_last_pad * 4
                + 2 * w_bytes + act_bytes)
    vmem_limit = int(min(max(32 << 20, vmem_est * 3 // 2), 56 << 20))

    kernel = functools.partial(
        _tcn_fused_kernel, layer_cfg=tuple(layer_cfg), ksize=kernel_size,
        t_pad=t_pad, t_valid=T, b_tile=b_tile)

    out = pl.pallas_call(
        kernel,
        out_shape=jax.ShapeDtypeStruct((n_tiles, b_tile, c_last_pad),
                                       jnp.float32),
        grid_spec=pltpu.PrefetchScalarGridSpec(
            num_scalar_prefetch=0,
            grid=(n_tiles,),
            in_specs=in_specs,
            out_specs=pl.BlockSpec((1, b_tile, c_last_pad),
                                   lambda g: (g, 0, 0)),
        ),
        compiler_params=pltpu.CompilerParams(
            dimension_semantics=("parallel",),
            vmem_limit_bytes=vmem_limit,
        ),
    )(x_pad, *flat_w)

    return out.reshape(B_pad, c_last_pad)[:B, :c_last]


def init_tcn_params(key, input_size, num_channels, kernel_size):
    """Deterministic synthetic weights.  weight_norm(g=||v||) folds to v."""
    params = []
    for i, c_out in enumerate(num_channels):
        c_in = input_size if i == 0 else num_channels[i - 1]
        key, k1, k2, k3, k4, k5, k6 = jax.random.split(key, 7)
        w1 = 0.01 * jax.random.normal(k1, (kernel_size, c_in, c_out), jnp.float32)
        b1 = (1.0 / jnp.sqrt(c_in * kernel_size)) * jax.random.uniform(
            k2, (1, c_out), jnp.float32, -1.0, 1.0)
        w2 = 0.01 * jax.random.normal(k3, (kernel_size, c_out, c_out), jnp.float32)
        b2 = (1.0 / jnp.sqrt(c_out * kernel_size)) * jax.random.uniform(
            k4, (1, c_out), jnp.float32, -1.0, 1.0)
        if c_in != c_out:
            wd = 0.01 * jax.random.normal(k5, (c_in, c_out), jnp.float32)
            bd = (1.0 / jnp.sqrt(c_in)) * jax.random.uniform(
                k6, (1, c_out), jnp.float32, -1.0, 1.0)
        else:
            wd, bd = None, None
        params.append((w1, b1, w2, b2, wd, bd))
    return params


# ---------------- pure-JAX reference (for verification) ----------------
# Matmul operands are cast to bf16 (f32 accumulation) and the input stream is
# bf16-rounded, mirroring the kernel's MXU input precision; all other math f32.
def _ref_causal_conv(x, w, b, dilation):
    K, _, c_out = w.shape
    T = x.shape[1]
    xb = x.astype(jnp.bfloat16)
    wb = w.astype(jnp.bfloat16)
    out = jnp.zeros((x.shape[0], T, c_out), jnp.float32)
    for j in range(K):
        s = (K - 1 - j) * dilation
        xs = xb if s == 0 else jnp.pad(xb, ((0, 0), (s, 0), (0, 0)))[:, :T]
        out = out + jnp.einsum("btc,cd->btd", xs, wb[j],
                               preferred_element_type=jnp.float32)
    return out + b


def ref_forward(inputs, params, kernel_size):
    if inputs.ndim == 4:
        inputs = jnp.squeeze(inputs, axis=1)
    x = jnp.transpose(inputs, (0, 2, 1)).astype(jnp.float32)
    x = x.astype(jnp.bfloat16).astype(jnp.float32)   # mirror bf16 input stream
    for i, (w1, b1, w2, b2, wd, bd) in enumerate(params):
        d = 2 ** i
        h = jax.nn.relu(_ref_causal_conv(x, w1, b1, d))
        h = jax.nn.relu(_ref_causal_conv(h, w2, b2, d))
        if wd is None:
            res = x
        else:
            res = jnp.einsum("btc,cd->btd", x.astype(jnp.bfloat16),
                             wd.astype(jnp.bfloat16),
                             preferred_element_type=jnp.float32) + bd
        x = jax.nn.relu(h + res)
    return jnp.max(x, axis=1) + jnp.mean(x, axis=1)


if __name__ == "__main__":
    # Small but representative: 4-D (B, 1, n_mels, time) input exercising the
    # squeeze(1), time padding (45 -> 48), channel padding (16/32 -> 128),
    # batch padding (B=5 -> 6 = 2 tiles x 3), a downsample layer (16 != 32,
    # fused N=256 matmul), an identity-residual layer (32 == 32), dilations
    # 1 and 2, and a 2-step ("parallel") batch-tile grid.
    B, C_IN, T = 5, 16, 45
    num_channels = [32, 32]
    kernel_size = 3

    key = jax.random.PRNGKey(0)
    kp, kx = jax.random.split(key)
    params = init_tcn_params(kp, C_IN, num_channels, kernel_size)
    x = jax.random.normal(kx, (B, 1, C_IN, T), jnp.float32)

    out = tcn_model_forward(x, params, kernel_size=kernel_size)
    out = jax.block_until_ready(out)

    ref = ref_forward(x, params, kernel_size)
    assert out.shape == (B, num_channels[-1]), out.shape
    assert jnp.allclose(out, ref, rtol=1e-4, atol=5e-5), (
        "mismatch vs pure-JAX reference: max abs err "
        f"{float(jnp.max(jnp.abs(out - ref)))}")
    print("KERNEL_OK")
</pallas_src>

<mosaic_0001>
module attributes {stable_mosaic.version = 11 : i64} {
  func.func @_tcn_fused_kernel(%arg0: i32, %arg1: memref<1x144x128xbf16, #tpu.memory_space<vmem>>, %arg2: memref<384x256xbf16, #tpu.memory_space<vmem>>, %arg3: memref<1x128xf32, #tpu.memory_space<vmem>>, %arg4: memref<1x128xf32, #tpu.memory_space<vmem>>, %arg5: memref<384x128xbf16, #tpu.memory_space<vmem>>, %arg6: memref<1x128xf32, #tpu.memory_space<vmem>>, %arg7: memref<384x128xbf16, #tpu.memory_space<vmem>>, %arg8: memref<1x128xf32, #tpu.memory_space<vmem>>, %arg9: memref<384x128xbf16, #tpu.memory_space<vmem>>, %arg10: memref<1x128xf32, #tpu.memory_space<vmem>>, %arg11: memref<1x3x128xf32, #tpu.memory_space<vmem>>) attributes {dimension_semantics = [#tpu.dimension_semantics<parallel>], iteration_bounds = array<i64: 2>, scalar_prefetch = 0 : i64, scratch_operands = 0 : i64, tpu.core_type = #tpu.core_type<tc>, window_params = [{transform_indices = @transform_0, window_bounds = array<i64: 1, 144, 128>}, {pipeline_mode = #tpu.pipeline_mode<synchronous>, transform_indices = @transform_1, window_bounds = array<i64: 384, 256>}, {pipeline_mode = #tpu.pipeline_mode<synchronous>, transform_indices = @transform_2, window_bounds = array<i64: 1, 128>}, {pipeline_mode = #tpu.pipeline_mode<synchronous>, transform_indices = @transform_3, window_bounds = array<i64: 1, 128>}, {pipeline_mode = #tpu.pipeline_mode<synchronous>, transform_indices = @transform_4, window_bounds = array<i64: 384, 128>}, {pipeline_mode = #tpu.pipeline_mode<synchronous>, transform_indices = @transform_5, window_bounds = array<i64: 1, 128>}, {pipeline_mode = #tpu.pipeline_mode<synchronous>, transform_indices = @transform_6, window_bounds = array<i64: 384, 128>}, {pipeline_mode = #tpu.pipeline_mode<synchronous>, transform_indices = @transform_7, window_bounds = array<i64: 1, 128>}, {pipeline_mode = #tpu.pipeline_mode<synchronous>, transform_indices = @transform_8, window_bounds = array<i64: 384, 128>}, {pipeline_mode = #tpu.pipeline_mode<synchronous>, transform_indices = @transform_9, window_bounds = array<i64: 1, 128>}, {transform_indices = @transform_10, window_bounds = array<i64: 1, 3, 128>}]} {
    %c0 = arith.constant 0 : index
    %c0_0 = arith.constant 0 : index
    %c0_1 = arith.constant 0 : index
    %0 = vector.load %arg1[%c0, %c0_0, %c0_1] : memref<1x144x128xbf16, #tpu.memory_space<vmem>>, vector<1x144x128xbf16>
    %1 = vector.shape_cast %0 : vector<1x144x128xbf16> to vector<144x128xbf16>
    %2 = arith.extf %1 : vector<144x128xbf16> to vector<144x128xf32>
    %c2_i32 = arith.constant 2 : i32
    %3 = tpu.dynamic_rotate %2 by %c2_i32 dim 0 : vector<144x128xf32>, i32 -> vector<144x128xf32>
    %4 = tpu.iota {dimensions = array<i32: 1>} : vector<3x48x128xi32>
    %5 = vector.shape_cast %4 : vector<3x48x128xi32> to vector<144x128xi32>
    %c2_i32_2 = arith.constant 2 : i32
    %6 = vector.broadcast %c2_i32_2 : i32 to vector<144x128xi32>
    %7 = arith.cmpi sge, %5, %6 : vector<144x128xi32>
    %cst = arith.constant 0.000000e+00 : f32
    %8 = vector.broadcast %cst : f32 to vector<144x128xf32>
    %9 = arith.select %7, %3, %8 : vector<144x128xi1>, vector<144x128xf32>
    %10 = arith.truncf %9 : vector<144x128xf32> to vector<144x128xbf16>
    %c1_i32 = arith.constant 1 : i32
    %11 = tpu.dynamic_rotate %2 by %c1_i32 dim 0 : vector<144x128xf32>, i32 -> vector<144x128xf32>
    %c1_i32_3 = arith.constant 1 : i32
    %12 = vector.broadcast %c1_i32_3 : i32 to vector<144x128xi32>
    %13 = arith.cmpi sge, %5, %12 : vector<144x128xi32>
    %cst_4 = arith.constant 0.000000e+00 : f32
    %14 = vector.broadcast %cst_4 : f32 to vector<144x128xf32>
    %15 = arith.select %13, %11, %14 : vector<144x128xi1>, vector<144x128xf32>
    %16 = arith.truncf %15 : vector<144x128xf32> to vector<144x128xbf16>
    %17 = arith.truncf %2 : vector<144x128xf32> to vector<144x128xbf16>
    %18 = tpu.concatenate %10, %16, %17 in 1 : vector<144x128xbf16>, vector<144x128xbf16>, vector<144x128xbf16> -> vector<144x384xbf16>
    %c0_5 = arith.constant 0 : index
    %c0_6 = arith.constant 0 : index
    %19 = vector.load %arg2[%c0_5, %c0_6] : memref<384x256xbf16, #tpu.memory_space<vmem>>, vector<384x256xbf16>
    %c0_7 = arith.constant 0 : index
    %c0_8 = arith.constant 0 : index
    %20 = vector.load %arg3[%c0_7, %c0_8] : memref<1x128xf32, #tpu.memory_space<vmem>>, vector<1x128xf32>
    %c0_9 = arith.constant 0 : index
    %c0_10 = arith.constant 0 : index
    %21 = vector.load %arg4[%c0_9, %c0_10] : memref<1x128xf32, #tpu.memory_space<vmem>>, vector<1x128xf32>
    %c0_11 = arith.constant 0 : index
    %c0_12 = arith.constant 0 : index
    %22 = vector.load %arg5[%c0_11, %c0_12] : memref<384x128xbf16, #tpu.memory_space<vmem>>, vector<384x128xbf16>
    %c0_13 = arith.constant 0 : index
    %c0_14 = arith.constant 0 : index
    %23 = vector.load %arg6[%c0_13, %c0_14] : memref<1x128xf32, #tpu.memory_space<vmem>>, vector<1x128xf32>
    %cst_15 = arith.constant dense<0.000000e+00> : vector<144x256xf32>
    %24 = tpu.matmul %18, %19, %cst_15 {dimension_numbers = #tpu.dot_dimension_numbers<[1], [0], [0], [1], [0, 0, 1, 1], [], []>} : vector<144x384xbf16>, vector<384x256xbf16>, vector<144x256xf32> -> vector<144x256xf32>
    %25 = vector.extract_strided_slice %24 {offsets = [0, 0], sizes = [144, 128], strides = [1, 1]} : vector<144x256xf32> to vector<144x128xf32>
    %26 = vector.extract_strided_slice %24 {offsets = [0, 128], sizes = [144, 128], strides = [1, 1]} : vector<144x256xf32> to vector<144x128xf32>
    %27 = vector.broadcast %21 : vector<1x128xf32> to vector<144x128xf32>
    %28 = arith.addf %26, %27 : vector<144x128xf32>
    %29 = vector.broadcast %20 : vector<1x128xf32> to vector<144x128xf32>
    %30 = arith.addf %25, %29 : vector<144x128xf32>
    %cst_16 = arith.constant 0.000000e+00 : f32
    %31 = vector.broadcast %cst_16 : f32 to vector<144x128xf32>
    %32 = arith.maximumf %30, %31 : vector<144x128xf32>
    %c2_i32_17 = arith.constant 2 : i32
    %33 = tpu.dynamic_rotate %32 by %c2_i32_17 dim 0 : vector<144x128xf32>, i32 -> vector<144x128xf32>
    %cst_18 = arith.constant 0.000000e+00 : f32
    %34 = vector.broadcast %cst_18 : f32 to vector<144x128xf32>
    %35 = arith.select %7, %33, %34 : vector<144x128xi1>, vector<144x128xf32>
    %36 = arith.truncf %35 : vector<144x128xf32> to vector<144x128xbf16>
    %c1_i32_19 = arith.constant 1 : i32
    %37 = tpu.dynamic_rotate %32 by %c1_i32_19 dim 0 : vector<144x128xf32>, i32 -> vector<144x128xf32>
    %cst_20 = arith.constant 0.000000e+00 : f32
    %38 = vector.broadcast %cst_20 : f32 to vector<144x128xf32>
    %39 = arith.select %13, %37, %38 : vector<144x128xi1>, vector<144x128xf32>
    %40 = arith.truncf %39 : vector<144x128xf32> to vector<144x128xbf16>
    %41 = arith.truncf %32 : vector<144x128xf32> to vector<144x128xbf16>
    %42 = tpu.concatenate %36, %40, %41 in 1 : vector<144x128xbf16>, vector<144x128xbf16>, vector<144x128xbf16> -> vector<144x384xbf16>
    %cst_21 = arith.constant dense<0.000000e+00> : vector<144x128xf32>
    %43 = tpu.matmul %42, %22, %cst_21 {dimension_numbers = #tpu.dot_dimension_numbers<[1], [0], [0], [1], [0, 0, 1, 1], [], []>} : vector<144x384xbf16>, vector<384x128xbf16>, vector<144x128xf32> -> vector<144x128xf32>
    %44 = vector.broadcast %23 : vector<1x128xf32> to vector<144x128xf32>
    %45 = arith.addf %43, %44 : vector<144x128xf32>
    %cst_22 = arith.constant 0.000000e+00 : f32
    %46 = vector.broadcast %cst_22 : f32 to vector<144x128xf32>
    %47 = arith.maximumf %45, %46 : vector<144x128xf32>
    %48 = arith.addf %47, %28 : vector<144x128xf32>
    %cst_23 = arith.constant 0.000000e+00 : f32
    %49 = vector.broadcast %cst_23 : f32 to vector<144x128xf32>
    %50 = arith.maximumf %48, %49 : vector<144x128xf32>
    %c4_i32 = arith.constant 4 : i32
    %51 = tpu.dynamic_rotate %50 by %c4_i32 dim 0 : vector<144x128xf32>, i32 -> vector<144x128xf32>
    %c4_i32_24 = arith.constant 4 : i32
    %52 = vector.broadcast %c4_i32_24 : i32 to vector<144x128xi32>
    %53 = arith.cmpi sge, %5, %52 : vector<144x128xi32>
    %cst_25 = arith.constant 0.000000e+00 : f32
    %54 = vector.broadcast %cst_25 : f32 to vector<144x128xf32>
    %55 = arith.select %53, %51, %54 : vector<144x128xi1>, vector<144x128xf32>
    %56 = arith.truncf %55 : vector<144x128xf32> to vector<144x128xbf16>
    %c2_i32_26 = arith.constant 2 : i32
    %57 = tpu.dynamic_rotate %50 by %c2_i32_26 dim 0 : vector<144x128xf32>, i32 -> vector<144x128xf32>
    %cst_27 = arith.constant 0.000000e+00 : f32
    %58 = vector.broadcast %cst_27 : f32 to vector<144x128xf32>
    %59 = arith.select %7, %57, %58 : vector<144x128xi1>, vector<144x128xf32>
    %60 = arith.truncf %59 : vector<144x128xf32> to vector<144x128xbf16>
    %61 = arith.truncf %50 : vector<144x128xf32> to vector<144x128xbf16>
    %62 = tpu.concatenate %56, %60, %61 in 1 : vector<144x128xbf16>, vector<144x128xbf16>, vector<144x128xbf16> -> vector<144x384xbf16>
    %c0_28 = arith.constant 0 : index
    %c0_29 = arith.constant 0 : index
    %63 = vector.load %arg7[%c0_28, %c0_29] : memref<384x128xbf16, #tpu.memory_space<vmem>>, vector<384x128xbf16>
    %c0_30 = arith.constant 0 : index
    %c0_31 = arith.constant 0 : index
    %64 = vector.load %arg8[%c0_30, %c0_31] : memref<1x128xf32, #tpu.memory_space<vmem>>, vector<1x128xf32>
    %c0_32 = arith.constant 0 : index
    %c0_33 = arith.constant 0 : index
    %65 = vector.load %arg9[%c0_32, %c0_33] : memref<384x128xbf16, #tpu.memory_space<vmem>>, vector<384x128xbf16>
    %c0_34 = arith.constant 0 : index
    %c0_35 = arith.constant 0 : index
    %66 = vector.load %arg10[%c0_34, %c0_35] : memref<1x128xf32, #tpu.memory_space<vmem>>, vector<1x128xf32>
    %cst_36 = arith.constant dense<0.000000e+00> : vector<144x128xf32>
    %67 = tpu.matmul %62, %63, %cst_36 {dimension_numbers = #tpu.dot_dimension_numbers<[1], [0], [0], [1], [0, 0, 1, 1], [], []>} : vector<144x384xbf16>, vector<384x128xbf16>, vector<144x128xf32> -> vector<144x128xf32>
    %68 = vector.broadcast %64 : vector<1x128xf32> to vector<144x128xf32>
    %69 = arith.addf %67, %68 : vector<144x128xf32>
    %cst_37 = arith.constant 0.000000e+00 : f32
    %70 = vector.broadcast %cst_37 : f32 to vector<144x128xf32>
    %71 = arith.maximumf %69, %70 : vector<144x128xf32>
    %c4_i32_38 = arith.constant 4 : i32
    %72 = tpu.dynamic_rotate %71 by %c4_i32_38 dim 0 : vector<144x128xf32>, i32 -> vector<144x128xf32>
    %cst_39 = arith.constant 0.000000e+00 : f32
    %73 = vector.broadcast %cst_39 : f32 to vector<144x128xf32>
    %74 = arith.select %53, %72, %73 : vector<144x128xi1>, vector<144x128xf32>
    %75 = arith.truncf %74 : vector<144x128xf32> to vector<144x128xbf16>
    %c2_i32_40 = arith.constant 2 : i32
    %76 = tpu.dynamic_rotate %71 by %c2_i32_40 dim 0 : vector<144x128xf32>, i32 -> vector<144x128xf32>
    %cst_41 = arith.constant 0.000000e+00 : f32
    %77 = vector.broadcast %cst_41 : f32 to vector<144x128xf32>
    %78 = arith.select %7, %76, %77 : vector<144x128xi1>, vector<144x128xf32>
    %79 = arith.truncf %78 : vector<144x128xf32> to vector<144x128xbf16>
    %80 = arith.truncf %71 : vector<144x128xf32> to vector<144x128xbf16>
    %81 = tpu.concatenate %75, %79, %80 in 1 : vector<144x128xbf16>, vector<144x128xbf16>, vector<144x128xbf16> -> vector<144x384xbf16>
    %cst_42 = arith.constant dense<0.000000e+00> : vector<144x128xf32>
    %82 = tpu.matmul %81, %65, %cst_42 {dimension_numbers = #tpu.dot_dimension_numbers<[1], [0], [0], [1], [0, 0, 1, 1], [], []>} : vector<144x384xbf16>, vector<384x128xbf16>, vector<144x128xf32> -> vector<144x128xf32>
    %83 = vector.broadcast %66 : vector<1x128xf32> to vector<144x128xf32>
    %84 = arith.addf %82, %83 : vector<144x128xf32>
    %cst_43 = arith.constant 0.000000e+00 : f32
    %85 = vector.broadcast %cst_43 : f32 to vector<144x128xf32>
    %86 = arith.maximumf %84, %85 : vector<144x128xf32>
    %87 = arith.addf %86, %50 : vector<144x128xf32>
    %cst_44 = arith.constant 0.000000e+00 : f32
    %88 = vector.broadcast %cst_44 : f32 to vector<144x128xf32>
    %89 = arith.maximumf %87, %88 : vector<144x128xf32>
    %90 = vector.shape_cast %89 : vector<144x128xf32> to vector<3x48x128xf32>
    %91 = vector.shape_cast %5 : vector<144x128xi32> to vector<3x48x128xi32>
    %c45_i32 = arith.constant 45 : i32
    %92 = vector.broadcast %c45_i32 : i32 to vector<3x48x128xi32>
    %93 = arith.cmpi slt, %91, %92 : vector<3x48x128xi32>
    %cst_45 = arith.constant 0.000000e+00 : f32
    %94 = vector.broadcast %cst_45 : f32 to vector<3x48x128xf32>
    %95 = arith.select %93, %90, %94 : vector<3x48x128xi1>, vector<3x48x128xf32>
    %cst_46 = arith.constant dense<0xFF800000> : vector<3x128xf32>
    %96 = vector.multi_reduction <maximumf>, %95, %cst_46 [1] : vector<3x48x128xf32> to vector<3x128xf32>
    %cst_47 = arith.constant dense<0.000000e+00> : vector<3x128xf32>
    %97 = vector.multi_reduction <add>, %95, %cst_47 [1] : vector<3x48x128xf32> to vector<3x128xf32>
    %cst_48 = arith.constant 0.0222222228 : f32
    %98 = vector.broadcast %cst_48 : f32 to vector<3x128xf32>
    %99 = arith.mulf %97, %98 : vector<3x128xf32>
    %100 = arith.addf %96, %99 : vector<3x128xf32>
    %c0_49 = arith.constant 0 : index
    %c0_50 = arith.constant 0 : index
    %c0_51 = arith.constant 0 : index
    %101 = vector.load %arg11[%c0_49, %c0_50, %c0_51] : memref<1x3x128xf32, #tpu.memory_space<vmem>>, vector<1x3x128xf32>
    %102 = vector.shape_cast %101 : vector<1x3x128xf32> to vector<3x128xf32>
    %103 = vector.shape_cast %100 : vector<3x128xf32> to vector<1x3x128xf32>
    tpu.vector_store %arg11[%c0_49, %c0_50, %c0_51], %103 {strides = array<i32>} : memref<1x3x128xf32, #tpu.memory_space<vmem>>, vector<1x3x128xf32>,
    return
  }
  func.func @transform_0(%arg0: i32) -> (i32, i32, i32) {
    %c0_i32 = arith.constant 0 : i32
    %c0_i32_0 = arith.constant 0 : i32
    %c0_i32_1 = arith.constant 0 : i32
    return %arg0, %c0_i32, %c0_i32_0 : i32, i32, i32
  }
  func.func @transform_1(%arg0: i32) -> (i32, i32) {
    %c0_i32 = arith.constant 0 : i32
    %c0_i32_0 = arith.constant 0 : i32
    %c0_i32_1 = arith.constant 0 : i32
    return %c0_i32, %c0_i32_0 : i32, i32
  }
  func.func @transform_2(%arg0: i32) -> (i32, i32) {
    %c0_i32 = arith.constant 0 : i32
    %c0_i32_0 = arith.constant 0 : i32
    %c0_i32_1 = arith.constant 0 : i32
    return %c0_i32, %c0_i32_0 : i32, i32
  }
  func.func @transform_3(%arg0: i32) -> (i32, i32) {
    %c0_i32 = arith.constant 0 : i32
    %c0_i32_0 = arith.constant 0 : i32
    %c0_i32_1 = arith.constant 0 : i32
    return %c0_i32, %c0_i32_0 : i32, i32
  }
  func.func @transform_4(%arg0: i32) -> (i32, i32) {
    %c0_i32 = arith.constant 0 : i32
    %c0_i32_0 = arith.constant 0 : i32
    %c0_i32_1 = arith.constant 0 : i32
    return %c0_i32, %c0_i32_0 : i32, i32
  }
  func.func @transform_5(%arg0: i32) -> (i32, i32) {
    %c0_i32 = arith.constant 0 : i32
    %c0_i32_0 = arith.constant 0 : i32
    %c0_i32_1 = arith.constant 0 : i32
    return %c0_i32, %c0_i32_0 : i32, i32
  }
  func.func @transform_6(%arg0: i32) -> (i32, i32) {
    %c0_i32 = arith.constant 0 : i32
    %c0_i32_0 = arith.constant 0 : i32
    %c0_i32_1 = arith.constant 0 : i32
    return %c0_i32, %c0_i32_0 : i32, i32
  }
  func.func @transform_7(%arg0: i32) -> (i32, i32) {
    %c0_i32 = arith.constant 0 : i32
    %c0_i32_0 = arith.constant 0 : i32
    %c0_i32_1 = arith.constant 0 : i32
    return %c0_i32, %c0_i32_0 : i32, i32
  }
  func.func @transform_8(%arg0: i32) -> (i32, i32) {
    %c0_i32 = arith.constant 0 : i32
    %c0_i32_0 = arith.constant 0 : i32
    %c0_i32_1 = arith.constant 0 : i32
    return %c0_i32, %c0_i32_0 : i32, i32
  }
  func.func @transform_9(%arg0: i32) -> (i32, i32) {
    %c0_i32 = arith.constant 0 : i32
    %c0_i32_0 = arith.constant 0 : i32
    %c0_i32_1 = arith.constant 0 : i32
    return %c0_i32, %c0_i32_0 : i32, i32
  }
  func.func @transform_10(%arg0: i32) -> (i32, i32, i32) {
    %c0_i32 = arith.constant 0 : i32
    %c0_i32_0 = arith.constant 0 : i32
    %c0_i32_1 = arith.constant 0 : i32
    return %arg0, %c0_i32, %c0_i32_0 : i32, i32, i32
  }
}

</mosaic_0001>

<bundles_post_ra>
// kernel: tpu_custom_call.1
= control target key start
LH: loop header
LB: loop body
LE: loop exit
PB: predicated region body
PF: predicated region fallthrough
CT: control target
= control target key end

     0   :  { %s6119_s0 = inlined_call_operand.hbm [shape: bf16[2,144,128], index: 0, kind: input, shape index: {}]   ;;  %s6120_s1 = inlined_call_operand.hbm [shape: bf16[384,256], index: 1, kind: input, shape index: {}]   ;;  %s6121_s2 = inlined_call_operand.vmem [shape: f32[1,128], index: 2, kind: input, shape index: {}]   ;;  %s6122_s3 = inlined_call_operand.vmem [shape: f32[1,128], index: 3, kind: input, shape index: {}]   ;;  %s6123_s4 = inlined_call_operand.hbm [shape: bf16[384,128], index: 4, kind: input, shape index: {}]   ;;  %s6124_s5 = inlined_call_operand.vmem [shape: f32[1,128], index: 5, kind: input, shape index: {}]   ;;  %s6125_s6 = inlined_call_operand.hbm [shape: bf16[384,128], index: 6, kind: input, shape index: {}]   ;;  %s6126_s7 = inlined_call_operand.vmem [shape: f32[1,128], index: 7, kind: input, shape index: {}]   ;;  %s6127_s8 = inlined_call_operand.hbm [shape: bf16[384,128], index: 8, kind: input, shape index: {}]   ;;  %s6128_s9 = inlined_call_operand.vmem [shape: f32[1,128], index: 9, kind: input, shape index: {}]   ;;  %s6129_s10 = inlined_call_operand.vmem [shape: f32[2,3,128], index: 10, kind: output, shape index: {}]  }
   0x1   :  { %6160 = sst [smem:[#allocation33_spill]] %s6126_s7 }
   0x2   :  { %6161 = sst [smem:[#allocation34_spill]] %s6128_s9 }
   0x3   :  { %6162 = sst [smem:[#allocation35_spill]] %s6129_s10 }
   0x4   :  { %15 = vsyncpa [#allocation3], 0 }
   0x5   :  { %17 = vsyncpa [#allocation3 + $0x1], 0 }
   0x6   :  { %18 = vsyncpa [#allocation5], 0 }
   0x7   :  { %19 = vsyncpa [#allocation8], 0  ;;  %s4447_s13 = smov 0   ;;  %s4449_s14 = smov 0  }
   0x8   :  { %s4451_s15 = smov 0   ;;  %s4453_s16 = smov 0  }
   0x9 LB: > { %s4466_s17 = sadd.s32 4294967295, %s4377_s16   ;;  %p45_p0 = scmp.ne.s32.totalorder %s4369_s14, %s4365_s13  ;;  %s4377_s16 = sphi %s4453_s16, %s6303_s16   ;;  %s4373_s15 = sphi %s4451_s15, %s6302_s15   ;;  %s4369_s14 = sphi %s4449_s14, %s6301_s14   ;;  %s4365_s13 = sphi %s4447_s13, %s6300_s13  }
   0xa   : > { %p6130_p1 = scmp.eq.s32.totalorder %s4466_s17, 0  ;;  %p3250_p2 = scmp.ge.s32.totalorder %s4377_s16, 1 }
   0xb   : > { %p271_p3 = scmp.lt.s32.totalorder %s4377_s16, 3  ;;  %s4379_s20 = smov [#allocation4]  }
   0xc   : > { %p4474_p4 = por %p6130_p1, %p45_p0  ;;  %s283_s21 = sshll.u32 %s4379_s20, 4  ;;  %s284_s21 = int_to_ptr.vmem [resolvable:$true] %s283_s21 }
   0xd   : > { %p4478_p5 = pnand %p3250_p2, %p271_p3  ;;  %s4380_s23 = smov [#allocation7]  }
   0xe   : > { %s6163_s18 = scalar_select %p4474_p4, 1, 0 }
   0xf   : > { %s6164_s19 = scalar_select %p4478_p5, 1, 0 }
  0x10   : > { %p3961_p6 = pneg %p4478_p5  ;;  %s318_s24 = sshll.u32 %s4380_s23, 4  ;;  %s319_s24 = int_to_ptr.vmem [resolvable:$true] %s318_s24 }
  0x11   : > { %s4193_s27 = scalar_lea.hbm %s6120_s1, 6144 }
  0x12   : > { %p4486_p7 = pnand %p3961_p6, %p6130_p1  ;;  %p4194_p8 = scmp.ne.s32.totalorder %s6120_s1, %s4193_s27 }
  0x13   : > { %p4200_p12 = scmp.lt.u32.totalorder %s4193_s27, %s6120_s1 }
  0x14   : > { %p4498_p9 = pneg %p4486_p7 }
  0x16   : > { %p4196_p10 = pnand %p4498_p9, %p4194_p8 }
  0x18   : > { %p4197_p11 = pneg %p4196_p10 }
  0x1a   : > { %p4202_p13 = pnand %p4200_p12, %p4197_p11 }
  0x1c   : > { %4205 = shalt.err (!%p4202_p13)
}
  0x1d   : > { %s4206_s13 = scalar_lea.vmem %s284_s21, 6144  ;;  %p4214_p6 = scmp.lt.s32.totalorder %s284_s21, %s284_s21 }
  0x1e   : > { %p4207_p0 = scmp.ne.s32.totalorder %s284_s21, %s4206_s13  ;;  %p4215_p1 = scmp.lt.s32.totalorder %s4206_s13, %s4206_s13 }
  0x20   : > { %p4209_p2 = pnand %p4207_p0, %p4498_p9  ;;  %p4216_p4 = por %p4215_p1, %p4214_p6 }
  0x22   : > { %p4210_p3 = pneg %p4209_p2 }
  0x24   : > { %p4217_p5 = pnand %p4216_p4, %p4210_p3 }
  0x26   : > { %4220 = shalt.err (!%p4217_p5)
}
  0x27   : > { %s4381_s20 = smov 128   ;;  %s4382_s23 = smov 8  }
  0x28   : > { %3964 = dma.hbm_to_vmem [thread:$0]  (!%p4486_p7), %s6120_s1, 6144, %s284_s21, [#allocation5], %s4381_s20, %s4381_s20, %s4382_s23  }
  0x29   : > { %s4383_s27 = smov [#allocation6]   ;;  %s4221_s12 = scalar_lea.hbm %s6125_s6, 3072 }
  0x2a   : > { %s302_s28 = sshll.u32 %s4383_s27, 4  ;;  %p4222_p1 = scmp.ne.s32.totalorder %s6125_s6, %s4221_s12  ;;  %s303_s28 = int_to_ptr.vmem [resolvable:$true] %s302_s28 }
  0x2b   : > { %p4228_p8 = scmp.lt.u32.totalorder %s4221_s12, %s6125_s6 }
  0x2c   : > { %p4224_p4 = pnand %p4222_p1, %p4498_p9 }
  0x2e   : > { %p4225_p5 = pneg %p4224_p4 }
  0x30   : > { %p4230_p10 = pnand %p4228_p8, %p4225_p5 }
  0x32   : > { %4233 = shalt.err (!%p4230_p10)
}
  0x33   : > { %s4234_s21 = scalar_lea.vmem %s319_s24, 3072  ;;  %p4242_p0 = scmp.lt.s32.totalorder %s319_s24, %s319_s24 }
  0x34   : > { %p4235_p11 = scmp.ne.s32.totalorder %s319_s24, %s4234_s21  ;;  %p4243_p2 = scmp.lt.s32.totalorder %s4234_s21, %s4234_s21 }
  0x36   : > { %p4237_p12 = pnand %p4235_p11, %p4498_p9  ;;  %p4244_p3 = por %p4243_p2, %p4242_p0 }
  0x38   : > { %p4238_p13 = pneg %p4237_p12 }
  0x3a   : > { %p4245_p6 = pnand %p4244_p3, %p4238_p13 }
  0x3c   : > { %4248 = shalt.err (!%p4245_p6)
}
  0x3d   : > { %s4384_s10 = smov 64   ;;  %s4385_s20 = smov 4  }
  0x3e   : > { %3970 = dma.hbm_to_vmem [thread:$0]  (!%p4486_p7), %s6125_s6, 3072, %s319_s24, [#allocation8], %s4384_s10, %s4384_s10, %s4385_s20  }
  0x3f   : > { %s4249_s26 = scalar_lea.hbm %s6123_s4, 3072 }
  0x40   : > { %p4250_p1 = scmp.ne.s32.totalorder %s6123_s4, %s4249_s26  ;;  %p4256_p8 = scmp.lt.u32.totalorder %s4249_s26, %s6123_s4 }
  0x42   : > { %p4252_p4 = pnand %p4250_p1, %p4498_p9 }
  0x44   : > { %p4253_p5 = pneg %p4252_p4 }
  0x46   : > { %p4258_p10 = pnand %p4256_p8, %p4253_p5 }
  0x48   : > { %4261 = shalt.err (!%p4258_p10)
}
  0x49   : > { %s4262_s13 = scalar_lea.vmem %s303_s28, 3072  ;;  %p4270_p0 = scmp.lt.s32.totalorder %s303_s28, %s303_s28 }
  0x4a   : > { %p4263_p11 = scmp.ne.s32.totalorder %s303_s28, %s4262_s13  ;;  %p4271_p2 = scmp.lt.s32.totalorder %s4262_s13, %s4262_s13 }
  0x4c   : > { %p4265_p12 = pnand %p4263_p11, %p4498_p9  ;;  %p4272_p3 = por %p4271_p2, %p4270_p0 }
  0x4e   : > { %p4266_p13 = pneg %p4265_p12 }
  0x50   : > { %p4273_p6 = pnand %p4272_p3, %p4266_p13 }
  0x52   : > { %4276 = shalt.err (!%p4273_p6)
}
  0x53   : > { %3967 = dma.hbm_to_vmem [thread:$0]  (!%p4486_p7), %s6123_s4, 3072, %s303_s28, [#allocation5], %s4384_s10, %s4384_s10, %s4385_s20  }
  0x54   : > { %s4386_s7 = smov [#allocation9]   ;;  %s4277_s26 = scalar_lea.hbm %s6127_s8, 3072 }
  0x55   : > { %s334_s9 = sshll.u32 %s4386_s7, 4  ;;  %p4278_p1 = scmp.ne.s32.totalorder %s6127_s8, %s4277_s26  ;;  %s335_s9 = int_to_ptr.vmem [resolvable:$true] %s334_s9 }
  0x56   : > { %p4284_p8 = scmp.lt.u32.totalorder %s4277_s26, %s6127_s8 }
  0x57   : > { %p4280_p4 = pnand %p4278_p1, %p4498_p9 }
  0x59   : > { %p4281_p5 = pneg %p4280_p4 }
  0x5b   : > { %p4286_p10 = pnand %p4284_p8, %p4281_p5 }
  0x5d   : > { %4289 = shalt.err (!%p4286_p10)
}
  0x5e   : > { %s4290_s28 = scalar_lea.vmem %s335_s9, 3072  ;;  %p4298_p0 = scmp.lt.s32.totalorder %s335_s9, %s335_s9 }
  0x5f   : > { %p4291_p11 = scmp.ne.s32.totalorder %s335_s9, %s4290_s28  ;;  %p4299_p2 = scmp.lt.s32.totalorder %s4290_s28, %s4290_s28 }
  0x61   : > { %p4293_p12 = pnand %p4291_p11, %p4498_p9  ;;  %p4300_p3 = por %p4299_p2, %p4298_p0 }
  0x63   : > { %p4294_p13 = pneg %p4293_p12 }
  0x65   : > { %p4301_p6 = pnand %p4300_p3, %p4294_p13 }
  0x67   : > { %4304 = shalt.err (!%p4301_p6)
}
  0x68   : > { %3973 = dma.hbm_to_vmem [thread:$0]  (!%p4486_p7), %s6127_s8, 3072, %s335_s9, [#allocation8], %s4384_s10, %s4384_s10, %s4385_s20  }
  0x69   : > { %s4578_s30 = sadd.s32 1, %s4377_s16   ;;  %s32_s22 = sadd.s32 1, %s4373_s15 }
  0x6a   : > { %s29_s21 = ssub.s32 %s4377_s16, %s4578_s30  ;;  %p39_p9 = scmp.ne.s32.totalorder %s4373_s15, %s4369_s14 }
  0x6b   : > { %p30_p1 = scmp.eq.s32.totalorder %s29_s21, 0  ;;  %p40_p4 = scmp.eq.s32.totalorder %s4377_s16, 0 }
  0x6c   : > { %p3982_p5 = scmp.lt.s32.totalorder %s4377_s16, 2  ;;  %s351_s7 = sand.u32 1, %s4373_s15  }
  0x6d   : > { %s4589_s23 = scalar_select %p30_p1, %s4373_s15, %s32_s22  }
  0x6e   : > { %p41_p8 = por %p40_p4, %p39_p9  ;;  %s3940_s25 = smul.u32 72, %s351_s7 }
  0x6f   : > { %s3941_s26 = smul.u32 1152, %s4377_s16  ;;  %s4603_s16 = scalar_lea.sflag [#allocation3], %s351_s7 }
  0x70   : > { %p4592_p10 = pnand %p3982_p5, %p41_p8  ;;  %s355_s12 = scalar_lea.vmem [#allocation2], %s3940_s25 }
  0x71   : > { %s4599_s11 = scalar_lea.hbm %s6119_s0, %s3941_s26  ;;  %s362_s28 = sshll.u32 %s355_s12, 4  ;;  %s4601_s28 = int_to_ptr.vmem [resolvable:$true] %s362_s28 }
  0x72   : > { %s4305_s13 = scalar_lea.hbm %s4599_s11, 1152  ;;  %p4307_p11 = pneg %p4592_p10 }
  0x73   : > { %p4306_p7 = scmp.ne.s32.totalorder %s4599_s11, %s4305_s13  ;;  %s4310_s21 = scalar_lea.hbm %s6119_s0, 2304 }
  0x74   : > { %p4311_p0 = scmp.lt.u32.totalorder %s4599_s11, %s6119_s0  ;;  %p4312_p2 = scmp.lt.u32.totalorder %s4310_s21, %s4305_s13 }
  0x75   : > { %p4308_p12 = pnand %p4307_p11, %p4306_p7  ;;  %p4314_p6 = scmp.lt.u32.totalorder %s4305_s13, %s4599_s11 }
  0x76   : > { %p4313_p3 = por %p4312_p2, %p4311_p0 }
  0x77   : > { %p4309_p13 = pneg %p4308_p12 }
  0x78   : > { %p4315_p9 = por %p4314_p6, %p4313_p3 }
  0x7a   : > { %p4316_p1 = pnand %p4315_p9, %p4309_p13 }
  0x7c   : > { %4319 = shalt.err (!%p4316_p1)
}
  0x7d   : > { %s4320_s7 = scalar_lea.vmem %s4601_s28, 1152  ;;  %s4387_s25 = smov [#allocation2]  }
  0x7e   : > { %p4321_p4 = scmp.ne.s32.totalorder %s4601_s28, %s4320_s7  ;;  %s4325_s29 = sshll.u32 %s4387_s25, 4  ;;  %s4326_s29 = int_to_ptr.vmem [resolvable:$false] %s4325_s29 }
  0x7f   : > { %s4327_s12 = scalar_lea.vmem %s4326_s29, 2304  ;;  %p4328_p7 = scmp.lt.s32.totalorder %s4601_s28, %s4326_s29 }
  0x80   : > { %p4323_p5 = pnand %p4321_p4, %p4307_p11  ;;  %p4329_p12 = scmp.lt.s32.totalorder %s4327_s12, %s4320_s7 }
  0x82   : > { %p4324_p8 = pneg %p4323_p5  ;;  %p4330_p0 = por %p4329_p12, %p4328_p7 }
  0x84   : > { %p4331_p2 = pnand %p4330_p0, %p4324_p8 }
  0x86   : > { %4334 = shalt.err (!%p4331_p2)
}
  0x87   : > { %3977 = dma.hbm_to_vmem [thread:$0]  (!%p4592_p10), %s4599_s11, 1152, %s4601_s28, %s4603_s16, %s4384_s10, %s4384_s10, %s4385_s20  }
  0x88   : > { %p6168_p11 = scmp.ne.s32.totalorder %s6164_s19, 0 }
  0x8a   : > { %374 = sbr.rel (%p6168_p11) target bundleno = 1561 (0x619), region = 60 }
  0x91   : > { %s376_s13 = sand.u32 1, %s4369_s14   ;;  %p6169_p13 = scmp.ne.s32.totalorder %s6163_s18, 0 }
  0x92   : > { %s3942_s24 = smul.u32 72, %s376_s13  ;;  %s377_s22 = scalar_lea.sflag [#allocation3], %s376_s13 }
  0x94   : > { %s4637_s21 = scalar_lea.vmem [#allocation2], %s3942_s24 }
  0x95   : > { %4352 = dma.done.wait (%p6169_p13), %s377_s22, 1152  }
  0x96   : > { %4354 = vsyncadd (%p6169_p13), %s377_s22, 4294966144  ;;  %p6170_p3 = scmp.eq.s32.totalorder %s4466_s17, 0 }
  0x98   : > { %4356 = dma.done.wait (%p6170_p3), [#allocation5], 9216   ;;  %p6171_p10 = pmov %p6170_p3 }
  0x99   : > { %p6172_p6 = pmov %p6170_p3 }
  0x9a   : > { %4358 = vsyncadd (%p6171_p10), [#allocation5], 4294958080 }
  0x9b   : > { %4360 = dma.done.wait (%p6172_p6), [#allocation8], 6144   ;;  %p6173_p9 = pmov %p6170_p3 }
  0x9c   : > { %v4031_v0 = vld [vmem:[#allocation4 + $0x4] ss:$8 sps:$4 sm:$0xff]   ;;  %v4033_v1 = vld [vmem:[#allocation4] ss:$8 sps:$4 sm:$0xff]   ;;  %v4034_v2 = vld [vmem:[#allocation4 + $0x14] ss:$8 sps:$4 sm:$0xff]   ;;  %v491_v11 = vlaneseq }
  0x9d   : > { %4362 = vsyncadd (%p6173_p9), [#allocation8], 4294961152  ;;  %1013 = vmatprep.subr.bf16.mxu0 %v4031_v0  ;;  %v4036_v3 = vld [vmem:[#allocation4 + $0x10] ss:$8 sps:$4 sm:$0xff]   ;;  %v4037_v4 = vld [vmem:[#allocation4 + $0x24] ss:$8 sps:$4 sm:$0xff]  }
  0x9e   : > { %1014 = vmatpush1.bf16.msra.mxu0 %v4033_v1  ;;  %v4039_v5 = vld [vmem:[#allocation4 + $0x20] ss:$8 sps:$4 sm:$0xff]   ;;  %v4040_v6 = vld [vmem:[#allocation4 + $0x34] ss:$8 sps:$4 sm:$0xff]   ;;  %v4042_v7 = vld [vmem:[#allocation4 + $0x30] ss:$8 sps:$4 sm:$0xff]  }
  0x9f   : > { %1015 = vmatprep.subr.bf16.mxu0 %v4034_v2  ;;  %v4043_v8 = vld [vmem:[#allocation4 + $0x44] ss:$8 sps:$4 sm:$0xff]   ;;  %v4045_v9 = vld [vmem:[#allocation4 + $0x40] ss:$8 sps:$4 sm:$0xff]   ;;  %v4046_v10 = vld [vmem:[#allocation4 + $0x54] ss:$8 sps:$4 sm:$0xff]  }
  0xa0   : > { %v4048_v12 = vld [vmem:[#allocation4 + $0x50] ss:$8 sps:$4 sm:$0xff]   ;;  %v4049_v13 = vld [vmem:[#allocation4 + $0x64] ss:$8 sps:$4 sm:$0xff]   ;;  %v4651_v14 = vshrl.u32 %v491_v11, 7  ;;  %vm4388_vm2 = vmmov 1  }
  0xa1   : > { %v4654_v15 = vld [vmem:[%s4637_s21] sm:$0xff]   ;;  %v4051_v20 = vld [vmem:[#allocation4 + $0x60] ss:$8 sps:$4 sm:$0xff]   ;;  %v4055_v29 = vld [vmem:[#allocation4 + $0x84] ss:$8 sps:$4 sm:$0xff]   ;;  %vm4391_vm7 = vmmov 0  }
  0xa2   : > { %1016 = vmatpush1.bf16.msra.mxu0 %v4036_v3  ;;  %v4657_v16 = vld [vmem:[%s4637_s21 + $0x40] sm:$0xff]   ;;  %v455_v17 = vunpack.c.l.bf16 %v4654_v15  ;;  %v456_v18 = vunpack.c.h.bf16 %v4654_v15  ;;  %vm568_vm0 = vcmp.lt.s32.totalorder %v4651_v14, 1  ;;  %vm587_vm1 = vcmp.ge.s32.totalorder %v4651_v14, 1  ;;  %v4680_v31 = vld [vmem:[%s4637_s21 + $0x8] sm:$0xff]   ;;  %v4686_v35 = vld [vmem:[%s4637_s21 + $0x10] sm:$0xff]   ;;  %s6262_s26 = sld [smem:[#allocation33_spill]] }
  0xa3   : > { %1017 = vmatprep.subr.bf16.mxu0 %v4037_v4  ;;  %v472_v19 = vunpack.c.h.bf16 %v4657_v16  ;;  %v4052_v21 = vld [vmem:[#allocation4 + $0x74] ss:$8 sps:$4 sm:$0xff]   ;;  %v4054_v25 = vld [vmem:[#allocation4 + $0x70] ss:$8 sps:$4 sm:$0xff]   ;;  %vm4675_vm3 = vmpackc.low %vm4388_vm2, %vm587_vm1  ;;  %v457_v34 = vunpack.c.l.bf16 %v4680_v31  ;;  %v458_v36 = vunpack.c.h.bf16 %v4680_v31  ;;  %v459_v40 = vunpack.c.l.bf16 %v4686_v35  ;;  %s6280_s25 = sld [smem:[#allocation34_spill]]  ;;  %p432_p1 = scmp.lt.s32.totalorder %s4466_s17, 1 }
  0xa4   : > { %v550_v22 = vrot.slane %v455_v17, 7  ;;  %v4664_v23 = vrot.slane %v456_v18, 7  ;;  %v4057_v32 = vld [vmem:[#allocation4 + $0x80] ss:$8 sps:$4 sm:$0xff]   ;;  %v4058_v33 = vld [vmem:[#allocation4 + $0x94] ss:$8 sps:$4 sm:$0xff]   ;;  %v460_v44 = vunpack.c.h.bf16 %v4686_v35  ;;  %v471_v2 = vunpack.c.l.bf16 %v4657_v16 }
  0xa5   : > { %v4666_v24 = vrot.slane %v472_v19, 7  ;;  %v4060_v37 = vld [vmem:[#allocation4 + $0x90] ss:$8 sps:$4 sm:$0xff]   ;;  %v4061_v38 = vld [vmem:[#allocation4 + $0xa4] ss:$8 sps:$4 sm:$0xff]   ;;  %v4689_v39 = vrot.slane %v455_v17, 6 }
  0xa6   : > { %1018 = vmatpush1.bf16.msra.mxu0 %v4039_v5  ;;  %v585_v26 = vsel %vm568_vm0, %v550_v22, %v4664_v23  ;;  %v4692_v41 = vrot.slane %v456_v18, 6  ;;  %v4694_v42 = vrot.slane %v472_v19, 6  ;;  %v4696_v43 = vrot.slane %v457_v34, 7  ;;  %v4700_v45 = vld [vmem:[%s4637_s21 + $0x18] sm:$0xff]   ;;  %v4705_v48 = vld [vmem:[%s4637_s21 + $0x20] sm:$0xff]   ;;  %s6305_s17 = smov (!%p432_p1, %s4466_s17), 1 }
  0xa7   : > { %1019 = vmatprep.subr.bf16.mxu0 %v4040_v6  ;;  %v586_v27 = vsel %vm568_vm0, %v4666_v24, %v550_v22  ;;  %v4063_v46 = vld [vmem:[#allocation4 + $0xa0] ss:$8 sps:$4 sm:$0xff]   ;;  %v4702_v47 = vrot.slane %v458_v36, 7  ;;  %v4064_v49 = vld [vmem:[#allocation4 + $0xb4] ss:$8 sps:$4 sm:$0xff]   ;;  %v4707_v50 = vrot.slane %v457_v34, 6  ;;  %v461_v53 = vunpack.c.l.bf16 %v4700_v45 }
  0xa8   : > { %v3321_v30 = vpack.c.bf16 %v585_v26, %v586_v27  ;;  %v4709_v51 = vrot.slane %v458_v36, 6  ;;  %v4711_v52 = vrot.slane %v459_v40, 7  ;;  %vm493_vm4 = vcmp.lt.s32.totalorder %v4651_v14, 2  ;;  %v4719_v56 = vld [vmem:[%s4637_s21 + $0x38] sm:$0xff]   ;;  %s3262_s29 = sshll.u32 %s6305_s17, 2  ;;  %s6299_s24 = sld [smem:[#allocation35_spill]] }
  0xa9   : > { %v4715_v54 = vrot.slane %v460_v44, 7  ;;  %v462_v55 = vunpack.c.h.bf16 %v4700_v45  ;;  %v4066_v57 = vld [vmem:[#allocation4 + $0xb0] ss:$8 sps:$4 sm:$0xff]   ;;  %v463_v58 = vunpack.c.l.bf16 %v4705_v48  ;;  %v464_v59 = vunpack.c.h.bf16 %v4705_v48  ;;  %v4067_v60 = vld [vmem:[#allocation4 + $0xc4] ss:$8 sps:$4 sm:$0xff]  }
  0xaa   : > { %1020 = vmatpush1.bf16.msra.mxu0 %v4042_v7  ;;  %3322 = vmatprep.mubr.msk.bf16.mxu0 %vm4675_vm3, %v3321_v30  ;;  %v4723_v61 = vrot.slane %v459_v40, 6  ;;  %v4725_v62 = vrot.slane %v460_v44, 6  ;;  %v4727_v63 = vrot.slane %v461_v53, 7  ;;  %v4729_v0 = vrot.slane %v461_v53, 6  ;;  %v4069_v5 = vld [vmem:[#allocation4 + $0xc0] ss:$8 sps:$4 sm:$0xff]  }
  0xab   : > { %1021 = vmatprep.subr.bf16.mxu0 %v4043_v8  ;;  %v470_v1 = vunpack.c.h.bf16 %v4719_v56  ;;  %vm517_vm5 = vcmp.ge.s32.totalorder %v4651_v14, 2  ;;  %v4734_v3 = vrot.slane %v462_v55, 7  ;;  %v4736_v4 = vrot.slane %v462_v55, 6  ;;  %v4070_v8 = vld [vmem:[#allocation4 + $0xd4] ss:$8 sps:$4 sm:$0xff]  }
  0xac   : > { %v4740_v6 = vrot.slane %v463_v58, 7  ;;  %v4744_v7 = vrot.slane %v464_v59, 7  ;;  %v566_v11 = vrot.slane %v471_v2, 7  ;;  %v4076_v26 = vld [vmem:[#allocation4 + $0xf4] ss:$8 sps:$4 sm:$0xff]   ;;  %vm4777_vm6 = vmpackc.low %vm4388_vm2, %vm517_vm5  ;;  %v583_v34 = vsel %vm568_vm0, %v4696_v43, %v4702_v47 }
  0xad   : > { %v4082_v30 = vld [vmem:[#allocation4 + $0x104] ss:$8 sps:$4 sm:$0xff]   ;;  %v584_v36 = vsel %vm568_vm0, %v4664_v23, %v4696_v43  ;;  %v4085_v40 = vld [vmem:[#allocation4 + $0x114] ss:$8 sps:$4 sm:$0xff]   ;;  %v509_v23 = vsel %vm493_vm4, %v4692_v41, %v4707_v50  ;;  %v581_v43 = vsel %vm568_vm0, %v4711_v52, %v4715_v54  ;;  %v4086_v53 = vld [vmem:[#allocation4 + $0x120] ss:$8 sps:$4 sm:$0xff]  }
  0xae   : > { %1022 = vmatpush1.bf16.msra.mxu0 %v4045_v9  ;;  %v4746_v9 = vrot.slane %v470_v1, 7  ;;  %v4753_v17 = vsel %vm568_vm0, %v566_v11, %v4666_v24  ;;  %v612_v44 = vpack.c.bf16 %v583_v34, %v584_v36  ;;  %v449_v36 = vld [vmem:[%s4637_s21 + $0x30] sm:$0xff]   ;;  %vm1892_vm8 = vcmp.lt.s32.totalorder %v4651_v14, 4  ;;  %s435_s22 = scalar_lea.vmem %s6299_s24, %s3262_s29 }
  0xaf   : > { %1023 = vmatprep.subr.bf16.mxu0 %v4046_v10  ;;  %v4748_v10 = vrot.slane %v470_v1, 6  ;;  %v4089_v1 = vld [vmem:[#allocation4 + $0x130] ss:$8 sps:$4 sm:$0xff]   ;;  %vm1911_vm9 = vcmp.ge.s32.totalorder %v4651_v14, 4  ;;  %vm3140_vm12 = vcmask 1041409   ;;  %vm3142_vm13 = vcmask 1042434  }
  0xb0   : > { %v4758_v18 = vsel %vm568_vm0, %v4746_v9, %v566_v11  ;;  %v4097_v11 = vld [vmem:[#allocation4 + $0x154] ss:$8 sps:$4 sm:$0xff]   ;;  %vm5550_vm10 = vmpackc.low %vm4388_vm2, %vm1911_vm9 }
  0xb2   : > { %1024 = vmatpush1.bf16.msra.mxu0 %v4048_v12  ;;  %v489_v12 = vrot.slane %v471_v2, 6  ;;  %v4094_v2 = vld [vmem:[#allocation4 + $0x144] ss:$8 sps:$4 sm:$0xff]  }
  0xb3   : > { %1025 = vmatprep.subr.bf16.mxu0 %v4049_v13  ;;  %v4072_v13 = vld [vmem:[#allocation4 + $0xd0] ss:$8 sps:$4 sm:$0xff]  }
  0xb4   : > { %v4763_v19 = vsel %vm493_vm4, %v489_v12, %v4694_v42  ;;  %v4770_v22 = vsel %vm493_vm4, %v4748_v10, %v489_v12 }
  0xb5   : > { %v549_v24 = vpack.c.bf16 %v4763_v19, %v4770_v22  ;;  %v4121_v19 = vld [vmem:[#allocation6 + $0x20] sm:$0xff]   ;;  %v4124_v22 = vld [vmem:[#allocation6 + $0x70] sm:$0xff]  }
  0xb6   : > { %1026 = vmatpush1.bf16.msra.mxu0 %v4051_v20  ;;  %v4073_v20 = vld [vmem:[#allocation4 + $0xe4] ss:$8 sps:$4 sm:$0xff]  }
  0xb7   : > { %1027 = vmatprep.subr.bf16.mxu0 %v4052_v21  ;;  %v619_v21 = vpack.c.bf16 %v4753_v17, %v4758_v18  ;;  %v4118_v17 = vld [vmem:[#allocation6 + $0x58] sm:$0xff]  }
  0xb8   : > { %v4119_v18 = vld [vmem:[#allocation6 + $0x18] sm:$0xff]  }
  0xba   : > { %1028 = vmatpush1.bf16.msra.mxu0 %v4054_v25  ;;  %v4075_v25 = vld [vmem:[#allocation4 + $0xe0] ss:$8 sps:$4 sm:$0xff]  }
  0xbb   : > { %1029 = vmatprep.subr.bf16.mxu0 %v4055_v29  ;;  %v4078_v29 = vld [vmem:[#allocation4 + $0xf0] ss:$8 sps:$4 sm:$0xff]  }
  0xbe   : > { %1030 = vmatpush1.bf16.msra.mxu0 %v4057_v32  ;;  %v510_v32 = vsel %vm493_vm4, %v4689_v39, %v4692_v41  ;;  %v481_v41 = vrot.slane %v463_v58, 6  ;;  %v579_v58 = vsel %vm568_vm0, %v4727_v63, %v4734_v3 }
  0xbf   : > { %1031 = vmatprep.subr.bf16.mxu0 %v4058_v33  ;;  %v511_v33 = vsel %vm493_vm4, %v4694_v42, %v4689_v39  ;;  %v4088_v39 = vld [vmem:[#allocation4 + $0x124] ss:$8 sps:$4 sm:$0xff]   ;;  %v508_v42 = vsel %vm493_vm4, %v4707_v50, %v4709_v51  ;;  %v482_v50 = vrot.slane %v464_v59, 6  ;;  %v580_v59 = vsel %vm568_vm0, %v4715_v54, %v4727_v63 }
  0xc0   : > { %v542_v55 = vpack.c.bf16 %v508_v42, %v509_v23  ;;  %v3327_v12 = vpack.c.bf16 %v579_v58, %v580_v59  ;;  %v504_v54 = vsel %vm493_vm4, %v4729_v0, %v4736_v4  ;;  %v505_v63 = vsel %vm493_vm4, %v4725_v62, %v4729_v0 }
  0xc2   : > { %1032 = vmatpush1.bf16.msra.mxu0 %v4060_v37  ;;  %v4080_v37 = vld [vmem:[#allocation4 + $0x100] ss:$8 sps:$4 sm:$0xff]  }
  0xc3   : > { %1033 = vmatprep.subr.bf16.mxu0 %v4061_v38  ;;  %v3324_v38 = vpack.c.bf16 %v510_v32, %v511_v33  ;;  %v3330_v32 = vpack.c.bf16 %v504_v54, %v505_v63  ;;  %v4103_v33 = vld [vmem:[#allocation4 + $0x174] ss:$8 sps:$4 sm:$0xff]  }
  0xc4   : > { %v4127_v63 = vld [vmem:[#allocation6 + $0x38] sm:$0xff]  }
  0xc6   : > { %1034 = vmatpush1.bf16.msra.mxu0 %v4063_v46  ;;  %v4083_v46 = vld [vmem:[#allocation4 + $0x110] ss:$8 sps:$4 sm:$0xff]  }
  0xc7   : > { %1035 = vmatprep.subr.bf16.mxu0 %v4064_v49  ;;  %v582_v49 = vsel %vm568_vm0, %v4702_v47, %v4711_v52  ;;  %v506_v47 = vsel %vm493_vm4, %v4723_v61, %v4725_v62  ;;  %v507_v52 = vsel %vm493_vm4, %v4709_v51, %v4723_v61  ;;  %v4095_v51 = vld [vmem:[#allocation4 + $0x150] ss:$8 sps:$4 sm:$0xff]   ;;  %v4100_v61 = vld [vmem:[#allocation4 + $0x164] ss:$8 sps:$4 sm:$0xff]  }
  0xca   : > { %1036 = vmatpush1.bf16.msra.mxu0 %v4066_v57  ;;  %v4091_v57 = vld [vmem:[#allocation4 + $0x134] ss:$8 sps:$4 sm:$0xff]  }
  0xcb   : > { %1037 = vmatprep.subr.bf16.mxu0 %v4067_v60  ;;  %v613_v60 = vpack.c.bf16 %v581_v43, %v582_v49 }
  0xce   : > { %1038 = vmatpush1.bf16.msra.mxu0 %v4069_v5  ;;  %v4092_v5 = vld [vmem:[#allocation4 + $0x140] ss:$8 sps:$4 sm:$0xff]  }
  0xcf   : > { %1039 = vmatprep.subr.bf16.mxu0 %v4070_v8  ;;  %v543_v8 = vpack.c.bf16 %v506_v47, %v507_v52 }
  0xd2   : > { %1040 = vmatpush1.bf16.msra.mxu0 %v4072_v13  ;;  %v4836_v13 = vld [vmem:[%s4637_s21 + $0x28] sm:$0xff]  }
  0xd3   : > { %1041 = vmatprep.subr.bf16.mxu0 %v4073_v20  ;;  %v577_v20 = vsel %vm568_vm0, %v4740_v6, %v4744_v7 }
  0xd6   : > { %1042 = vmatpush1.bf16.msra.mxu0 %v4075_v25  ;;  %v578_v25 = vsel %vm568_vm0, %v4734_v3, %v4740_v6  ;;  %v502_v3 = vsel %vm493_vm4, %v481_v41, %v482_v50  ;;  %v503_v6 = vsel %vm493_vm4, %v4736_v4, %v481_v41 }
  0xd7   : > { %1043 = vmatprep.subr.bf16.mxu0 %v4076_v26  ;;  %v465_v26 = vunpack.c.l.bf16 %v4836_v13  ;;  %v615_v62 = vpack.c.bf16 %v577_v20, %v578_v25  ;;  %v6133_v20 = vmov 0.0   ;;  %v4917_v25 = vld [vmem:[%s6121_s2] ss:$0 sm:$0xff] }
  0xd9   : > { %v560_v0 = vrot.slane %v465_v26, 7  ;;  %v483_v23 = vrot.slane %v465_v26, 6 }
  0xda   : > { %1044 = vmatpush1.bf16.msra.mxu0 %v4078_v29  ;;  %v466_v29 = vunpack.c.h.bf16 %v4836_v13 }
  0xdb   : > { %1136 = vmatprep.subr.bf16.mxu0 %v4082_v30  ;;  %v4098_v30 = vld [vmem:[#allocation4 + $0x160] ss:$8 sps:$4 sm:$0xff]  }
  0xdc   : > { %v561_v34 = vrot.slane %v466_v29, 7  ;;  %v484_v43 = vrot.slane %v466_v29, 6 }
  0xdd   : > { %3325 = vmatmul.mubr.msk.bf16.vlgmr.msra.gmra.mrb[0].mxu0 %vm4777_vm6, %v3324_v38 }
  0xde   : > { %1137 = vmatpush1.bf16.msra.mxu0 %v4080_v37  ;;  %1055 = vmatprep.mubr.bf16.mxu0 %v612_v44  ;;  %v4101_v37 = vld [vmem:[#allocation4 + $0x170] ss:$8 sps:$4 sm:$0xff]   ;;  %v575_v38 = vsel %vm568_vm0, %v560_v0, %v561_v34  ;;  %v467_v44 = vunpack.c.l.bf16 %v449_v36  ;;  %v500_v4 = vsel %vm493_vm4, %v483_v23, %v484_v43 }
  0xdf   : > { %1138 = vmatprep.subr.bf16.mxu0 %v4085_v40  ;;  %v576_v40 = vsel %vm568_vm0, %v4744_v7, %v560_v0 }
  0xe0   : > { %v616_v42 = vpack.c.bf16 %v575_v38, %v576_v40  ;;  %v562_v49 = vrot.slane %v467_v44, 7 }
  0xe2   : > { %1139 = vmatpush1.bf16.msra.mxu0 %v4083_v46  ;;  %v468_v46 = vunpack.c.h.bf16 %v449_v36 }
  0xe3   : > { %1140 = vmatprep.subr.bf16.mxu0 %v4088_v39  ;;  %v545_v39 = vpack.c.bf16 %v502_v3, %v503_v6 }
  0xe4   : > { %v486_v47 = vrot.slane %v468_v46, 6 }
  0xe5   : > { %1056 = vmatmul.mubr.bf16.gmra.mrb[4].mxu0 %v542_v55  ;;  %v501_v55 = vsel %vm493_vm4, %v482_v50, %v483_v23 }
  0xe6   : > { %1065 = vmatprep.mubr.bf16.mxu0 %v613_v60  ;;  %1141 = vmatpush1.bf16.msra.mxu0 %v4086_v53  ;;  %v563_v53 = vrot.slane %v468_v46, 7  ;;  %v469_v60 = vunpack.c.l.bf16 %v4719_v56 }
  0xe7   : > { %1142 = vmatprep.subr.bf16.mxu0 %v4091_v57  ;;  %v574_v57 = vsel %vm568_vm0, %v561_v34, %v562_v49 }
  0xe8   : > { %v573_v7 = vsel %vm568_vm0, %v562_v49, %v563_v53  ;;  %v564_v52 = vrot.slane %v469_v60, 7 }
  0xe9   : > { %v3333_v41 = vpack.c.bf16 %v573_v7, %v574_v57 }
  0xea   : > { %1143 = vmatpush1.bf16.msra.mxu0 %v4089_v1  ;;  %v546_v1 = vpack.c.bf16 %v500_v4, %v501_v55  ;;  %v571_v59 = vsel %vm568_vm0, %v564_v52, %v4746_v9  ;;  %v4389_v9 = vmov 0  }
  0xeb   : > { %1144 = vmatprep.subr.bf16.mxu0 %v4094_v2  ;;  %v485_v2 = vrot.slane %v467_v44, 6 }
  0xed   : > { %1066 = vmatmul.mubr.bf16.gmra.mrb[8].mxu0 %v543_v8  ;;  %v498_v50 = vsel %vm493_vm4, %v485_v2, %v486_v47  ;;  %v499_v58 = vsel %vm493_vm4, %v484_v43, %v485_v2 }
  0xee   : > { %3328 = vmatprep.mubr.msk.bf16.mxu0 %vm4675_vm3, %v3327_v12  ;;  %1145 = vmatpush1.bf16.msra.mxu0 %v4092_v5  ;;  %v572_v5 = vsel %vm568_vm0, %v563_v53, %v564_v52  ;;  %v3336_v8 = vpack.c.bf16 %v498_v50, %v499_v58  ;;  %v487_v12 = vrot.slane %v469_v60, 6 }
  0xef   : > { %1146 = vmatprep.subr.bf16.mxu0 %v4097_v11  ;;  %v618_v11 = vpack.c.bf16 %v571_v59, %v572_v5 }
  0xf2   : > { %1147 = vmatpush1.bf16.msra.mxu0 %v4095_v51  ;;  %v496_v51 = vsel %vm493_vm4, %v487_v12, %v4748_v10  ;;  %v4117_v10 = vld [vmem:[#allocation6 + $0x10] sm:$0xff]  }
  0xf3   : > { %1148 = vmatprep.subr.bf16.mxu0 %v4100_v61  ;;  %v497_v61 = vsel %vm493_vm4, %v486_v47, %v487_v12 }
  0xf4   : > { %v548_v54 = vpack.c.bf16 %v496_v51, %v497_v61 }
  0xf5   : > { %3331 = vmatmul.mubr.msk.bf16.gmra.mrb[12].mxu0 %vm4777_vm6, %v3330_v32 }
  0xf6   : > { %1085 = vmatprep.mubr.bf16.mxu0 %v615_v62  ;;  %1149 = vmatpush1.bf16.msra.mxu0 %v4098_v30 }
  0xf7   : > { %1150 = vmatprep.subr.bf16.mxu0 %v4103_v33 }
  0xfa   : > { %1151 = vmatpush1.bf16.msra.mxu0 %v4101_v37 }
  0xfb   : > { %3784 = vmatprep.subr.bf16.mxu0 %v6133_v20 }
  0xfd   : > { %1086 = vmatmul.mubr.bf16.gmra.mrb[16].mxu0 %v545_v39 }
  0xfe   : > { %1095 = vmatprep.mubr.bf16.mxu0 %v616_v42 }
 0x105   : > { %1096 = vmatmul.mubr.bf16.gmra.mrb[20].mxu0 %v546_v1 }
 0x106   : > { %3334 = vmatprep.mubr.msk.bf16.mxu0 %vm4675_vm3, %v3333_v41 }
 0x10d   : > { %3337 = vmatmul.mubr.msk.bf16.gmra.mrb[24].mxu0 %vm4777_vm6, %v3336_v8 }
 0x10e   : > { %1115 = vmatprep.mubr.bf16.mxu0 %v618_v11 }
 0x115   : > { %1116 = vmatmul.mubr.bf16.gmra.mrb[28].mxu0 %v548_v54 }
 0x116   : > { %1125 = vmatprep.mubr.bf16.mxu0 %v619_v21  ;;  %v4123_v21 = vld [vmem:[#allocation6 + $0x28] sm:$0xff]  }
 0x11d   : > { %1126 = vmatmul.mubr.bf16.gmra.mrb[32].mxu0 %v549_v24  ;;  %v4125_v24 = vld [vmem:[#allocation6 + $0x30] sm:$0xff]  }
 0x11e   : > { %1168 = vmatprep.mubr.bf16.mxu0 %v4389_v9 }
 0x125   : > { %1169 = vmatmul.mubr.bf16.vlgmr.msra.gmra.mrb[0].mxu0 %v4654_v15  ;;  %v4112_v15 = vld [vmem:[#allocation6 + $0x40] sm:$0xff]  }
 0x126   : > { %1178 = vmatprep.mubr.bf16.mxu0 %v4389_v9  ;;  %3471 = vmatprep.subr.bf16.mxu1 %v4112_v15 }
 0x12d   : > { %1179 = vmatmul.mubr.bf16.gmra.mrb[4].mxu0 %v4680_v31  ;;  %v4113_v31 = vld [vmem:[#allocation6] sm:$0xff]  }
 0x12e   : > { %1188 = vmatprep.mubr.bf16.mxu0 %v4389_v9  ;;  %3472 = vmatpush3.bf16.msra.mxu1 %v4113_v31 }
 0x135   : > { %1189 = vmatmul.mubr.bf16.gmra.mrb[8].mxu0 %v4686_v35  ;;  %v4114_v35 = vld [vmem:[#allocation6 + $0x48] sm:$0xff]  }
 0x136   : > { %1198 = vmatprep.mubr.bf16.mxu0 %v4389_v9  ;;  %3473 = vmatprep.subr.bf16.mxu1 %v4114_v35 }
 0x13d   : > { %1199 = vmatmul.mubr.bf16.gmra.mrb[12].mxu0 %v4700_v45  ;;  %v4115_v45 = vld [vmem:[#allocation6 + $0x8] sm:$0xff]  }
 0x13e   : > { %1208 = vmatprep.mubr.bf16.mxu0 %v4389_v9  ;;  %3474 = vmatpush3.bf16.msra.mxu1 %v4115_v45 }
 0x145   : > { %1209 = vmatmul.mubr.bf16.gmra.mrb[16].mxu0 %v4705_v48  ;;  %v4116_v48 = vld [vmem:[#allocation6 + $0x50] sm:$0xff]  }
 0x146   : > { %1218 = vmatprep.mubr.bf16.mxu0 %v4389_v9  ;;  %3475 = vmatprep.subr.bf16.mxu1 %v4116_v48 }
 0x147   : > { %3476 = vmatpush3.bf16.msra.mxu1 %v4117_v10 }
 0x148   : > { %3477 = vmatprep.subr.bf16.mxu1 %v4118_v17 }
 0x14b   : > { %3478 = vmatpush3.bf16.msra.mxu1 %v4119_v18 }
 0x14d   : > { %1219 = vmatmul.mubr.bf16.gmra.mrb[20].mxu0 %v4836_v13  ;;  %v4126_v13 = vld [vmem:[#allocation6 + $0x78] sm:$0xff]  }
 0x14e   : > { %1228 = vmatprep.mubr.bf16.mxu0 %v4389_v9 }
 0x155   : > { %1229 = vmatmul.mubr.bf16.gmra.mrb[24].mxu0 %v449_v36 }
 0x156   : > { %1238 = vmatprep.mubr.bf16.mxu0 %v4389_v9 }
 0x15d   : > { %1239 = vmatmul.mubr.bf16.gmra.mrb[28].mxu0 %v4719_v56  ;;  %v4120_v56 = vld [vmem:[#allocation6 + $0x60] sm:$0xff]  }
 0x15e   : > { %1248 = vmatprep.mubr.bf16.mxu0 %v4389_v9  ;;  %3479 = vmatprep.subr.bf16.mxu1 %v4120_v56 }
 0x15f   : > { %3480 = vmatpush3.bf16.msra.mxu1 %v4121_v19 }
 0x165   : > { %1249 = vmatmul.mubr.bf16.gmra.mrb[32].mxu0 %v4657_v16  ;;  %v4122_v16 = vld [vmem:[#allocation6 + $0x68] sm:$0xff]  }
 0x166   : > { %3481 = vmatprep.subr.bf16.mxu1 %v4122_v16  ;;  %3800 = vmatprep.mubr.msk.bf16.mxu0 %vm4391_vm7, %v6133_v20 }
 0x167   : > { %3482 = vmatpush3.bf16.msra.mxu1 %v4123_v21 }
 0x168   : > { %3483 = vmatprep.subr.bf16.mxu1 %v4124_v22 }
 0x16b   : > { %3484 = vmatpush3.bf16.msra.mxu1 %v4125_v24 }
 0x16c   : > { %3485 = vmatprep.subr.bf16.mxu1 %v4126_v13 }
 0x16f   : > { %3486 = vmatpush3.bf16.msra.mxu1 %v4127_v63 }
 0x170   : > { %3732 = vmatprep.subr.bf16.mxu1 %v6133_v20 }
 0x1f8   : > { %v1170_v26 = vpop.f32.mrb[0].mxu0 }
 0x1f9   : > { %v1289_v29 = vadd.f32 %v4917_v25, %v1170_v26  ;;  %v4920_v30 = vpop.f32.mrb[1].mxu0 }
 0x1fa   : > { %6178 = vst [vmem:[#allocation13_spill] sm:$0xff] %v4920_v30  ;;  %v1174_v32 = vpop.f32.mrb[2].mxu0 }
 0x1fb   : > { %v4922_v33 = vmax.f32 %v1289_v29, 0.0  ;;  %v1290_v62 = vadd.f32 %v4917_v25, %v1174_v32  ;;  %v4925_v0 = vpop.f32.mrb[3].mxu0 }
 0x1fc   : > { %6179 = vst [vmem:[#allocation14_spill] sm:$0xff] %v4925_v0 }
 0x1fd   : > { %v4927_v34 = vmax.f32 %v1290_v62, 0.0  ;;  %v6135_v36 = vrot.slane %v4922_v33, 6  ;;  %v6136_v3 = vrot.slane %v4922_v33, 7 }
 0x1ff   : > { %v1326_v6 = vrot.slane %v4927_v34, 6  ;;  %v1389_v37 = vrot.slane %v4927_v34, 7 }
 0x200   : > { %v1180_v40 = vpop.f32.mrb[4].mxu0 }
 0x201   : > { %v1291_v44 = vadd.f32 %v4917_v25, %v1180_v40  ;;  %v4936_v46 = vpop.f32.mrb[5].mxu0  ;;  %v4942_v39 = vsel %vm568_vm0, %v6136_v3, %v1389_v37  ;;  %v4948_v42 = vsel %vm493_vm4, %v6135_v36, %v1326_v6 }
 0x202   : > { %6180 = vst [vmem:[#allocation15_spill] sm:$0xff] %v4936_v46  ;;  %v1184_v23 = vpop.f32.mrb[6].mxu0 }
 0x203   : > { %v4950_v43 = vmax.f32 %v1291_v44, 0.0  ;;  %v1292_v49 = vadd.f32 %v4917_v25, %v1184_v23  ;;  %v4953_v53 = vpop.f32.mrb[7].mxu0 }
 0x204   : > { %6181 = vst [vmem:[#allocation16_spill] sm:$0xff] %v4953_v53 }
 0x205   : > { %v1327_v4 = vrot.slane %v4950_v43, 6  ;;  %v1390_v55 = vrot.slane %v4950_v43, 7  ;;  %v4957_v7 = vmax.f32 %v1292_v49, 0.0 }
 0x207   : > { %v1328_v57 = vrot.slane %v4957_v7, 6  ;;  %v1391_v60 = vrot.slane %v4957_v7, 7  ;;  %v4965_v1 = vsel %vm568_vm0, %v1389_v37, %v1390_v55  ;;  %v4969_v41 = vsel %vm493_vm4, %v1326_v6, %v1327_v4 }
 0x208   : > { %v1190_v2 = vpop.f32.mrb[8].mxu0  ;;  %v6214_v28 = vpack.c.bf16 %v4957_v7, %v4950_v43  ;;  %v4136_v7 = vld [vmem:[#allocation7 + $0x80] sm:$0xff]  }
 0x209   : > { %v1293_v52 = vadd.f32 %v4917_v25, %v1190_v2  ;;  %v4974_v50 = vpop.f32.mrb[9].mxu0  ;;  %v4978_v58 = vsel %vm568_vm0, %v1390_v55, %v1391_v60  ;;  %v4982_v59 = vsel %vm493_vm4, %v1327_v4, %v1328_v57  ;;  %3785 = vmatpush3.bf16.msra.mxu0 %v4136_v7 }
 0x20a   : > { %6182 = vst [vmem:[#allocation17_spill] sm:$0xff] %v4974_v50  ;;  %v1194_v5 = vpop.f32.mrb[10].mxu0 }
 0x20b   : > { %v4988_v12 = vmax.f32 %v1293_v52, 0.0  ;;  %v1294_v51 = vadd.f32 %v4917_v25, %v1194_v5  ;;  %v4991_v61 = vpop.f32.mrb[11].mxu0 }
 0x20c   : > { %6183 = vst [vmem:[#allocation18_spill] sm:$0xff] %v4991_v61 }
 0x20d   : > { %v1329_v54 = vrot.slane %v4988_v12, 6  ;;  %v1392_v9 = vrot.slane %v4988_v12, 7  ;;  %v4995_v15 = vmax.f32 %v1294_v51, 0.0 }
 0x20f   : > { %v1330_v31 = vrot.slane %v4995_v15, 6  ;;  %v1393_v35 = vrot.slane %v4995_v15, 7  ;;  %v5001_v45 = vsel %vm568_vm0, %v1391_v60, %v1392_v9  ;;  %v5005_v48 = vsel %vm493_vm4, %v1328_v57, %v1329_v54 }
 0x210   : > { %v1200_v10 = vpop.f32.mrb[12].mxu0 }
 0x211   : > { %v1295_v18 = vadd.f32 %v4917_v25, %v1200_v10  ;;  %v5010_v56 = vpop.f32.mrb[13].mxu0  ;;  %v5014_v19 = vsel %vm568_vm0, %v1392_v9, %v1393_v35  ;;  %v5018_v16 = vsel %vm493_vm4, %v1329_v54, %v1330_v31 }
 0x212   : > { %6184 = vst [vmem:[#allocation19_spill] sm:$0xff] %v5010_v56  ;;  %v1204_v21 = vpop.f32.mrb[14].mxu0 }
 0x213   : > { %v5024_v13 = vmax.f32 %v1295_v18, 0.0  ;;  %v1296_v63 = vadd.f32 %v4917_v25, %v1204_v21  ;;  %v5027_v26 = vpop.f32.mrb[15].mxu0 }
 0x214   : > { %6185 = vst [vmem:[#allocation20_spill] sm:$0xff] %v5027_v26 }
 0x215   : > { %v1331_v29 = vrot.slane %v5024_v13, 6  ;;  %v1394_v32 = vrot.slane %v5024_v13, 7  ;;  %v5031_v62 = vmax.f32 %v1296_v63, 0.0 }
 0x217   : > { %v1332_v6 = vrot.slane %v5031_v62, 6  ;;  %v1395_v37 = vrot.slane %v5031_v62, 7  ;;  %v5037_v40 = vsel %vm568_vm0, %v1393_v35, %v1394_v32  ;;  %v5041_v44 = vsel %vm493_vm4, %v1330_v31, %v1331_v29 }
 0x218   : > { %v1210_v23 = vpop.f32.mrb[16].mxu0 }
 0x219   : > { %v1297_v4 = vadd.f32 %v4917_v25, %v1210_v23  ;;  %v5046_v55 = vpop.f32.mrb[17].mxu0  ;;  %v5050_v57 = vsel %vm568_vm0, %v1394_v32, %v1395_v37  ;;  %v5054_v60 = vsel %vm493_vm4, %v1331_v29, %v1332_v6 }
 0x21a   : > { %6186 = vst [vmem:[#allocation21_spill] sm:$0xff] %v5046_v55  ;;  %v1214_v2 = vpop.f32.mrb[18].mxu0 }
 0x21b   : > { %v5060_v51 = vmax.f32 %v1297_v4, 0.0  ;;  %v1298_v54 = vadd.f32 %v4917_v25, %v1214_v2  ;;  %v5063_v9 = vpop.f32.mrb[19].mxu0 }
 0x21c   : > { %6187 = vst [vmem:[#allocation22_spill] sm:$0xff] %v5063_v9 }
 0x21d   : > { %v1333_v31 = vrot.slane %v5060_v51, 6  ;;  %v1396_v35 = vrot.slane %v5060_v51, 7  ;;  %v5067_v10 = vmax.f32 %v1298_v54, 0.0 }
 0x21f   : > { %v1334_v18 = vrot.slane %v5067_v10, 6  ;;  %v1397_v21 = vrot.slane %v5067_v10, 7  ;;  %v5073_v63 = vsel %vm568_vm0, %v1395_v37, %v1396_v35  ;;  %v5077_v29 = vsel %vm493_vm4, %v1332_v6, %v1333_v31 }
 0x220   : > { %v1220_v32 = vpop.f32.mrb[20].mxu0 }
 0x221   : > { %v1299_v4 = vadd.f32 %v4917_v25, %v1220_v32  ;;  %v5082_v2 = vpop.f32.mrb[21].mxu0  ;;  %v5086_v54 = vsel %vm568_vm0, %v1396_v35, %v1397_v21  ;;  %v5090_v37 = vsel %vm493_vm4, %v1333_v31, %v1334_v18 }
 0x222   : > { %6188 = vst [vmem:[#allocation23_spill] sm:$0xff] %v5082_v2  ;;  %v1224_v49 = vpop.f32.mrb[22].mxu0 }
 0x223   : > { %v5096_v23 = vmax.f32 %v1299_v4, 0.0  ;;  %v1300_v32 = vadd.f32 %v4917_v25, %v1224_v49  ;;  %v5099_v47 = vpop.f32.mrb[23].mxu0 }
 0x224   : > { %6189 = vst [vmem:[#allocation24_spill] sm:$0xff] %v5099_v47 }
 0x225   : > { %v1335_v35 = vrot.slane %v5096_v23, 6  ;;  %v1398_v38 = vrot.slane %v5096_v23, 7  ;;  %v5103_v5 = vmax.f32 %v1300_v32, 0.0 }
 0x227   : > { %v1336_v31 = vrot.slane %v5103_v5, 6  ;;  %v1399_v52 = vrot.slane %v5103_v5, 7  ;;  %v5109_v6 = vsel %vm568_vm0, %v1397_v21, %v1398_v38  ;;  %v5113_v4 = vsel %vm493_vm4, %v1334_v18, %v1335_v35 }
 0x228   : > { %v1230_v49 = vpop.f32.mrb[24].mxu0 }
 0x229   : > { %v1301_v24 = vadd.f32 %v4917_v25, %v1230_v49  ;;  %v5118_v32 = vpop.f32.mrb[25].mxu0  ;;  %v5122_v22 = vsel %vm568_vm0, %v1398_v38, %v1399_v52  ;;  %v5126_v21 = vsel %vm493_vm4, %v1335_v35, %v1336_v31 }
 0x22a   : > { %6190 = vst [vmem:[#allocation25_spill] sm:$0xff] %v5118_v32  ;;  %v1234_v11 = vpop.f32.mrb[26].mxu0 }
 0x22b   : > { %v5132_v17 = vmax.f32 %v1301_v24, 0.0  ;;  %v1302_v49 = vadd.f32 %v4917_v25, %v1234_v11  ;;  %v5135_v8 = vpop.f32.mrb[27].mxu0 }
 0x22c   : > { %6191 = vst [vmem:[#allocation26_spill] sm:$0xff] %v5135_v8 }
 0x22d   : > { %v1337_v38 = vrot.slane %v5132_v17, 6  ;;  %v1400_v36 = vrot.slane %v5132_v17, 7  ;;  %v5139_v3 = vmax.f32 %v1302_v49, 0.0 }
 0x22f   : > { %v1338_v35 = vrot.slane %v5139_v3, 6  ;;  %v1401_v32 = vrot.slane %v5139_v3, 7  ;;  %v5145_v18 = vsel %vm568_vm0, %v1399_v52, %v1400_v36  ;;  %v5149_v24 = vsel %vm493_vm4, %v1336_v31, %v1337_v38 }
 0x230   : > { %v1240_v11 = vpop.f32.mrb[28].mxu0  ;;  %v6219_v43 = vpack.c.bf16 %v5139_v3, %v5132_v17  ;;  %v4137_v3 = vld [vmem:[#allocation7 + $0x88] sm:$0xff]   ;;  %v4138_v17 = vld [vmem:[#allocation7 + $0x90] sm:$0xff]  }
 0x231   : > { %v1303_v8 = vadd.f32 %v4917_v25, %v1240_v11  ;;  %v5154_v49 = vpop.f32.mrb[29].mxu0  ;;  %v5158_v47 = vsel %vm568_vm0, %v1400_v36, %v1401_v32  ;;  %v5162_v52 = vsel %vm493_vm4, %v1337_v38, %v1338_v35 }
 0x232   : > { %6192 = vst [vmem:[#allocation27_spill] sm:$0xff] %v5154_v49  ;;  %v1244_v2 = vpop.f32.mrb[30].mxu0 }
 0x233   : > { %v5168_v20 = vmax.f32 %v1303_v8, 0.0  ;;  %v1304_v11 = vadd.f32 %v4917_v25, %v1244_v2  ;;  %v5171_v49 = vpop.f32.mrb[31].mxu0 }
 0x234   : > { %6193 = vst [vmem:[#allocation28_spill] sm:$0xff] %v5171_v49 }
 0x235   : > { %v1339_v36 = vrot.slane %v5168_v20, 6  ;;  %v1402_v55 = vrot.slane %v5168_v20, 7  ;;  %v5175_v26 = vmax.f32 %v1304_v11, 0.0 }
 0x237   : > { %v1340_v38 = vrot.slane %v5175_v26, 6  ;;  %v1403_v56 = vrot.slane %v5175_v26, 7  ;;  %v5181_v31 = vsel %vm568_vm0, %v1401_v32, %v1402_v55  ;;  %v5185_v8 = vsel %vm493_vm4, %v1338_v35, %v1339_v36 }
 0x238   : > { %v1250_v2 = vpop.f32.mrb[32].mxu0 }
 0x239   : > { %v1305_v49 = vadd.f32 %v4917_v25, %v1250_v2  ;;  %v5190_v11 = vpop.f32.mrb[33].mxu0  ;;  %v1408_v61 = vsel %vm568_vm0, %v1402_v55, %v1403_v56  ;;  %v1345_v50 = vsel %vm493_vm4, %v1339_v36, %v1340_v38 }
 0x23a   : > { %6194 = vst [vmem:[#allocation29_spill] sm:$0xff] %v5190_v11  ;;  %v1254_v32 = vpop.f32.mrb[34].mxu0  ;;  %v1449_v53 = vpack.c.bf16 %v1408_v61, %v5181_v31  ;;  %v1386_v35 = vpack.c.bf16 %v1345_v50, %v5185_v8 }
 0x23b   : > { %v5198_v46 = vmax.f32 %v1305_v49, 0.0  ;;  %v1306_v0 = vadd.f32 %v4917_v25, %v1254_v32  ;;  %v5201_v9 = vpop.f32.mrb[35].mxu0  ;;  %v6198_v49 = vrot.slane %v4922_v33, 7 }
 0x23c   : > { %6196 = vst [vmem:[#allocation31_spill] sm:$0xff] %v5201_v9  ;;  %v4128_v9 = vld [vmem:[#allocation6 + $0x80] sm:$0xff]  }
 0x23d   : > { %6195 = vst [vmem:[#allocation30_spill] sm:$0xff] %v5198_v46  ;;  %v1341_v2 = vrot.slane %v5198_v46, 6  ;;  %v1404_v11 = vrot.slane %v5198_v46, 7  ;;  %v5205_v30 = vmax.f32 %v1306_v0, 0.0  ;;  %v6199_v0 = vrot.slane %v4922_v33, 6 }
 0x23f   : > { %6197 = vst [vmem:[#allocation32_spill] sm:$0xff] %v5205_v30  ;;  %v1342_v55 = vrot.slane %v5205_v30, 6  ;;  %v1405_v36 = vrot.slane %v5205_v30, 7  ;;  %v1407_v61 = vsel %vm568_vm0, %v1403_v56, %v1404_v11  ;;  %v1344_v50 = vsel %vm493_vm4, %v1340_v38, %v1341_v2 }
 0x241   : > { %v1423_v31 = vsel %vm568_vm0, %v1405_v36, %v6198_v49  ;;  %v1360_v8 = vsel %vm493_vm4, %v1342_v55, %v6199_v0  ;;  %v1406_v32 = vsel %vm568_vm0, %v1404_v11, %v1405_v36  ;;  %v1343_v56 = vsel %vm493_vm4, %v1341_v2, %v1342_v55  ;;  %v4129_v11 = vld [vmem:[#allocation6 + $0x88] sm:$0xff]   ;;  %v4131_v36 = vld [vmem:[#allocation6 + $0x98] sm:$0xff]  }
 0x242   : > { %v3366_v38 = vpack.c.bf16 %v4942_v39, %v1423_v31  ;;  %v3369_v25 = vpack.c.bf16 %v4948_v42, %v1360_v8  ;;  %v1450_v46 = vpack.c.bf16 %v1406_v32, %v1407_v61  ;;  %v1387_v30 = vpack.c.bf16 %v1343_v56, %v1344_v50  ;;  %v4130_v39 = vld [vmem:[#allocation6 + $0x90] sm:$0xff]   ;;  %v4154_v50 = vld [vmem:[#allocation7 + $0x68] sm:$0xff]  }
 0x243   : > { %v6200_v49 = vpack.c.bf16 %v4978_v58, %v4965_v1  ;;  %v6201_v2 = vmov 0.0   ;;  %v6202_v42 = vpack.c.bf16 %v4982_v59, %v4969_v41  ;;  %v6203_v55 = vpack.c.bf16 %v5014_v19, %v5001_v45  ;;  %v4132_v1 = vld [vmem:[#allocation6 + $0xa0] sm:$0xff]   ;;  %v4133_v59 = vld [vmem:[#allocation6 + $0xa8] sm:$0xff]   ;;  %v4134_v45 = vld [vmem:[#allocation6 + $0xb0] sm:$0xff]  }
 0x244   : > { %3367 = vmatprep.mubr.msk.bf16.mxu1 %vm4675_vm3, %v3366_v38  ;;  %v6204_v58 = vpack.c.bf16 %v5018_v16, %v5005_v48  ;;  %v6205_v41 = vpack.c.bf16 %v5050_v57, %v5037_v40  ;;  %v6206_v19 = vpack.c.bf16 %v5054_v60, %v5041_v44  ;;  %v6207_v48 = vpack.c.bf16 %v5086_v54, %v5073_v63  ;;  %v4135_v16 = vld [vmem:[#allocation6 + $0xb8] sm:$0xff]   ;;  %v4146_v63 = vld [vmem:[#allocation7 + $0x48] sm:$0xff]   ;;  %v4149_v54 = vld [vmem:[#allocation7 + $0x10] sm:$0xff]  }
 0x245   : > { %3370 = vmatmul.mubr.msk.bf16.vlgmr.msra.gmra.mrb[0].mxu1 %vm4777_vm6, %v3369_v25  ;;  %v6208_v40 = vpack.c.bf16 %v5090_v37, %v5077_v29  ;;  %v6209_v57 = vpack.c.bf16 %v5122_v22, %v5109_v6  ;;  %v6210_v44 = vpack.c.bf16 %v5126_v21, %v5113_v4  ;;  %v6211_v60 = vpack.c.bf16 %v5158_v47, %v5145_v18  ;;  %v4147_v29 = vld [vmem:[#allocation7 + $0x8] sm:$0xff]   ;;  %v4150_v37 = vld [vmem:[#allocation7 + $0x58] sm:$0xff]   ;;  %v4152_v4 = vld [vmem:[#allocation7 + $0x60] sm:$0xff]  }
 0x246   : > { %1650 = vmatprep.mubr.bf16.mxu1 %v6200_v49  ;;  %3733 = vmatpush3.bf16.msra.mxu1 %v4128_v9  ;;  %v6212_v9 = vpack.c.bf16 %v5162_v52, %v5149_v24  ;;  %v6213_v22 = vpack.c.bf16 %v4927_v34, %v4922_v33  ;;  %v6216_v33 = vpack.c.bf16 %v5031_v62, %v5024_v13  ;;  %v6221_v47 = vld [vmem:[#allocation32_spill] sm:$0xff]  ;;  %v4140_v13 = vld [vmem:[#allocation7 + $0xa0] sm:$0xff]   ;;  %v4142_v62 = vld [vmem:[#allocation7 + $0xb0] sm:$0xff]  }
 0x247   : > { %3734 = vmatprep.subr.bf16.mxu1 %v6201_v2  ;;  %v6217_v34 = vpack.c.bf16 %v5067_v10, %v5060_v51  ;;  %3786 = vmatprep.subr.bf16.mxu0 %v6201_v2  ;;  %v4143_v51 = vld [vmem:[#allocation7 + $0x40] sm:$0xff]   ;;  %v4151_v6 = vld [vmem:[#allocation7 + $0x18] sm:$0xff]   ;;  %v4155_v25 = vld [vmem:[#allocation7 + $0x28] sm:$0xff]  }
 0x248   : > { %3787 = vmatpush3.bf16.msra.mxu0 %v4137_v3  ;;  %v4144_v10 = vld [vmem:[#allocation7] sm:$0xff]   ;;  %v4156_v32 = vld [vmem:[#allocation7 + $0x70] sm:$0xff]  }
 0x249   : > { %3788 = vmatprep.subr.bf16.mxu0 %v6201_v2  ;;  %v4153_v21 = vld [vmem:[#allocation7 + $0x20] sm:$0xff]  }
 0x24a   : > { %3735 = vmatpush3.bf16.msra.mxu1 %v4129_v11 }
 0x24b   : > { %3736 = vmatprep.subr.bf16.mxu1 %v6201_v2 }
 0x24c   : > { %3789 = vmatpush3.bf16.msra.mxu0 %v4138_v17 }
 0x24d   : > { %1651 = vmatmul.mubr.bf16.gmra.mrb[4].mxu1 %v6202_v42  ;;  %3790 = vmatprep.subr.bf16.mxu0 %v6201_v2 }
 0x24e   : > { %1658 = vmatprep.mubr.bf16.mxu1 %v6203_v55  ;;  %3737 = vmatpush3.bf16.msra.mxu1 %v4130_v39  ;;  %v4157_v39 = vld [vmem:[#allocation7 + $0x30] sm:$0xff]  }
 0x24f   : > { %3738 = vmatprep.subr.bf16.mxu1 %v6201_v2 }
 0x252   : > { %3739 = vmatpush3.bf16.msra.mxu1 %v4131_v36 }
 0x253   : > { %3740 = vmatprep.subr.bf16.mxu1 %v6201_v2 }
 0x255   : > { %1659 = vmatmul.mubr.bf16.gmra.mrb[8].mxu1 %v6204_v58 }
 0x256   : > { %3373 = vmatprep.mubr.msk.bf16.mxu1 %vm4675_vm3, %v6205_v41  ;;  %3741 = vmatpush3.bf16.msra.mxu1 %v4132_v1 }
 0x257   : > { %3742 = vmatprep.subr.bf16.mxu1 %v6201_v2 }
 0x25a   : > { %3743 = vmatpush3.bf16.msra.mxu1 %v4133_v59  ;;  %v4158_v59 = vld [vmem:[#allocation7 + $0x78] sm:$0xff]  }
 0x25b   : > { %3744 = vmatprep.subr.bf16.mxu1 %v6201_v2 }
 0x25d   : > { %3376 = vmatmul.mubr.msk.bf16.gmra.mrb[12].mxu1 %vm4777_vm6, %v6206_v19 }
 0x25e   : > { %1674 = vmatprep.mubr.bf16.mxu1 %v6207_v48  ;;  %3745 = vmatpush3.bf16.msra.mxu1 %v4134_v45  ;;  %v4159_v45 = vld [vmem:[#allocation7 + $0x38] sm:$0xff]  }
 0x25f   : > { %3746 = vmatprep.subr.bf16.mxu1 %v6201_v2 }
 0x262   : > { %3747 = vmatpush3.bf16.msra.mxu1 %v4135_v16 }
 0x263   : > { %3558 = vmatprep.subr.bf16.mxu1 %v4143_v51 }
 0x265   : > { %1675 = vmatmul.mubr.bf16.gmra.mrb[16].mxu1 %v6208_v40 }
 0x266   : > { %1682 = vmatprep.mubr.bf16.mxu1 %v6209_v57 }
 0x26d   : > { %1683 = vmatmul.mubr.bf16.gmra.mrb[20].mxu1 %v6210_v44 }
 0x26e   : > { %3379 = vmatprep.mubr.msk.bf16.mxu1 %vm4675_vm3, %v6211_v60 }
 0x275   : > { %3382 = vmatmul.mubr.msk.bf16.gmra.mrb[24].mxu1 %vm4777_vm6, %v6212_v9 }
 0x276   : > { %1698 = vmatprep.mubr.bf16.mxu1 %v1449_v53  ;;  %v6220_v53 = vpack.c.bf16 %v5175_v26, %v5168_v20  ;;  %v4139_v20 = vld [vmem:[#allocation7 + $0x98] sm:$0xff]   ;;  %v4141_v26 = vld [vmem:[#allocation7 + $0xa8] sm:$0xff]  }
 0x277   : > { %3791 = vmatpush3.bf16.msra.mxu0 %v4139_v20 }
 0x278   : > { %3792 = vmatprep.subr.bf16.mxu0 %v6201_v2 }
 0x27b   : > { %3793 = vmatpush3.bf16.msra.mxu0 %v4140_v13 }
 0x27c   : > { %3794 = vmatprep.subr.bf16.mxu0 %v6201_v2 }
 0x27d   : > { %1699 = vmatmul.mubr.bf16.gmra.mrb[28].mxu1 %v1386_v35 }
 0x27e   : > { %1706 = vmatprep.mubr.bf16.mxu1 %v1450_v46  ;;  %v6218_v46 = vpack.c.bf16 %v5103_v5, %v5096_v23  ;;  %v4145_v5 = vld [vmem:[#allocation7 + $0xb8] sm:$0xff]   ;;  %v4148_v23 = vld [vmem:[#allocation7 + $0x50] sm:$0xff]  }
 0x27f   : > { %3795 = vmatpush3.bf16.msra.mxu0 %v4141_v26 }
 0x280   : > { %3796 = vmatprep.subr.bf16.mxu0 %v6201_v2 }
 0x283   : > { %3797 = vmatpush3.bf16.msra.mxu0 %v4142_v62 }
 0x284   : > { %3798 = vmatprep.subr.bf16.mxu0 %v6201_v2 }
 0x285   : > { %1707 = vmatmul.mubr.bf16.gmra.mrb[32].mxu1 %v1387_v30  ;;  %v6215_v30 = vpack.c.bf16 %v4995_v15, %v4988_v12  ;;  %v6222_v12 = vld [vmem:[#allocation30_spill] sm:$0xff] }
 0x286   : > { %3748 = vmatprep.mubr.msk.bf16.mxu1 %vm4391_vm7, %v6201_v2  ;;  %v6223_v15 = vpack.c.bf16 %v6221_v47, %v6222_v12 }
 0x287   : > { %3799 = vmatpush3.bf16.msra.mxu0 %v4145_v5 }
 0x288   : > { %3836 = vmatprep.subr.bf16.mxu0 %v6201_v2 }
 0x28d   : > { %3749 = vmatmul.mubr.bf16.vlgmr.msra.gmra.mrb[36].mxu1 %v6213_v22 }
 0x28e   : > { %3752 = vmatprep.mubr.msk.bf16.mxu1 %vm4391_vm7, %v6201_v2  ;;  %3559 = vmatpush3.bf16.msra.mxu1 %v4144_v10 }
 0x28f   : > { %3560 = vmatprep.subr.bf16.mxu1 %v4146_v63 }
 0x292   : > { %3561 = vmatpush3.bf16.msra.mxu1 %v4147_v29 }
 0x293   : > { %3562 = vmatprep.subr.bf16.mxu1 %v4148_v23 }
 0x295   : > { %3753 = vmatmul.mubr.bf16.gmra.mrb[40].mxu1 %v6214_v28 }
 0x296   : > { %3756 = vmatprep.mubr.msk.bf16.mxu1 %vm4391_vm7, %v6201_v2  ;;  %3563 = vmatpush3.bf16.msra.mxu1 %v4149_v54 }
 0x297   : > { %3564 = vmatprep.subr.bf16.mxu1 %v4150_v37 }
 0x29a   : > { %3565 = vmatpush3.bf16.msra.mxu1 %v4151_v6 }
 0x29b   : > { %3566 = vmatprep.subr.bf16.mxu1 %v4152_v4 }
 0x29d   : > { %3757 = vmatmul.mubr.bf16.gmra.mrb[44].mxu1 %v6215_v30 }
 0x29e   : > { %3760 = vmatprep.mubr.msk.bf16.mxu1 %vm4391_vm7, %v6201_v2  ;;  %3567 = vmatpush3.bf16.msra.mxu1 %v4153_v21  ;;  %v5376_v21 = vld [vmem:[%s6124_s5] ss:$0 sm:$0xff] }
 0x29f   : > { %3568 = vmatprep.subr.bf16.mxu1 %v4154_v50 }
 0x2a2   : > { %3569 = vmatpush3.bf16.msra.mxu1 %v4155_v25 }
 0x2a3   : > { %3570 = vmatprep.subr.bf16.mxu1 %v4156_v32 }
 0x2a5   : > { %3761 = vmatmul.mubr.bf16.gmra.mrb[48].mxu1 %v6216_v33 }
 0x2a6   : > { %3764 = vmatprep.mubr.msk.bf16.mxu1 %vm4391_vm7, %v6201_v2  ;;  %3571 = vmatpush3.bf16.msra.mxu1 %v4157_v39 }
 0x2a7   : > { %3572 = vmatprep.subr.bf16.mxu1 %v4158_v59 }
 0x2aa   : > { %3573 = vmatpush3.bf16.msra.mxu1 %v4159_v45 }
 0x2ad   : > { %3765 = vmatmul.mubr.bf16.gmra.mrb[52].mxu1 %v6217_v34 }
 0x2ae   : > { %3768 = vmatprep.mubr.msk.bf16.mxu1 %vm4391_vm7, %v6201_v2 }
 0x2b5   : > { %3769 = vmatmul.mubr.bf16.gmra.mrb[56].mxu1 %v6218_v46 }
 0x2b6   : > { %3772 = vmatprep.mubr.msk.bf16.mxu1 %vm4391_vm7, %v6201_v2 }
 0x2bd   : > { %3773 = vmatmul.mubr.bf16.gmra.mrb[60].mxu1 %v6219_v43 }
 0x2be   : > { %3776 = vmatprep.mubr.msk.bf16.mxu1 %vm4391_vm7, %v6201_v2 }
 0x2c5   : > { %3777 = vmatmul.mubr.bf16.gmra.mrb[64].mxu1 %v6220_v53 }
 0x2c6   : > { %3780 = vmatprep.mubr.msk.bf16.mxu1 %vm4391_vm7, %v6201_v2 }
 0x2cd   : > { %3781 = vmatmul.mubr.bf16.gmra.mrb[68].mxu1 %v6223_v15 }
 0x318   : > { %v3487_v18 = vpop.f32.mrb[0].mxu1 }
 0x319   : > { %v3488_v24 = vpop.f32.mrb[1].mxu1 }
 0x31a   : > { %v5337_v52 = vadd.f32 %v3488_v24, %v3487_v18  ;;  %v3490_v35 = vpop.f32.mrb[2].mxu1  ;;  %v5383_v24 = vld [vmem:[%s6122_s3] ss:$0 sm:$0xff] }
 0x31b   : > { %v3491_v61 = vpop.f32.mrb[3].mxu1 }
 0x31c   : > { %v5339_v31 = vadd.f32 %v3491_v61, %v3490_v35  ;;  %v1645_v18 = vadd.f32 %v5337_v52, %v5376_v21 }
 0x31e   : > { %v1648_v25 = vadd.f32 %v5339_v31, %v5376_v21 }
 0x320   : > { %v3493_v0 = vpop.f32.mrb[4].mxu1 }
 0x321   : > { %v3494_v8 = vpop.f32.mrb[5].mxu1 }
 0x322   : > { %v5341_v56 = vadd.f32 %v3494_v8, %v3493_v0  ;;  %v3496_v38 = vpop.f32.mrb[6].mxu1  ;;  %v6224_v8 = vld [vmem:[#allocation13_spill] sm:$0xff] }
 0x323   : > { %v3497_v49 = vpop.f32.mrb[7].mxu1  ;;  %v1265_v32 = vadd.f32 %v5383_v24, %v6224_v8 }
 0x324   : > { %v5343_v11 = vadd.f32 %v3497_v49, %v3496_v38  ;;  %v1653_v59 = vadd.f32 %v5341_v56, %v5376_v21 }
 0x328   : > { %v3499_v42 = vpop.f32.mrb[8].mxu1 }
 0x329   : > { %v3500_v55 = vpop.f32.mrb[9].mxu1 }
 0x32a   : > { %v5345_v36 = vadd.f32 %v3500_v55, %v3499_v42  ;;  %v3502_v1 = vpop.f32.mrb[10].mxu1  ;;  %v6225_v42 = vld [vmem:[#allocation14_spill] sm:$0xff] }
 0x32b   : > { %v3503_v58 = vpop.f32.mrb[11].mxu1  ;;  %v1266_v52 = vadd.f32 %v5383_v24, %v6225_v42 }
 0x32c   : > { %v5347_v41 = vadd.f32 %v3503_v58, %v3502_v1 }
 0x330   : > { %v3505_v19 = vpop.f32.mrb[12].mxu1 }
 0x331   : > { %v3506_v48 = vpop.f32.mrb[13].mxu1 }
 0x332   : > { %v5349_v16 = vadd.f32 %v3506_v48, %v3505_v19  ;;  %v3508_v40 = vpop.f32.mrb[14].mxu1 }
 0x333   : > { %v3509_v57 = vpop.f32.mrb[15].mxu1 }
 0x334   : > { %v5351_v44 = vadd.f32 %v3509_v57, %v3508_v40  ;;  %v1656_v57 = vadd.f32 %v5343_v11, %v5376_v21  ;;  %v1661_v11 = vadd.f32 %v5345_v36, %v5376_v21 }
 0x338   : > { %v3511_v60 = vpop.f32.mrb[16].mxu1 }
 0x339   : > { %v3512_v9 = vpop.f32.mrb[17].mxu1 }
 0x33a   : > { %v5353_v22 = vadd.f32 %v3512_v9, %v3511_v60  ;;  %v3514_v28 = vpop.f32.mrb[18].mxu1  ;;  %v6228_v9 = vld [vmem:[#allocation15_spill] sm:$0xff] }
 0x33b   : > { %v3515_v30 = vpop.f32.mrb[19].mxu1 }
 0x33c   : > { %v5355_v33 = vadd.f32 %v3515_v30, %v3514_v28  ;;  %v1267_v28 = vadd.f32 %v5383_v24, %v6228_v9 }
 0x340   : > { %v3517_v34 = vpop.f32.mrb[20].mxu1 }
 0x341   : > { %v3518_v46 = vpop.f32.mrb[21].mxu1 }
 0x342   : > { %v5357_v43 = vadd.f32 %v3518_v46, %v3517_v34  ;;  %v3520_v53 = vpop.f32.mrb[22].mxu1 }
 0x343   : > { %v3521_v7 = vpop.f32.mrb[23].mxu1 }
 0x344   : > { %v5359_v47 = vadd.f32 %v3521_v7, %v3520_v53  ;;  %v6229_v7 = vld [vmem:[#allocation16_spill] sm:$0xff] }
 0x348   : > { %v3523_v12 = vpop.f32.mrb[24].mxu1 }
 0x349   : > { %v3524_v15 = vpop.f32.mrb[25].mxu1 }
 0x34a   : > { %v5361_v3 = vadd.f32 %v3524_v15, %v3523_v12  ;;  %v3526_v17 = vpop.f32.mrb[26].mxu1  ;;  %v1268_v12 = vadd.f32 %v5383_v24, %v6229_v7  ;;  %v1680_v7 = vadd.f32 %v5355_v33, %v5376_v21  ;;  %v1685_v33 = vadd.f32 %v5357_v43, %v5376_v21 }
 0x34b   : > { %v3527_v20 = vpop.f32.mrb[27].mxu1 }
 0x34c   : > { %v5363_v13 = vadd.f32 %v3527_v20, %v3526_v17 }
 0x350   : > { %v3529_v26 = vpop.f32.mrb[28].mxu1 }
 0x351   : > { %v3530_v62 = vpop.f32.mrb[29].mxu1 }
 0x352   : > { %v5365_v5 = vadd.f32 %v3530_v62, %v3529_v26  ;;  %v3532_v51 = vpop.f32.mrb[30].mxu1 }
 0x353   : > { %v3533_v10 = vpop.f32.mrb[31].mxu1 }
 0x354   : > { %v5367_v63 = vadd.f32 %v3533_v10, %v3532_v51  ;;  %v1664_v51 = vadd.f32 %v5347_v41, %v5376_v21 }
 0x358   : > { %v3535_v29 = vpop.f32.mrb[32].mxu1 }
 0x359   : > { %v3536_v23 = vpop.f32.mrb[33].mxu1 }
 0x35a   : > { %v5369_v54 = vadd.f32 %v3536_v23, %v3535_v29  ;;  %v3538_v37 = vpop.f32.mrb[34].mxu1 }
 0x35b   : > { %v3539_v6 = vpop.f32.mrb[35].mxu1 }
 0x35c   : > { %v5371_v4 = vadd.f32 %v3539_v6, %v3538_v37  ;;  %v6232_v37 = vld [vmem:[#allocation17_spill] sm:$0xff] }
 0x35d   : > { %v1269_v6 = vadd.f32 %v5383_v24, %v6232_v37 }
 0x360   : > { %v1749_v35 = vpop.f32.mrb[36].mxu1 }
 0x361   : > { %v1750_v61 = vadd.f32 %v1749_v35, %v1645_v18  ;;  %v3750_v50 = vpop.f32.mrb[37].mxu1 }
 0x362   : > { %v1752_v0 = vpop.f32.mrb[38].mxu1  ;;  %v6233_v50 = vld [vmem:[#allocation18_spill] sm:$0xff] }
 0x363   : > { %v1820_v38 = vmax.f32 %v1750_v61, 0.0  ;;  %v1753_v49 = vadd.f32 %v1752_v0, %v1648_v25  ;;  %v3751_v39 = vpop.f32.mrb[39].mxu1  ;;  %v1270_v25 = vadd.f32 %v5383_v24, %v6233_v50 }
 0x365   : > { %v1838_v55 = vadd.f32 %v1820_v38, %v1265_v32  ;;  %v1821_v1 = vmax.f32 %v1753_v49, 0.0  ;;  %v1669_v32 = vadd.f32 %v5349_v16, %v5376_v21 }
 0x367   : > { %v1839_v58 = vadd.f32 %v1821_v1, %v1266_v52  ;;  %v5393_v19 = vmax.f32 %v1838_v55, 0.0  ;;  %v1672_v55 = vadd.f32 %v5351_v44, %v5376_v21  ;;  %v1677_v44 = vadd.f32 %v5353_v22, %v5376_v21 }
 0x368   : > { %v1757_v45 = vpop.f32.mrb[40].mxu1 }
 0x369   : > { %6226 = vst [vmem:[#allocation32_spill] sm:$0xff] %v5393_v19  ;;  %v5395_v31 = vmax.f32 %v1839_v58, 0.0  ;;  %v1758_v48 = vadd.f32 %v1757_v45, %v1653_v59  ;;  %v3754_v40 = vpop.f32.mrb[41].mxu1  ;;  %v6236_v58 = vld [vmem:[#allocation19_spill] sm:$0xff] }
 0x36a   : > { %v1760_v60 = vpop.f32.mrb[42].mxu1  ;;  %v1271_v59 = vadd.f32 %v5383_v24, %v6236_v58 }
 0x36b   : > { %6227 = vst [vmem:[#allocation30_spill] sm:$0xff] %v5395_v31  ;;  %v2007_v30 = vpack.c.bf16 %v5395_v31, %v5393_v19  ;;  %v1822_v34 = vmax.f32 %v1758_v48, 0.0  ;;  %v3755_v46 = vpop.f32.mrb[43].mxu1  ;;  %v1761_v56 = vadd.f32 %v1760_v60, %v1656_v57  ;;  %v6237_v57 = vld [vmem:[#allocation20_spill] sm:$0xff] }
 0x36c   : > { %v1272_v60 = vadd.f32 %v5383_v24, %v6237_v57 }
 0x36d   : > { %v1840_v53 = vadd.f32 %v1822_v34, %v1267_v28  ;;  %3801 = vmatmul.mubr.bf16.vlgmr.msra.gmra.mrb[36].mxu0 %v2007_v30  ;;  %v1823_v15 = vmax.f32 %v1761_v56, 0.0 }
 0x36e   : > { %3804 = vmatprep.mubr.msk.bf16.mxu0 %vm4391_vm7, %v6201_v2 }
 0x36f   : > { %v1841_v17 = vadd.f32 %v1823_v15, %v1268_v12  ;;  %v5411_v10 = vmax.f32 %v1840_v53, 0.0 }
 0x370   : > { %v1765_v20 = vpop.f32.mrb[44].mxu1 }
 0x371   : > { %v1766_v26 = vadd.f32 %v1765_v20, %v1661_v11  ;;  %v3758_v62 = vpop.f32.mrb[45].mxu1  ;;  %6230 = vst [vmem:[#allocation13_spill] sm:$0xff] %v5411_v10  ;;  %v5413_v29 = vmax.f32 %v1841_v17, 0.0  ;;  %v6240_v11 = vld [vmem:[#allocation21_spill] sm:$0xff] }
 0x372   : > { %v1768_v23 = vpop.f32.mrb[46].mxu1  ;;  %v1273_v17 = vadd.f32 %v5383_v24, %v6240_v11 }
 0x373   : > { %6231 = vst [vmem:[#allocation14_spill] sm:$0xff] %v5413_v29  ;;  %v1824_v18 = vmax.f32 %v1766_v26, 0.0  ;;  %v1769_v35 = vadd.f32 %v1768_v23, %v1664_v51  ;;  %v3759_v61 = vpop.f32.mrb[47].mxu1  ;;  %v2008_v36 = vpack.c.bf16 %v5413_v29, %v5411_v10  ;;  %v6241_v51 = vld [vmem:[#allocation22_spill] sm:$0xff] }
 0x374   : > { %v1274_v23 = vadd.f32 %v5383_v24, %v6241_v51 }
 0x375   : > { %v1842_v0 = vadd.f32 %v1824_v18, %v1269_v6  ;;  %v1825_v8 = vmax.f32 %v1769_v35, 0.0  ;;  %3805 = vmatmul.mubr.bf16.gmra.mrb[40].mxu0 %v2008_v36 }
 0x376   : > { %3808 = vmatprep.mubr.msk.bf16.mxu0 %vm4391_vm7, %v6201_v2 }
 0x377   : > { %v1843_v41 = vadd.f32 %v1825_v8, %v1270_v25  ;;  %v5425_v49 = vmax.f32 %v1842_v0, 0.0  ;;  %v1688_v0 = vadd.f32 %v5359_v47, %v5376_v21  ;;  %v1693_v47 = vadd.f32 %v5361_v3, %v5376_v21 }
 0x378   : > { %v1773_v38 = vpop.f32.mrb[48].mxu1 }
 0x379   : > { %6234 = vst [vmem:[#allocation15_spill] sm:$0xff] %v5425_v49  ;;  %v5427_v39 = vmax.f32 %v1843_v41, 0.0  ;;  %v1774_v42 = vadd.f32 %v1773_v38, %v1669_v32  ;;  %v3762_v52 = vpop.f32.mrb[49].mxu1  ;;  %v6244_v41 = vld [vmem:[#allocation23_spill] sm:$0xff] }
 0x37a   : > { %v1776_v1 = vpop.f32.mrb[50].mxu1  ;;  %v1275_v32 = vadd.f32 %v5383_v24, %v6244_v41 }
 0x37b   : > { %6235 = vst [vmem:[#allocation16_spill] sm:$0xff] %v5427_v39  ;;  %v1826_v45 = vmax.f32 %v1774_v42, 0.0  ;;  %v1777_v48 = vadd.f32 %v1776_v1, %v1672_v55  ;;  %v3763_v16 = vpop.f32.mrb[51].mxu1  ;;  %v2009_v40 = vpack.c.bf16 %v5427_v39, %v5425_v49  ;;  %v6245_v55 = vld [vmem:[#allocation24_spill] sm:$0xff] }
 0x37c   : > { %v1276_v1 = vadd.f32 %v5383_v24, %v6245_v55 }
 0x37d   : > { %v1844_v9 = vadd.f32 %v1826_v45, %v1271_v59  ;;  %v1827_v28 = vmax.f32 %v1777_v48, 0.0  ;;  %3809 = vmatmul.mubr.bf16.gmra.mrb[44].mxu0 %v2009_v40 }
 0x37e   : > { %3812 = vmatprep.mubr.msk.bf16.mxu0 %vm4391_vm7, %v6201_v2 }
 0x37f   : > { %v1845_v30 = vadd.f32 %v1827_v28, %v1272_v60  ;;  %v5445_v12 = vmax.f32 %v1844_v9, 0.0  ;;  %v1696_v9 = vadd.f32 %v5363_v13, %v5376_v21  ;;  %v1701_v13 = vadd.f32 %v5365_v5, %v5376_v21 }
 0x380   : > { %v1781_v34 = vpop.f32.mrb[52].mxu1 }
 0x381   : > { %v5441_v46 = vmax.f32 %v1845_v30, 0.0  ;;  %v1782_v56 = vadd.f32 %v1781_v34, %v1677_v44  ;;  %v3766_v53 = vpop.f32.mrb[53].mxu1  ;;  %6239 = vst [vmem:[#allocation18_spill] sm:$0xff] %v5445_v12  ;;  %v6248_v30 = vld [vmem:[#allocation25_spill] sm:$0xff] }
 0x382   : > { %v1784_v15 = vpop.f32.mrb[54].mxu1  ;;  %v1277_v44 = vadd.f32 %v5383_v24, %v6248_v30 }
 0x383   : > { %6238 = vst [vmem:[#allocation17_spill] sm:$0xff] %v5441_v46  ;;  %v1828_v20 = vmax.f32 %v1782_v56, 0.0  ;;  %v1785_v26 = vadd.f32 %v1784_v15, %v1680_v7  ;;  %v3767_v22 = vpop.f32.mrb[55].mxu1  ;;  %v2010_v62 = vpack.c.bf16 %v5441_v46, %v5445_v12  ;;  %v6249_v7 = vld [vmem:[#allocation26_spill] sm:$0xff] }
 0x384   : > { %v1278_v15 = vadd.f32 %v5383_v24, %v6249_v7  ;;  %v1944_v7 = vrot.slane %v5393_v19, 6 }
 0x385   : > { %v1846_v37 = vadd.f32 %v1828_v20, %v1273_v17  ;;  %v1829_v6 = vmax.f32 %v1785_v26, 0.0  ;;  %3813 = vmatmul.mubr.bf16.gmra.mrb[48].mxu0 %v2010_v62 }
 0x386   : > { %3816 = vmatprep.mubr.msk.bf16.mxu0 %vm4391_vm7, %v6201_v2 }
 0x387   : > { %v1847_v18 = vadd.f32 %v1829_v6, %v1274_v23  ;;  %v5457_v61 = vmax.f32 %v1846_v37, 0.0  ;;  %v1704_v23 = vadd.f32 %v5367_v63, %v5376_v21  ;;  %v1709_v63 = vadd.f32 %v5369_v54, %v5376_v21 }
 0x388   : > { %v1789_v35 = vpop.f32.mrb[56].mxu1 }
 0x389   : > { %6242 = vst [vmem:[#allocation19_spill] sm:$0xff] %v5457_v61  ;;  %v5459_v36 = vmax.f32 %v1847_v18, 0.0  ;;  %v1790_v50 = vadd.f32 %v1789_v35, %v1685_v33  ;;  %v3770_v25 = vpop.f32.mrb[57].mxu1  ;;  %v6252_v18 = vld [vmem:[#allocation27_spill] sm:$0xff] }
 0x38a   : > { %v1792_v8 = vpop.f32.mrb[58].mxu1  ;;  %v1279_v33 = vadd.f32 %v5383_v24, %v6252_v18 }
 0x38b   : > { %6243 = vst [vmem:[#allocation20_spill] sm:$0xff] %v5459_v36  ;;  %v1830_v38 = vmax.f32 %v1790_v50, 0.0  ;;  %v1793_v42 = vadd.f32 %v1792_v8, %v1688_v0  ;;  %v3771_v43 = vpop.f32.mrb[59].mxu1  ;;  %v2011_v52 = vpack.c.bf16 %v5459_v36, %v5457_v61  ;;  %v6253_v0 = vld [vmem:[#allocation28_spill] sm:$0xff] }
 0x38c   : > { %v1280_v8 = vadd.f32 %v5383_v24, %v6253_v0  ;;  %v1876_v0 = vrot.slane %v5411_v10, 4 }
 0x38d   : > { %v1848_v58 = vadd.f32 %v1830_v38, %v1275_v32  ;;  %v1831_v59 = vmax.f32 %v1793_v42, 0.0  ;;  %3817 = vmatmul.mubr.bf16.gmra.mrb[52].mxu0 %v2011_v52 }
 0x38e   : > { %3820 = vmatprep.mubr.msk.bf16.mxu0 %vm4391_vm7, %v6201_v2 }
 0x38f   : > { %v1849_v45 = vadd.f32 %v1831_v59, %v1276_v1  ;;  %v5473_v16 = vmax.f32 %v1848_v58, 0.0  ;;  %v1712_v58 = vadd.f32 %v5371_v4, %v5376_v21  ;;  %v1875_v4 = vrot.slane %v5395_v31, 4 }
 0x390   : > { %v1797_v48 = vpop.f32.mrb[60].mxu1  ;;  %v1945_v21 = vrot.slane %v5395_v31, 6 }
 0x391   : > { %6246 = vst [vmem:[#allocation21_spill] sm:$0xff] %v5473_v16  ;;  %v5475_v40 = vmax.f32 %v1849_v45, 0.0  ;;  %v1798_v57 = vadd.f32 %v1797_v48, %v1693_v47  ;;  %v3774_v60 = vpop.f32.mrb[61].mxu1  ;;  %v6256_v45 = vld [vmem:[#allocation29_spill] sm:$0xff] }
 0x392   : > { %v1800_v28 = vpop.f32.mrb[62].mxu1  ;;  %v1281_v47 = vadd.f32 %v5383_v24, %v6256_v45  ;;  %v1950_v45 = vrot.slane %v5445_v12, 6 }
 0x393   : > { %6247 = vst [vmem:[#allocation22_spill] sm:$0xff] %v5475_v40  ;;  %v1832_v34 = vmax.f32 %v1798_v57, 0.0  ;;  %v1801_v56 = vadd.f32 %v1800_v28, %v1696_v9  ;;  %v3775_v3 = vpop.f32.mrb[63].mxu1  ;;  %v2012_v53 = vpack.c.bf16 %v5475_v40, %v5473_v16  ;;  %v6257_v9 = vld [vmem:[#allocation31_spill] sm:$0xff] }
 0x394   : > { %v1282_v28 = vadd.f32 %v5383_v24, %v6257_v9  ;;  %v1874_v24 = vrot.slane %v5393_v19, 4  ;;  %v1881_v9 = vrot.slane %v5441_v46, 4 }
 0x395   : > { %v1850_v11 = vadd.f32 %v1832_v34, %v1277_v44  ;;  %v1833_v17 = vmax.f32 %v1801_v56, 0.0  ;;  %3821 = vmatmul.mubr.bf16.gmra.mrb[56].mxu0 %v2012_v53  ;;  %v1947_v53 = vrot.slane %v5413_v29, 6 }
 0x396   : > { %3824 = vmatprep.mubr.msk.bf16.mxu0 %vm4391_vm7, %v6201_v2 }
 0x397   : > { %v1851_v20 = vadd.f32 %v1833_v17, %v1278_v15  ;;  %v5493_v37 = vmax.f32 %v1850_v11, 0.0 }
 0x398   : > { %v1805_v26 = vpop.f32.mrb[64].mxu1 }
 0x399   : > { %v5489_v22 = vmax.f32 %v1851_v20, 0.0  ;;  %v1806_v62 = vadd.f32 %v1805_v26, %v1701_v13  ;;  %v3778_v51 = vpop.f32.mrb[65].mxu1  ;;  %6251 = vst [vmem:[#allocation24_spill] sm:$0xff] %v5493_v37  ;;  %v1946_v20 = vrot.slane %v5411_v10, 6  ;;  %v1909_v13 = vsel %vm1892_vm8, %v1874_v24, %v1875_v4 }
 0x39a   : > { %v1808_v6 = vpop.f32.mrb[66].mxu1 }
 0x39b   : > { %6250 = vst [vmem:[#allocation23_spill] sm:$0xff] %v5489_v22  ;;  %v1834_v35 = vmax.f32 %v1806_v62, 0.0  ;;  %v1809_v50 = vadd.f32 %v1808_v6, %v1704_v23  ;;  %v3779_v5 = vpop.f32.mrb[67].mxu1  ;;  %v2013_v25 = vpack.c.bf16 %v5489_v22, %v5493_v37  ;;  %v1978_v62 = vsel %vm493_vm4, %v1944_v7, %v1945_v21 }
 0x39c   : > { %v1976_v23 = vsel %vm493_vm4, %v1946_v20, %v1947_v53  ;;  %v1877_v5 = vrot.slane %v5413_v29, 4 }
 0x39d   : > { %v1852_v41 = vadd.f32 %v1834_v35, %v1279_v33  ;;  %v1835_v32 = vmax.f32 %v1809_v50, 0.0  ;;  %3825 = vmatmul.mubr.bf16.gmra.mrb[60].mxu0 %v2013_v25  ;;  %v1977_v35 = vsel %vm493_vm4, %v1945_v21, %v1946_v20  ;;  %v1949_v25 = vrot.slane %v5427_v39, 6 }
 0x39e   : > { %3828 = vmatprep.mubr.msk.bf16.mxu0 %vm4391_vm7, %v6201_v2  ;;  %v1999_v50 = vpack.c.bf16 %v1976_v23, %v1977_v35  ;;  %v1883_v20 = vrot.slane %v5459_v36, 4 }
 0x39f   : > { %v1853_v38 = vadd.f32 %v1835_v32, %v1280_v8  ;;  %v5505_v43 = vmax.f32 %v1852_v41, 0.0  ;;  %v1948_v8 = vrot.slane %v5425_v49, 6  ;;  %v1907_v41 = vsel %vm1892_vm8, %v1876_v0, %v1877_v5 }
 0x3a0   : > { %v1813_v42 = vpop.f32.mrb[68].mxu1 }
 0x3a1   : > { %6254 = vst [vmem:[#allocation25_spill] sm:$0xff] %v5505_v43  ;;  %v5507_v52 = vmax.f32 %v1853_v38, 0.0  ;;  %v1814_v55 = vadd.f32 %v1813_v42, %v1709_v63  ;;  %v3782_v1 = vpop.f32.mrb[69].mxu1  ;;  %v1974_v32 = vsel %vm493_vm4, %v1948_v8, %v1949_v25  ;;  %v1908_v38 = vsel %vm1892_vm8, %v1875_v4, %v1876_v0 }
 0x3a2   : > { %v1816_v59 = vpop.f32.mrb[70].mxu1  ;;  %v1936_v63 = vpack.c.bf16 %v1907_v41, %v1908_v38  ;;  %v1975_v42 = vsel %vm493_vm4, %v1947_v53, %v1948_v8  ;;  %v1879_v1 = vrot.slane %v5427_v39, 4  ;;  %v1884_v0 = vrot.slane %v5473_v16, 4 }
 0x3a3   : > { %6255 = vst [vmem:[#allocation26_spill] sm:$0xff] %v5507_v52  ;;  %v1836_v48 = vmax.f32 %v1814_v55, 0.0  ;;  %v1817_v57 = vadd.f32 %v1816_v59, %v1712_v58  ;;  %v3783_v54 = vpop.f32.mrb[71].mxu1  ;;  %v2014_v60 = vpack.c.bf16 %v5507_v52, %v5505_v43  ;;  %v2000_v55 = vpack.c.bf16 %v1974_v32, %v1975_v42 }
 0x3a4   : > { %v1951_v58 = vrot.slane %v5441_v46, 6  ;;  %v1878_v59 = vrot.slane %v5425_v49, 4  ;;  %v1956_v8 = vrot.slane %v5493_v37, 6  ;;  %v1900_v38 = vsel %vm1892_vm8, %v1883_v20, %v1884_v0 }
 0x3a5   : > { %v1854_v30 = vadd.f32 %v1836_v48, %v1281_v47  ;;  %v1837_v44 = vmax.f32 %v1817_v57, 0.0  ;;  %3829 = vmatmul.mubr.bf16.gmra.mrb[64].mxu0 %v2014_v60  ;;  %v1973_v60 = vsel %vm493_vm4, %v1949_v25, %v1950_v45  ;;  %v1957_v25 = vrot.slane %v5489_v22, 6 }
 0x3a6   : > { %3832 = vmatprep.mubr.msk.bf16.mxu0 %vm4391_vm7, %v6201_v2  ;;  %v1905_v47 = vsel %vm1892_vm8, %v1878_v59, %v1879_v1  ;;  %v1972_v48 = vsel %vm493_vm4, %v1950_v45, %v1951_v58  ;;  %v1906_v57 = vsel %vm1892_vm8, %v1877_v5, %v1878_v59  ;;  %v1885_v5 = vrot.slane %v5475_v40, 4 }
 0x3a7   : > { %v1855_v34 = vadd.f32 %v1837_v44, %v1282_v28  ;;  %v5522_v56 = vmax.f32 %v1854_v30, 0.0  ;;  %v1937_v54 = vpack.c.bf16 %v1905_v47, %v1906_v57  ;;  %v3415_v28 = vpack.c.bf16 %v1972_v48, %v1973_v60 }
 0x3a8   : > { %v1953_v30 = vrot.slane %v5459_v36, 6  ;;  %v1880_v44 = vrot.slane %v5445_v12, 4  ;;  %v1899_v41 = vsel %vm1892_vm8, %v1884_v0, %v1885_v5  ;;  %v1966_v32 = vsel %vm493_vm4, %v1956_v8, %v1957_v25  ;;  %v4171_v0 = vld [vmem:[#allocation9 + $0x8] sm:$0xff]  }
 0x3a9   : > { %6258 = vst [vmem:[#allocation27_spill] sm:$0xff] %v5522_v56  ;;  %v5524_v3 = vmax.f32 %v1855_v34, 0.0  ;;  %v1952_v34 = vrot.slane %v5457_v61, 6  ;;  %v1886_v59 = vrot.slane %v5493_v37, 4  ;;  %v1958_v45 = vrot.slane %v5505_v43, 6 }
 0x3aa   : > { %v1903_v4 = vsel %vm1892_vm8, %v1880_v44, %v1881_v9  ;;  %v1904_v53 = vsel %vm1892_vm8, %v1879_v1, %v1880_v44  ;;  %v1960_v44 = vrot.slane %v5522_v56, 6 }
 0x3ab   : > { %6259 = vst [vmem:[#allocation28_spill] sm:$0xff] %v5524_v3  ;;  %v1891_v15 = vrot.slane %v5524_v3, 4  ;;  %v1961_v11 = vrot.slane %v5524_v3, 6  ;;  %v2015_v17 = vpack.c.bf16 %v5524_v3, %v5522_v56  ;;  %v1970_v21 = vsel %vm493_vm4, %v1952_v34, %v1953_v30 }
 0x3ac   : > { %v1898_v57 = vsel %vm1892_vm8, %v1885_v5, %v1886_v59  ;;  %v1965_v60 = vsel %vm493_vm4, %v1957_v25, %v1958_v45  ;;  %v4168_v5 = vld [vmem:[#allocation9] sm:$0xff]   ;;  %v4170_v25 = vld [vmem:[#allocation9 + $0x48] sm:$0xff]  }
 0x3ad   : > { %v1910_v26 = vsel %vm1892_vm8, %v1891_v15, %v1874_v24  ;;  %v1979_v51 = vsel %vm493_vm4, %v1961_v11, %v1944_v7  ;;  %3833 = vmatmul.mubr.bf16.gmra.mrb[68].mxu0 %v2015_v17  ;;  %v3418_v24 = vpack.c.bf16 %v1903_v4, %v1904_v53  ;;  %v1971_v7 = vsel %vm493_vm4, %v1951_v58, %v1952_v34 }
 0x3ae   : > { %v3412_v6 = vpack.c.bf16 %v1909_v13, %v1910_v26  ;;  %v3409_v18 = vpack.c.bf16 %v1978_v62, %v1979_v51  ;;  %3852 = vmatprep.mubr.msk.bf16.mxu0 %vm4391_vm7, %v6201_v2  ;;  %v2002_v17 = vpack.c.bf16 %v1970_v21, %v1971_v7  ;;  %v1955_v13 = vrot.slane %v5475_v40, 6 }
 0x3af   : > { %v1882_v26 = vrot.slane %v5457_v61, 4  ;;  %v1954_v62 = vrot.slane %v5473_v16, 6  ;;  %v1959_v58 = vrot.slane %v5507_v52, 6  ;;  %v1962_v4 = vsel %vm493_vm4, %v1960_v44, %v1961_v11 }
 0x3b0   : > { %3410 = vmatprep.mubr.msk.bf16.mxu1 %vm4777_vm6, %v3409_v18  ;;  %v1967_v42 = vsel %vm493_vm4, %v1955_v13, %v1956_v8  ;;  %v4172_v8 = vld [vmem:[#allocation9 + $0x50] sm:$0xff]  }
 0x3b1   : > { %3413 = vmatmul.mubr.msk.bf16.vlgmr.msra.gmra.mrb[72].mxu1 %vm5550_vm10, %v3412_v6  ;;  %v1901_v51 = vsel %vm1892_vm8, %v1882_v26, %v1883_v20  ;;  %v1968_v23 = vsel %vm493_vm4, %v1954_v62, %v1955_v13  ;;  %v1902_v6 = vsel %vm1892_vm8, %v1881_v9, %v1882_v26  ;;  %v1969_v35 = vsel %vm493_vm4, %v1953_v30, %v1954_v62  ;;  %v5662_v26 = vld [vmem:[#allocation9 + $0x80] sm:$0xff]   ;;  %v5665_v62 = vld [vmem:[#allocation9 + $0x88] sm:$0xff]  }
 0x3b2   : > { %2304 = vmatprep.mubr.bf16.mxu1 %v1999_v50  ;;  %v1939_v18 = vpack.c.bf16 %v1901_v51, %v1902_v6  ;;  %v2003_v50 = vpack.c.bf16 %v1968_v23, %v1969_v35  ;;  %v3421_v1 = vpack.c.bf16 %v1966_v32, %v1967_v42  ;;  %v1964_v48 = vsel %vm493_vm4, %v1958_v45, %v1959_v58  ;;  %v5670_v51 = vld [vmem:[#allocation9 + $0x90] sm:$0xff]   ;;  %v5678_v23 = vld [vmem:[#allocation9 + $0xa0] sm:$0xff]   ;;  %v5682_v6 = vld [vmem:[#allocation9 + $0xa8] sm:$0xff]  }
 0x3b3   : > { %v2005_v9 = vpack.c.bf16 %v1964_v48, %v1965_v60  ;;  %v1888_v30 = vrot.slane %v5505_v43, 4  ;;  %3837 = vmatpush3.bf16.msra.mxu0 %v5662_v26  ;;  %v5690_v35 = vld [vmem:[#allocation9 + $0xb8] sm:$0xff]   ;;  %v4177_v42 = vld [vmem:[#allocation9 + $0x20] sm:$0xff]   ;;  %v4180_v48 = vld [vmem:[#allocation9 + $0x70] sm:$0xff]  }
 0x3b4   : > { %3838 = vmatprep.subr.bf16.mxu0 %v6201_v2  ;;  %v4174_v32 = vld [vmem:[#allocation9 + $0x58] sm:$0xff]  }
 0x3b7   : > { %3839 = vmatpush3.bf16.msra.mxu0 %v5665_v62 }
 0x3b8   : > { %3840 = vmatprep.subr.bf16.mxu0 %v6201_v2 }
 0x3b9   : > { %2305 = vmatmul.mubr.bf16.gmra.mrb[76].mxu1 %v1936_v63  ;;  %v1940_v63 = vpack.c.bf16 %v1899_v41, %v1900_v38  ;;  %v4173_v41 = vld [vmem:[#allocation9 + $0x10] sm:$0xff]   ;;  %v4175_v38 = vld [vmem:[#allocation9 + $0x18] sm:$0xff]  }
 0x3ba   : > { %2312 = vmatprep.mubr.bf16.mxu1 %v2000_v55  ;;  %v1887_v55 = vrot.slane %v5489_v22, 4 }
 0x3bb   : > { %3841 = vmatpush3.bf16.msra.mxu0 %v5670_v51 }
 0x3bc   : > { %v1897_v47 = vsel %vm1892_vm8, %v1886_v59, %v1887_v55  ;;  %v1896_v21 = vsel %vm1892_vm8, %v1887_v55, %v1888_v30  ;;  %3842 = vmatprep.subr.bf16.mxu0 %v6201_v2 }
 0x3c1   : > { %2313 = vmatmul.mubr.bf16.gmra.mrb[80].mxu1 %v1937_v54  ;;  %v3424_v54 = vpack.c.bf16 %v1897_v47, %v1898_v57 }
 0x3c2   : > { %3416 = vmatprep.mubr.msk.bf16.mxu1 %vm4777_vm6, %v3415_v28  ;;  %v1889_v28 = vrot.slane %v5507_v52, 4 }
 0x3c4   : > { %v1895_v34 = vsel %vm1892_vm8, %v1888_v30, %v1889_v28 }
 0x3c5   : > { %v1942_v53 = vpack.c.bf16 %v1895_v34, %v1896_v21 }
 0x3c9   : > { %3419 = vmatmul.mubr.msk.bf16.gmra.mrb[84].mxu1 %vm5550_vm10, %v3418_v24  ;;  %v1963_v24 = vsel %vm493_vm4, %v1959_v58, %v1960_v44  ;;  %v4179_v58 = vld [vmem:[#allocation9 + $0x28] sm:$0xff]   ;;  %v4182_v44 = vld [vmem:[#allocation9 + $0x78] sm:$0xff]  }
 0x3ca   : > { %2328 = vmatprep.mubr.bf16.mxu1 %v2002_v17  ;;  %v2006_v7 = vpack.c.bf16 %v1962_v4, %v1963_v24  ;;  %v1890_v17 = vrot.slane %v5522_v56, 4  ;;  %v4183_v4 = vld [vmem:[#allocation9 + $0x38] sm:$0xff]  }
 0x3cc   : > { %v1893_v20 = vsel %vm1892_vm8, %v1890_v17, %v1891_v15  ;;  %v1894_v11 = vsel %vm1892_vm8, %v1889_v28, %v1890_v17  ;;  %v5673_v15 = vld [vmem:[#allocation9 + $0x98] sm:$0xff]   ;;  %v4181_v28 = vld [vmem:[#allocation9 + $0x30] sm:$0xff]  }
 0x3cd   : > { %v1943_v13 = vpack.c.bf16 %v1893_v20, %v1894_v11  ;;  %3843 = vmatpush3.bf16.msra.mxu0 %v5673_v15 }
 0x3ce   : > { %3844 = vmatprep.subr.bf16.mxu0 %v6201_v2 }
 0x3d1   : > { %2329 = vmatmul.mubr.bf16.gmra.mrb[88].mxu1 %v1939_v18  ;;  %3845 = vmatpush3.bf16.msra.mxu0 %v5678_v23  ;;  %v5686_v18 = vld [vmem:[#allocation9 + $0xb0] sm:$0xff]  }
 0x3d2   : > { %2336 = vmatprep.mubr.bf16.mxu1 %v2003_v50  ;;  %3846 = vmatprep.subr.bf16.mxu0 %v6201_v2  ;;  %v4167_v50 = vld [vmem:[#allocation9 + $0x40] sm:$0xff]  }
 0x3d3   : > { %3645 = vmatprep.subr.bf16.mxu1 %v4167_v50 }
 0x3d4   : > { %3646 = vmatpush3.bf16.msra.mxu1 %v4168_v5 }
 0x3d5   : > { %3847 = vmatpush3.bf16.msra.mxu0 %v5682_v6  ;;  %3647 = vmatprep.subr.bf16.mxu1 %v4170_v25 }
 0x3d6   : > { %3848 = vmatprep.subr.bf16.mxu0 %v6201_v2 }
 0x3d8   : > { %3648 = vmatpush3.bf16.msra.mxu1 %v4171_v0 }
 0x3d9   : > { %2337 = vmatmul.mubr.bf16.gmra.mrb[92].mxu1 %v1940_v63  ;;  %3849 = vmatpush3.bf16.msra.mxu0 %v5686_v18  ;;  %v4176_v63 = vld [vmem:[#allocation9 + $0x60] sm:$0xff]  }
 0x3da   : > { %3422 = vmatprep.mubr.msk.bf16.mxu1 %vm4777_vm6, %v3421_v1  ;;  %3850 = vmatprep.subr.bf16.mxu0 %v6201_v2  ;;  %v4178_v1 = vld [vmem:[#allocation9 + $0x68] sm:$0xff]  }
 0x3db   : > { %3649 = vmatprep.subr.bf16.mxu1 %v4172_v8 }
 0x3dc   : > { %3650 = vmatpush3.bf16.msra.mxu1 %v4173_v41 }
 0x3dd   : > { %3851 = vmatpush3.bf16.msra.mxu0 %v5690_v35  ;;  %3651 = vmatprep.subr.bf16.mxu1 %v4174_v32 }
 0x3e0   : > { %3652 = vmatpush3.bf16.msra.mxu1 %v4175_v38 }
 0x3e1   : > { %3425 = vmatmul.mubr.msk.bf16.gmra.mrb[96].mxu1 %vm5550_vm10, %v3424_v54  ;;  %3653 = vmatprep.subr.bf16.mxu1 %v4176_v63 }
 0x3e2   : > { %2352 = vmatprep.mubr.bf16.mxu1 %v2005_v9 }
 0x3e4   : > { %3654 = vmatpush3.bf16.msra.mxu1 %v4177_v42 }
 0x3e5   : > { %3655 = vmatprep.subr.bf16.mxu1 %v4178_v1 }
 0x3e8   : > { %3656 = vmatpush3.bf16.msra.mxu1 %v4179_v58 }
 0x3e9   : > { %2353 = vmatmul.mubr.bf16.gmra.mrb[100].mxu1 %v1942_v53  ;;  %3657 = vmatprep.subr.bf16.mxu1 %v4180_v48 }
 0x3ea   : > { %2360 = vmatprep.mubr.bf16.mxu1 %v2006_v7 }
 0x3ec   : > { %3658 = vmatpush3.bf16.msra.mxu1 %v4181_v28 }
 0x3ed   : > { %3659 = vmatprep.subr.bf16.mxu1 %v4182_v44 }
 0x3f0   : > { %3660 = vmatpush3.bf16.msra.mxu1 %v4183_v4 }
 0x3f1   : > { %2361 = vmatmul.mubr.bf16.gmra.mrb[104].mxu1 %v1943_v13  ;;  %3888 = vmatprep.subr.bf16.mxu1 %v6201_v2 }
 0x440   : > { %v2403_v55 = vpop.f32.mrb[36].mxu0 }
 0x441   : > { %v3802_v59 = vpop.f32.mrb[37].mxu0 }
 0x442   : > { %v2406_v45 = vpop.f32.mrb[38].mxu0 }
 0x443   : > { %v3803_v47 = vpop.f32.mrb[39].mxu0 }
 0x448   : > { %v5693_v57 = vpop.f32.mrb[40].mxu0 }
 0x449   : > { %v3806_v54 = vpop.f32.mrb[41].mxu0 }
 0x44a   : > { %v5695_v60 = vpop.f32.mrb[42].mxu0 }
 0x44b   : > { %v3807_v9 = vpop.f32.mrb[43].mxu0 }
 0x450   : > { %v5697_v30 = vpop.f32.mrb[44].mxu0 }
 0x451   : > { %v3810_v34 = vpop.f32.mrb[45].mxu0 }
 0x452   : > { %v5699_v21 = vpop.f32.mrb[46].mxu0  ;;  %v5729_v34 = vld [vmem:[%s6262_s26] ss:$0 sm:$0xff] }
 0x453   : > { %v3811_v53 = vpop.f32.mrb[47].mxu0 }
 0x458   : > { %v5702_v24 = vpop.f32.mrb[48].mxu0 }
 0x459   : > { %v3814_v7 = vpop.f32.mrb[49].mxu0 }
 0x45a   : > { %v5704_v17 = vpop.f32.mrb[50].mxu0 }
 0x45b   : > { %v3815_v20 = vpop.f32.mrb[51].mxu0 }
 0x460   : > { %v5706_v11 = vpop.f32.mrb[52].mxu0 }
 0x461   : > { %v3818_v13 = vpop.f32.mrb[53].mxu0 }
 0x462   : > { %v5708_v50 = vpop.f32.mrb[54].mxu0 }
 0x463   : > { %v3819_v5 = vpop.f32.mrb[55].mxu0 }
 0x468   : > { %v5710_v25 = vpop.f32.mrb[56].mxu0 }
 0x469   : > { %v3822_v0 = vpop.f32.mrb[57].mxu0 }
 0x46a   : > { %v5712_v8 = vpop.f32.mrb[58].mxu0 }
 0x46b   : > { %v3823_v41 = vpop.f32.mrb[59].mxu0 }
 0x470   : > { %v5714_v32 = vpop.f32.mrb[60].mxu0 }
 0x471   : > { %v3826_v38 = vpop.f32.mrb[61].mxu0 }
 0x472   : > { %v5716_v63 = vpop.f32.mrb[62].mxu0 }
 0x473   : > { %v3827_v42 = vpop.f32.mrb[63].mxu0 }
 0x478   : > { %v5718_v1 = vpop.f32.mrb[64].mxu0 }
 0x479   : > { %v3830_v58 = vpop.f32.mrb[65].mxu0 }
 0x47a   : > { %v5720_v59 = vpop.f32.mrb[66].mxu0 }
 0x47b   : > { %v3831_v47 = vpop.f32.mrb[67].mxu0 }
 0x480   : > { %v5722_v48 = vpop.f32.mrb[68].mxu0 }
 0x481   : > { %v3834_v54 = vpop.f32.mrb[69].mxu0 }
 0x482   : > { %v5724_v9 = vpop.f32.mrb[70].mxu0 }
 0x483   : > { %v3835_v28 = vpop.f32.mrb[71].mxu0 }
 0x484   : > { %v3574_v44 = vpop.f32.mrb[72].mxu1 }
 0x485   : > { %v3575_v4 = vpop.f32.mrb[73].mxu1 }
 0x486   : > { %v3576_v53 = vadd.f32 %v3575_v4, %v3574_v44  ;;  %v3577_v7 = vpop.f32.mrb[74].mxu1 }
 0x487   : > { %v3578_v20 = vpop.f32.mrb[75].mxu1 }
 0x488   : > { %v2299_v13 = vadd.f32 %v3576_v53, %v5729_v34  ;;  %v3579_v5 = vadd.f32 %v3578_v20, %v3577_v7 }
 0x48a   : > { %v2404_v0 = vadd.f32 %v2403_v55, %v2299_v13  ;;  %v2302_v41 = vadd.f32 %v3579_v5, %v5729_v34 }
 0x48c   : > { %v5733_v38 = vmax.f32 %v2404_v0, 0.0  ;;  %v2407_v42 = vadd.f32 %v2406_v45, %v2302_v41  ;;  %v3580_v58 = vpop.f32.mrb[76].mxu1 }
 0x48d   : > { %v3581_v47 = vpop.f32.mrb[77].mxu1 }
 0x48e   : > { %v2475_v54 = vmax.f32 %v2407_v42, 0.0  ;;  %v3582_v28 = vadd.f32 %v3581_v47, %v3580_v58  ;;  %v3583_v3 = vpop.f32.mrb[78].mxu1  ;;  %v6144_v56 = vrot.slane %v5733_v38, 4  ;;  %v6143_v44 = vrot.slane %v5733_v38, 6 }
 0x48f   : > { %v3584_v4 = vpop.f32.mrb[79].mxu1 }
 0x490   : > { %v2493_v52 = vrot.slane %v2475_v54, 4  ;;  %v2556_v43 = vrot.slane %v2475_v54, 6  ;;  %v2618_v53 = vpack.c.bf16 %v2475_v54, %v5733_v38  ;;  %v2307_v55 = vadd.f32 %v3582_v28, %v5729_v34 }
 0x491   : > { %v3585_v7 = vadd.f32 %v3584_v4, %v3583_v3 }
 0x492   : > { %v5743_v45 = vsel %vm1892_vm8, %v6144_v56, %v2493_v52  ;;  %v2412_v20 = vadd.f32 %v5693_v57, %v2307_v55  ;;  %3853 = vmatmul.mubr.bf16.vlgmr.msra.gmra.mrb[72].mxu0 %v2618_v53  ;;  %v5750_v13 = vsel %vm493_vm4, %v6143_v44, %v2556_v43 }
 0x493   : > { %v2310_v5 = vadd.f32 %v3585_v7, %v5729_v34  ;;  %3856 = vmatprep.mubr.msk.bf16.mxu0 %vm4391_vm7, %v6201_v2 }
 0x494   : > { %v2476_v3 = vmax.f32 %v2412_v20, 0.0  ;;  %v3586_v0 = vpop.f32.mrb[80].mxu1 }
 0x495   : > { %v2415_v41 = vadd.f32 %v5695_v60, %v2310_v5  ;;  %v3587_v42 = vpop.f32.mrb[81].mxu1 }
 0x496   : > { %v3588_v58 = vadd.f32 %v3587_v42, %v3586_v0  ;;  %v3589_v47 = vpop.f32.mrb[82].mxu1  ;;  %v2557_v57 = vrot.slane %v2476_v3, 6  ;;  %v2494_v54 = vrot.slane %v2476_v3, 4 }
 0x497   : > { %v2477_v28 = vmax.f32 %v2415_v41, 0.0  ;;  %v3590_v4 = vpop.f32.mrb[83].mxu1 }
 0x498   : > { %v2315_v53 = vadd.f32 %v3588_v58, %v5729_v34  ;;  %v3591_v55 = vadd.f32 %v3590_v4, %v3589_v47  ;;  %v5759_v7 = vsel %vm493_vm4, %v2556_v43, %v2557_v57  ;;  %v5763_v20 = vsel %vm1892_vm8, %v2493_v52, %v2494_v54 }
 0x499   : > { %v2619_v44 = vpack.c.bf16 %v2477_v28, %v2476_v3  ;;  %v2558_v60 = vrot.slane %v2477_v28, 6  ;;  %v2495_v5 = vrot.slane %v2477_v28, 4 }
 0x49a   : > { %v2420_v0 = vadd.f32 %v5697_v30, %v2315_v53  ;;  %v2318_v42 = vadd.f32 %v3591_v55, %v5729_v34 }
 0x49b   : > { %3857 = vmatmul.mubr.bf16.gmra.mrb[76].mxu0 %v2619_v44  ;;  %v5769_v41 = vsel %vm493_vm4, %v2557_v57, %v2558_v60  ;;  %v5773_v43 = vsel %vm1892_vm8, %v2494_v54, %v2495_v5 }
 0x49c   : > { %v2478_v58 = vmax.f32 %v2420_v0, 0.0  ;;  %v2423_v52 = vadd.f32 %v5699_v21, %v2318_v42  ;;  %v3592_v47 = vpop.f32.mrb[84].mxu1  ;;  %3860 = vmatprep.mubr.msk.bf16.mxu0 %vm4391_vm7, %v6201_v2 }
 0x49d   : > { %v3593_v3 = vpop.f32.mrb[85].mxu1 }
 0x49e   : > { %v2479_v57 = vmax.f32 %v2423_v52, 0.0  ;;  %v3594_v28 = vadd.f32 %v3593_v3, %v3592_v47  ;;  %v3595_v4 = vpop.f32.mrb[86].mxu1  ;;  %v2559_v53 = vrot.slane %v2478_v58, 6  ;;  %v2496_v54 = vrot.slane %v2478_v58, 4 }
 0x49f   : > { %v3596_v55 = vpop.f32.mrb[87].mxu1 }
 0x4a0   : > { %v2323_v0 = vadd.f32 %v3594_v28, %v5729_v34  ;;  %v3597_v21 = vadd.f32 %v3596_v55, %v3595_v4  ;;  %v2620_v42 = vpack.c.bf16 %v2479_v57, %v2478_v58  ;;  %v2560_v56 = vrot.slane %v2479_v57, 6 }
 0x4a1   : > { %v5785_v22 = vsel %vm493_vm4, %v2558_v60, %v2559_v53  ;;  %v2497_v30 = vrot.slane %v2479_v57, 4  ;;  %v5789_v44 = vsel %vm1892_vm8, %v2495_v5, %v2496_v54 }
 0x4a2   : > { %v2428_v52 = vadd.f32 %v5702_v24, %v2323_v0  ;;  %v2326_v47 = vadd.f32 %v3597_v21, %v5729_v34  ;;  %v5795_v3 = vsel %vm493_vm4, %v2559_v53, %v2560_v56 }
 0x4a3   : > { %3861 = vmatmul.mubr.bf16.gmra.mrb[80].mxu0 %v2620_v42  ;;  %v5801_v60 = vsel %vm1892_vm8, %v2496_v54, %v2497_v30 }
 0x4a4   : > { %v2480_v57 = vmax.f32 %v2428_v52, 0.0  ;;  %v2431_v5 = vadd.f32 %v5704_v17, %v2326_v47  ;;  %v3598_v28 = vpop.f32.mrb[88].mxu1  ;;  %3864 = vmatprep.mubr.msk.bf16.mxu0 %vm4391_vm7, %v6201_v2 }
 0x4a5   : > { %v3599_v4 = vpop.f32.mrb[89].mxu1 }
 0x4a6   : > { %v2498_v53 = vrot.slane %v2480_v57, 4  ;;  %v2561_v55 = vrot.slane %v2480_v57, 6  ;;  %v2481_v0 = vmax.f32 %v2431_v5, 0.0  ;;  %v3600_v21 = vadd.f32 %v3599_v4, %v3598_v28  ;;  %v3601_v42 = vpop.f32.mrb[90].mxu1 }
 0x4a7   : > { %v3602_v58 = vpop.f32.mrb[91].mxu1 }
 0x4a8   : > { %v2499_v37 = vrot.slane %v2481_v0, 4  ;;  %v2562_v54 = vrot.slane %v2481_v0, 6  ;;  %v2331_v52 = vadd.f32 %v3600_v21, %v5729_v34  ;;  %v3603_v40 = vadd.f32 %v3602_v58, %v3601_v42 }
 0x4a9   : > { %v2621_v17 = vpack.c.bf16 %v2481_v0, %v2480_v57  ;;  %v5811_v47 = vsel %vm493_vm4, %v2560_v56, %v2561_v55  ;;  %v5815_v24 = vsel %vm1892_vm8, %v2497_v30, %v2498_v53 }
 0x4aa   : > { %v2436_v16 = vadd.f32 %v5706_v11, %v2331_v52  ;;  %v2334_v5 = vadd.f32 %v3603_v40, %v5729_v34  ;;  %v5821_v28 = vsel %vm493_vm4, %v2561_v55, %v2562_v54  ;;  %v5825_v58 = vsel %vm1892_vm8, %v2498_v53, %v2499_v37 }
 0x4ab   : > { %3865 = vmatmul.mubr.bf16.gmra.mrb[84].mxu0 %v2621_v17 }
 0x4ac   : > { %v2482_v57 = vmax.f32 %v2436_v16, 0.0  ;;  %v2439_v11 = vadd.f32 %v5708_v50, %v2334_v5  ;;  %v3604_v4 = vpop.f32.mrb[92].mxu1  ;;  %3868 = vmatprep.mubr.msk.bf16.mxu0 %vm4391_vm7, %v6201_v2 }
 0x4ad   : > { %v3605_v40 = vpop.f32.mrb[93].mxu1 }
 0x4ae   : > { %v2483_v55 = vmax.f32 %v2439_v11, 0.0  ;;  %v3606_v0 = vadd.f32 %v3605_v40, %v3604_v4  ;;  %v3607_v21 = vpop.f32.mrb[94].mxu1  ;;  %v2563_v53 = vrot.slane %v2482_v57, 6  ;;  %v2500_v42 = vrot.slane %v2482_v57, 4 }
 0x4af   : > { %v3608_v52 = vpop.f32.mrb[95].mxu1 }
 0x4b0   : > { %v2339_v17 = vadd.f32 %v3606_v0, %v5729_v34  ;;  %v3609_v56 = vadd.f32 %v3608_v52, %v3607_v21  ;;  %v2622_v36 = vpack.c.bf16 %v2483_v55, %v2482_v57  ;;  %v2564_v61 = vrot.slane %v2483_v55, 6 }
 0x4b1   : > { %v5837_v16 = vsel %vm493_vm4, %v2562_v54, %v2563_v53  ;;  %v2501_v50 = vrot.slane %v2483_v55, 4  ;;  %v5841_v5 = vsel %vm1892_vm8, %v2499_v37, %v2500_v42 }
 0x4b2   : > { %v2444_v11 = vadd.f32 %v5710_v25, %v2339_v17  ;;  %v2342_v4 = vadd.f32 %v3609_v56, %v5729_v34  ;;  %v5847_v40 = vsel %vm493_vm4, %v2563_v53, %v2564_v61 }
 0x4b3   : > { %3869 = vmatmul.mubr.bf16.gmra.mrb[88].mxu0 %v2622_v36  ;;  %v5853_v54 = vsel %vm1892_vm8, %v2500_v42, %v2501_v50 }
 0x4b4   : > { %v2484_v55 = vmax.f32 %v2444_v11, 0.0  ;;  %v2447_v37 = vadd.f32 %v5712_v8, %v2342_v4  ;;  %v3610_v0 = vpop.f32.mrb[96].mxu1  ;;  %3872 = vmatprep.mubr.msk.bf16.mxu0 %vm4391_vm7, %v6201_v2 }
 0x4b5   : > { %v3611_v56 = vpop.f32.mrb[97].mxu1 }
 0x4b6   : > { %v2485_v21 = vmax.f32 %v2447_v37, 0.0  ;;  %v3612_v36 = vadd.f32 %v3611_v56, %v3610_v0  ;;  %v3613_v53 = vpop.f32.mrb[98].mxu1  ;;  %v2565_v52 = vrot.slane %v2484_v55, 6  ;;  %v2502_v17 = vrot.slane %v2484_v55, 4 }
 0x4b7   : > { %v3614_v57 = vpop.f32.mrb[99].mxu1 }
 0x4b8   : > { %v2347_v42 = vadd.f32 %v3612_v36, %v5729_v34  ;;  %v3615_v30 = vadd.f32 %v3614_v57, %v3613_v53  ;;  %v2623_v11 = vpack.c.bf16 %v2485_v21, %v2484_v55  ;;  %v2566_v46 = vrot.slane %v2485_v21, 6 }
 0x4b9   : > { %v5863_v8 = vsel %vm493_vm4, %v2564_v61, %v2565_v52  ;;  %v2503_v4 = vrot.slane %v2485_v21, 4  ;;  %v5867_v25 = vsel %vm1892_vm8, %v2501_v50, %v2502_v17 }
 0x4ba   : > { %v2452_v37 = vadd.f32 %v5714_v32, %v2347_v42  ;;  %v2350_v0 = vadd.f32 %v3615_v30, %v5729_v34  ;;  %v5873_v56 = vsel %vm493_vm4, %v2565_v52, %v2566_v46 }
 0x4bb   : > { %3873 = vmatmul.mubr.bf16.gmra.mrb[92].mxu0 %v2623_v11  ;;  %v5879_v61 = vsel %vm1892_vm8, %v2502_v17, %v2503_v4 }
 0x4bc   : > { %v2486_v55 = vmax.f32 %v2452_v37, 0.0  ;;  %v2455_v50 = vadd.f32 %v5716_v63, %v2350_v0  ;;  %v3616_v21 = vpop.f32.mrb[100].mxu1  ;;  %3876 = vmatprep.mubr.msk.bf16.mxu0 %vm4391_vm7, %v6201_v2 }
 0x4bd   : > { %v3617_v30 = vpop.f32.mrb[101].mxu1 }
 0x4be   : > { %v2504_v36 = vrot.slane %v2486_v55, 4  ;;  %v2567_v53 = vrot.slane %v2486_v55, 6  ;;  %v2487_v52 = vmax.f32 %v2455_v50, 0.0  ;;  %v3618_v42 = vadd.f32 %v3617_v30, %v3616_v21  ;;  %v3619_v11 = vpop.f32.mrb[102].mxu1 }
 0x4bf   : > { %v3620_v57 = vpop.f32.mrb[103].mxu1 }
 0x4c0   : > { %v2505_v12 = vrot.slane %v2487_v52, 4  ;;  %v2568_v17 = vrot.slane %v2487_v52, 6  ;;  %v2355_v37 = vadd.f32 %v3618_v42, %v5729_v34  ;;  %v3621_v39 = vadd.f32 %v3620_v57, %v3619_v11 }
 0x4c1   : > { %v2624_v63 = vpack.c.bf16 %v2487_v52, %v2486_v55  ;;  %v5889_v0 = vsel %vm493_vm4, %v2566_v46, %v2567_v53  ;;  %v5893_v32 = vsel %vm1892_vm8, %v2503_v4, %v2504_v36 }
 0x4c2   : > { %v2460_v49 = vadd.f32 %v5718_v1, %v2355_v37  ;;  %v2358_v50 = vadd.f32 %v3621_v39, %v5729_v34  ;;  %v5899_v21 = vsel %vm493_vm4, %v2567_v53, %v2568_v17  ;;  %v5903_v57 = vsel %vm1892_vm8, %v2504_v36, %v2505_v12 }
 0x4c3   : > { %3877 = vmatmul.mubr.bf16.gmra.mrb[96].mxu0 %v2624_v63 }
 0x4c4   : > { %v5909_v55 = vmax.f32 %v2460_v49, 0.0  ;;  %v2463_v1 = vadd.f32 %v5720_v59, %v2358_v50  ;;  %v3622_v39 = vpop.f32.mrb[104].mxu1 }
 0x4c5   : > { %v3623_v30 = vpop.f32.mrb[105].mxu1 }
 0x4c6   : > { %6263 = vst [vmem:[#allocation29_spill] sm:$0xff] %v5909_v55  ;;  %v5912_v52 = vmax.f32 %v2463_v1, 0.0  ;;  %v3624_v53 = vadd.f32 %v3623_v30, %v3622_v39  ;;  %v3625_v42 = vpop.f32.mrb[106].mxu1  ;;  %v2569_v36 = vrot.slane %v5909_v55, 6  ;;  %v2506_v11 = vrot.slane %v5909_v55, 4 }
 0x4c7   : > { %v3626_v37 = vpop.f32.mrb[107].mxu1 }
 0x4c8   : > { %v2363_v4 = vadd.f32 %v3624_v53, %v5729_v34  ;;  %v3627_v49 = vadd.f32 %v3626_v37, %v3625_v42  ;;  %v2570_v46 = vrot.slane %v5912_v52, 6  ;;  %v2576_v59 = vsel %vm493_vm4, %v2568_v17, %v2569_v36 }
 0x4c9   : > { %v2507_v50 = vrot.slane %v5912_v52, 4  ;;  %v2513_v1 = vsel %vm1892_vm8, %v2505_v12, %v2506_v11 }
 0x4ca   : > { %v2468_v39 = vadd.f32 %v5722_v48, %v2363_v4  ;;  %v2366_v30 = vadd.f32 %v3627_v49, %v5729_v34  ;;  %v2575_v63 = vsel %vm493_vm4, %v2569_v36, %v2570_v46  ;;  %v6264_v36 = vrot.slane %v5733_v38, 4 }
 0x4cb   : > { %v2616_v29 = vpack.c.bf16 %v2575_v63, %v2576_v59  ;;  %v2512_v53 = vsel %vm1892_vm8, %v2506_v11, %v2507_v50 }
 0x4cc   : > { %v2490_v42 = vmax.f32 %v2468_v39, 0.0  ;;  %v2471_v37 = vadd.f32 %v5724_v9, %v2366_v30  ;;  %v2553_v17 = vpack.c.bf16 %v2512_v53, %v2513_v1  ;;  %v6265_v9 = vrot.slane %v5733_v38, 6  ;;  %v6043_v39 = vld [vmem:[%s6280_s25] ss:$0 sm:$0xff] }
 0x4cd   : > { %v6266_v38 = vpack.c.bf16 %v5769_v41, %v5759_v7 }
 0x4ce   : > { %v2491_v10 = vmax.f32 %v2471_v37, 0.0  ;;  %v2571_v31 = vrot.slane %v2490_v42, 6  ;;  %v2508_v19 = vrot.slane %v2490_v42, 4 }
 0x4d0   : > { %v2509_v55 = vrot.slane %v2491_v10, 4  ;;  %v2572_v12 = vrot.slane %v2491_v10, 6  ;;  %v2574_v48 = vsel %vm493_vm4, %v2570_v46, %v2571_v31  ;;  %v2511_v34 = vsel %vm1892_vm8, %v2507_v50, %v2508_v19 }
 0x4d1   : > { %v2626_v4 = vpack.c.bf16 %v2491_v10, %v2490_v42 }
 0x4d2   : > { %v2527_v11 = vsel %vm1892_vm8, %v2509_v55, %v6264_v36  ;;  %v2590_v63 = vsel %vm493_vm4, %v2572_v12, %v6265_v9  ;;  %v2573_v49 = vsel %vm493_vm4, %v2571_v31, %v2572_v12  ;;  %v2510_v46 = vsel %vm1892_vm8, %v2508_v19, %v2509_v55 }
 0x4d3   : > { %v3455_v59 = vpack.c.bf16 %v5743_v45, %v2527_v11  ;;  %v3452_v10 = vpack.c.bf16 %v5750_v13, %v2590_v63  ;;  %v2617_v50 = vpack.c.bf16 %v2573_v49, %v2574_v48  ;;  %v2554_v1 = vpack.c.bf16 %v2510_v46, %v2511_v34  ;;  %v6281_v63 = vld [vmem:[#allocation32_spill] sm:$0xff] }
 0x4d4   : > { %v6267_v19 = vpack.c.bf16 %v5773_v43, %v5763_v20  ;;  %v6268_v31 = vpack.c.bf16 %v5795_v3, %v5785_v22  ;;  %v6271_v22 = vpack.c.bf16 %v5825_v58, %v5815_v24  ;;  %v6276_v45 = vpack.c.bf16 %v5899_v21, %v5889_v0 }
 0x4d5   : > { %3453 = vmatprep.mubr.msk.bf16.mxu1 %vm4777_vm6, %v3452_v10 }
 0x4d6   : > { %3456 = vmatmul.mubr.msk.bf16.vlgmr.msra.gmra.mrb[108].mxu1 %vm5550_vm10, %v3455_v59 }
 0x4d7   : > { %2817 = vmatprep.mubr.bf16.mxu1 %v6266_v38  ;;  %3896 = vmatpush3.bf16.msra.mxu1 %v5662_v26  ;;  %v6269_v26 = vpack.c.bf16 %v5801_v60, %v5789_v44 }
 0x4d8   : > { %3889 = vmatprep.subr.bf16.mxu1 %v6201_v2 }
 0x4db   : > { %3897 = vmatpush3.bf16.msra.mxu1 %v5665_v62  ;;  %v6270_v62 = vpack.c.bf16 %v5821_v28, %v5811_v47 }
 0x4dc   : > { %3890 = vmatprep.subr.bf16.mxu1 %v6201_v2 }
 0x4de   : > { %2818 = vmatmul.mubr.bf16.gmra.mrb[112].mxu1 %v6267_v19 }
 0x4df   : > { %2825 = vmatprep.mubr.bf16.mxu1 %v6268_v31  ;;  %3898 = vmatpush3.bf16.msra.mxu1 %v5670_v51  ;;  %v6272_v51 = vpack.c.bf16 %v5847_v40, %v5837_v16 }
 0x4e0   : > { %3891 = vmatprep.subr.bf16.mxu1 %v6201_v2 }
 0x4e3   : > { %3899 = vmatpush3.bf16.msra.mxu1 %v5673_v15  ;;  %v6273_v15 = vpack.c.bf16 %v5853_v54, %v5841_v5 }
 0x4e4   : > { %3892 = vmatprep.subr.bf16.mxu1 %v6201_v2 }
 0x4e6   : > { %2826 = vmatmul.mubr.bf16.gmra.mrb[116].mxu1 %v6269_v26 }
 0x4e7   : > { %3459 = vmatprep.mubr.msk.bf16.mxu1 %vm4777_vm6, %v6270_v62  ;;  %3900 = vmatpush3.bf16.msra.mxu1 %v5678_v23  ;;  %v6274_v23 = vpack.c.bf16 %v5873_v56, %v5863_v8 }
 0x4e8   : > { %3893 = vmatprep.subr.bf16.mxu1 %v6201_v2 }
 0x4eb   : > { %3901 = vmatpush3.bf16.msra.mxu1 %v5682_v6  ;;  %v6275_v6 = vpack.c.bf16 %v5879_v61, %v5867_v25 }
 0x4ec   : > { %3894 = vmatprep.subr.bf16.mxu1 %v6201_v2 }
 0x4ee   : > { %3462 = vmatmul.mubr.msk.bf16.gmra.mrb[120].mxu1 %vm5550_vm10, %v6271_v22 }
 0x4ef   : > { %2841 = vmatprep.mubr.bf16.mxu1 %v6272_v51  ;;  %3902 = vmatpush3.bf16.msra.mxu1 %v5686_v18  ;;  %v6277_v18 = vpack.c.bf16 %v5903_v57, %v5893_v32 }
 0x4f0   : > { %3895 = vmatprep.subr.bf16.mxu1 %v6201_v2 }
 0x4f3   : > { %3903 = vmatpush3.bf16.msra.mxu1 %v5690_v35  ;;  %v6278_v35 = vld [vmem:[#allocation29_spill] sm:$0xff] }
 0x4f4   : > { %v6279_v13 = vpack.c.bf16 %v5912_v52, %v6278_v35  ;;  %v6283_v35 = vld [vmem:[#allocation13_spill] sm:$0xff] }
 0x4f6   : > { %2842 = vmatmul.mubr.bf16.gmra.mrb[124].mxu1 %v6273_v15 }
 0x4f7   : > { %2849 = vmatprep.mubr.bf16.mxu1 %v6274_v23 }
 0x4fe   : > { %2850 = vmatmul.mubr.bf16.gmra.mrb[128].mxu1 %v6275_v6 }
 0x4ff   : > { %3465 = vmatprep.mubr.msk.bf16.mxu1 %vm4777_vm6, %v6276_v45 }
 0x506   : > { %3468 = vmatmul.mubr.msk.bf16.gmra.mrb[132].mxu1 %vm5550_vm10, %v6277_v18 }
 0x507   : > { %2865 = vmatprep.mubr.bf16.mxu1 %v2616_v29 }
 0x50e   : > { %2866 = vmatmul.mubr.bf16.gmra.mrb[136].mxu1 %v2553_v17 }
 0x50f   : > { %2873 = vmatprep.mubr.bf16.mxu1 %v2617_v50 }
 0x516   : > { %2874 = vmatmul.mubr.bf16.gmra.mrb[140].mxu1 %v2554_v1  ;;  %v6282_v1 = vld [vmem:[#allocation30_spill] sm:$0xff] }
 0x517   : > { %3880 = vmatprep.mubr.msk.bf16.mxu1 %vm4391_vm7, %v6201_v2 }
 0x51e   : > { %3881 = vmatmul.mubr.bf16.vlgmr.msra.gmra.mrb[144].mxu1 %v6279_v13 }
 0x51f   : > { %3884 = vmatprep.mubr.msk.bf16.mxu1 %vm4391_vm7, %v6201_v2 }
 0x526   : > { %3885 = vmatmul.mubr.bf16.gmra.mrb[148].mxu1 %v2626_v4 }
 0x565   : > { %v2916_v27 = vpop.f32.mrb[72].mxu0 }
 0x566   : > { %v3854_v7 = vpop.f32.mrb[73].mxu0 }
 0x567   : > { %v2919_v20 = vpop.f32.mrb[74].mxu0 }
 0x568   : > { %v3855_v33 = vpop.f32.mrb[75].mxu0 }
 0x56e   : > { %v2924_v41 = vpop.f32.mrb[76].mxu0 }
 0x56f   : > { %v3858_v29 = vpop.f32.mrb[77].mxu0 }
 0x570   : > { %v2927_v43 = vpop.f32.mrb[78].mxu0 }
 0x571   : > { %v3859_v44 = vpop.f32.mrb[79].mxu0 }
 0x572   : > { %v6284_v44 = vld [vmem:[#allocation14_spill] sm:$0xff] }
 0x576   : > { %v6020_v3 = vpop.f32.mrb[80].mxu0 }
 0x577   : > { %v3862_v60 = vpop.f32.mrb[81].mxu0 }
 0x578   : > { %v6022_v24 = vpop.f32.mrb[82].mxu0 }
 0x579   : > { %v3863_v47 = vpop.f32.mrb[83].mxu0 }
 0x57e   : > { %v6024_v28 = vpop.f32.mrb[84].mxu0 }
 0x57f   : > { %v3866_v58 = vpop.f32.mrb[85].mxu0 }
 0x580   : > { %v6026_v16 = vpop.f32.mrb[86].mxu0 }
 0x581   : > { %v3867_v2 = vpop.f32.mrb[87].mxu0 }
 0x586   : > { %v6028_v5 = vpop.f32.mrb[88].mxu0 }
 0x587   : > { %v3870_v40 = vpop.f32.mrb[89].mxu0 }
 0x588   : > { %v6030_v54 = vpop.f32.mrb[90].mxu0 }
 0x589   : > { %v3871_v25 = vpop.f32.mrb[91].mxu0 }
 0x58e   : > { %v6032_v8 = vpop.f32.mrb[92].mxu0 }
 0x58f   : > { %v3874_v56 = vpop.f32.mrb[93].mxu0 }
 0x590   : > { %v6034_v61 = vpop.f32.mrb[94].mxu0 }
 0x591   : > { %v3875_v32 = vpop.f32.mrb[95].mxu0 }
 0x596   : > { %v6036_v0 = vpop.f32.mrb[96].mxu0 }
 0x597   : > { %v3878_v21 = vpop.f32.mrb[97].mxu0 }
 0x598   : > { %v6038_v57 = vpop.f32.mrb[98].mxu0 }
 0x599   : > { %v3879_v55 = vpop.f32.mrb[99].mxu0 }
 0x5a9   : > { %v3661_v52 = vpop.f32.mrb[108].mxu1 }
 0x5aa   : > { %v3662_v30 = vpop.f32.mrb[109].mxu1 }
 0x5ab   : > { %v3663_v53 = vadd.f32 %v3662_v30, %v3661_v52  ;;  %v3664_v42 = vpop.f32.mrb[110].mxu1 }
 0x5ac   : > { %v3665_v37 = vpop.f32.mrb[111].mxu1 }
 0x5ad   : > { %v2812_v17 = vadd.f32 %v3663_v53, %v6043_v39  ;;  %v3666_v12 = vadd.f32 %v3665_v37, %v3664_v42  ;;  %v6058_v53 = vadd.s32 40, %v4651_v14  ;;  %v6285_v42 = vld [vmem:[#allocation15_spill] sm:$0xff] }
 0x5af   : > { %v2917_v48 = vadd.f32 %v2916_v27, %v2812_v17  ;;  %v2815_v34 = vadd.f32 %v3666_v12, %v6043_v39  ;;  %vm3046_vm11 = vcmp.lt.s32.totalorder %v6058_v53, 45 }
 0x5b1   : > { %v2987_v4 = vmax.f32 %v2917_v48, 0.0  ;;  %v2920_v36 = vadd.f32 %v2919_v20, %v2815_v34  ;;  %v3667_v11 = vpop.f32.mrb[112].mxu1 }
 0x5b2   : > { %v3668_v9 = vpop.f32.mrb[113].mxu1 }
 0x5b3   : > { %v3005_v49 = vadd.f32 %v2987_v4, %v6281_v63  ;;  %v2988_v46 = vmax.f32 %v2920_v36, 0.0  ;;  %v3669_v59 = vadd.f32 %v3668_v9, %v3667_v11  ;;  %v3670_v10 = vpop.f32.mrb[114].mxu1  ;;  %v6286_v11 = vld [vmem:[#allocation16_spill] sm:$0xff] }
 0x5b4   : > { %v3671_v50 = vpop.f32.mrb[115].mxu1 }
 0x5b5   : > { %v3006_v38 = vadd.f32 %v2988_v46, %v6282_v1  ;;  %v2820_v19 = vadd.f32 %v3669_v59, %v6043_v39  ;;  %v3672_v31 = vadd.f32 %v3671_v50, %v3670_v10  ;;  %v3023_v26 = vmax.f32 %v3005_v49, 0.0 }
 0x5b7   : > { %v3024_v62 = vmax.f32 %v3006_v38, 0.0  ;;  %v2925_v22 = vadd.f32 %v2924_v41, %v2820_v19  ;;  %v2823_v51 = vadd.f32 %v3672_v31, %v6043_v39  ;;  %v6287_v19 = vld [vmem:[#allocation18_spill] sm:$0xff] }
 0x5b9   : > { %v3098_v15 = vadd.f32 %v3024_v62, %v3023_v26  ;;  %v2989_v23 = vmax.f32 %v2925_v22, 0.0  ;;  %v2928_v6 = vadd.f32 %v2927_v43, %v2823_v51  ;;  %v3673_v45 = vpop.f32.mrb[116].mxu1 }
 0x5ba   : > { %v3674_v18 = vpop.f32.mrb[117].mxu1 }
 0x5bb   : > { %v3007_v13 = vadd.f32 %v2989_v23, %v6283_v35  ;;  %v2990_v27 = vmax.f32 %v2928_v6, 0.0  ;;  %v3675_v7 = vadd.f32 %v3674_v18, %v3673_v45  ;;  %v3676_v20 = vpop.f32.mrb[118].mxu1 }
 0x5bc   : > { %v3677_v33 = vpop.f32.mrb[119].mxu1 }
 0x5bd   : > { %v3025_v29 = vmax.f32 %v3007_v13, 0.0  ;;  %v3008_v60 = vadd.f32 %v2990_v27, %v6284_v44  ;;  %v2828_v47 = vadd.f32 %v3675_v7, %v6043_v39  ;;  %v3678_v58 = vadd.f32 %v3677_v33, %v3676_v20 }
 0x5bf   : > { %v3065_v41 = vmax.f32 %v3023_v26, %v3025_v29  ;;  %v3099_v2 = vadd.f32 %v3098_v15, %v3025_v29  ;;  %v3026_v40 = vmax.f32 %v3008_v60, 0.0  ;;  %v2933_v25 = vadd.f32 %v6020_v3, %v2828_v47 }
 0x5c0   : > { %v2831_v43 = vadd.f32 %v3678_v58, %v6043_v39 }
 0x5c1   : > { %v3066_v56 = vmax.f32 %v3024_v62, %v3026_v40  ;;  %v3100_v32 = vadd.f32 %v3099_v2, %v3026_v40  ;;  %v2991_v21 = vmax.f32 %v2933_v25, 0.0  ;;  %v3679_v55 = vpop.f32.mrb[120].mxu1  ;;  %v6289_v25 = vld [vmem:[#allocation19_spill] sm:$0xff] }
 0x5c2   : > { %v2936_v52 = vadd.f32 %v6022_v24, %v2831_v43  ;;  %v3680_v30 = vpop.f32.mrb[121].mxu1 }
 0x5c3   : > { %v3009_v37 = vadd.f32 %v2991_v21, %v6285_v42  ;;  %v3681_v17 = vadd.f32 %v3680_v30, %v3679_v55  ;;  %v3682_v12 = vpop.f32.mrb[122].mxu1  ;;  %v6290_v42 = vld [vmem:[#allocation20_spill] sm:$0xff] }
 0x5c4   : > { %v2992_v48 = vmax.f32 %v2936_v52, 0.0  ;;  %v3683_v34 = vpop.f32.mrb[123].mxu1 }
 0x5c5   : > { %v3027_v4 = vmax.f32 %v3009_v37, 0.0  ;;  %v2836_v3 = vadd.f32 %v3681_v17, %v6043_v39  ;;  %v3684_v36 = vadd.f32 %v3683_v34, %v3682_v12 }
 0x5c6   : > { %v3010_v9 = vadd.f32 %v2992_v48, %v6286_v11 }
 0x5c7   : > { %v3067_v63 = vmax.f32 %v3065_v41, %v3027_v4  ;;  %v3101_v24 = vadd.f32 %v3100_v32, %v3027_v4  ;;  %v2941_v49 = vadd.f32 %v6024_v28, %v2836_v3  ;;  %v2839_v14 = vadd.f32 %v3684_v36, %v6043_v39  ;;  %v6288_v28 = vld [vmem:[#allocation17_spill] sm:$0xff] }
 0x5c8   : > { %v3028_v46 = vmax.f32 %v3010_v9, 0.0 }
 0x5c9   : > { %v2993_v59 = vmax.f32 %v2941_v49, 0.0  ;;  %v2944_v10 = vadd.f32 %v6026_v16, %v2839_v14  ;;  %v3685_v50 = vpop.f32.mrb[124].mxu1 }
 0x5ca   : > { %v3686_v1 = vpop.f32.mrb[125].mxu1  ;;  %v3052_v38 = vsel %vm3046_vm11, %v3028_v46, 0.0 }
 0x5cb   : > { %v3011_v31 = vadd.f32 %v2993_v59, %v6287_v19  ;;  %v2994_v26 = vmax.f32 %v2944_v10, 0.0  ;;  %v3687_v62 = vadd.f32 %v3686_v1, %v3685_v50  ;;  %v3688_v22 = vpop.f32.mrb[126].mxu1  ;;  %v3068_v51 = vmax.f32 %v3066_v56, %v3052_v38 }
 0x5cc   : > { %v3689_v15 = vpop.f32.mrb[127].mxu1  ;;  %v3102_v23 = vadd.f32 %v3101_v24, %v3052_v38  ;;  %v6291_v38 = vld [vmem:[#allocation21_spill] sm:$0xff] }
 0x5cd   : > { %v3012_v6 = vadd.f32 %v2994_v26, %v6288_v28  ;;  %v2844_v45 = vadd.f32 %v3687_v62, %v6043_v39  ;;  %v3690_v18 = vadd.f32 %v3689_v15, %v3688_v22  ;;  %v3069_v35 = vmax.f32 %v3067_v63, %v3068_v51  ;;  %v6292_v28 = vld [vmem:[#allocation22_spill] sm:$0xff] }
 0x5ce   : > { %v3103_v16 = vrot.slane %v3102_v23, 4  ;;  %v3029_v13 = vmax.f32 %v3011_v31, 0.0 }
 0x5cf   : > { %v3030_v27 = vmax.f32 %v3012_v6, 0.0  ;;  %v2949_v7 = vadd.f32 %v6028_v5, %v2844_v45  ;;  %v2847_v20 = vadd.f32 %v3690_v18, %v6043_v39  ;;  %v3070_v33 = vrot.slane %v3069_v35, 4 }
 0x5d0   : > { %v3104_v29 = vadd.f32 %v3103_v16, %v3102_v23 }
 0x5d1   : > { %v3109_v44 = vadd.f32 %v3030_v27, %v3029_v13  ;;  %v2995_v60 = vmax.f32 %v2949_v7, 0.0  ;;  %v2952_v47 = vadd.f32 %v6030_v54, %v2847_v20  ;;  %v3691_v58 = vpop.f32.mrb[128].mxu1  ;;  %v3071_v2 = vmax.f32 %v3069_v35, %v3070_v33 }
 0x5d2   : > { %v3692_v41 = vpop.f32.mrb[129].mxu1  ;;  %v3105_v40 = vrot.slane %v3104_v29, 2 }
 0x5d3   : > { %v3013_v43 = vadd.f32 %v2995_v60, %v6289_v25  ;;  %v2996_v56 = vmax.f32 %v2952_v47, 0.0  ;;  %v3693_v32 = vadd.f32 %v3692_v41, %v3691_v58  ;;  %v3694_v21 = vpop.f32.mrb[130].mxu1  ;;  %v3072_v52 = vrot.slane %v3071_v2, 2 }
 0x5d4   : > { %v3695_v55 = vpop.f32.mrb[131].mxu1  ;;  %v3106_v5 = vadd.f32 %v3105_v40, %v3104_v29  ;;  %v6293_v29 = vld [vmem:[#allocation24_spill] sm:$0xff] }
 0x5d5   : > { %v3031_v30 = vmax.f32 %v3013_v43, 0.0  ;;  %v3014_v37 = vadd.f32 %v2996_v56, %v6290_v42  ;;  %v2852_v17 = vadd.f32 %v3693_v32, %v6043_v39  ;;  %v3696_v12 = vadd.f32 %v3695_v55, %v3694_v21 }
 0x5d6   : > { %v3073_v48 = vmax.f32 %v3071_v2, %v3072_v52  ;;  %v3107_v54 = vrot.slane %v3106_v5, 1 }
 0x5d7   : > { %v3076_v34 = vmax.f32 %v3029_v13, %v3031_v30  ;;  %v3110_v4 = vadd.f32 %v3109_v44, %v3031_v30  ;;  %v3032_v3 = vmax.f32 %v3014_v37, 0.0  ;;  %v2957_v36 = vadd.f32 %v6032_v8, %v2852_v17 }
 0x5d8   : > { %v2855_v11 = vadd.f32 %v3696_v12, %v6043_v39  ;;  %v3074_v9 = vrot.slane %v3073_v48, 1  ;;  %v3108_v63 = vadd.f32 %v3107_v54, %v3106_v5 }
 0x5d9   : > { %v3077_v24 = vmax.f32 %v3030_v27, %v3032_v3  ;;  %v3111_v49 = vadd.f32 %v3110_v4, %v3032_v3  ;;  %v2997_v14 = vmax.f32 %v2957_v36, 0.0  ;;  %v3697_v46 = vpop.f32.mrb[132].mxu1 }
 0x5da   : > { %v2960_v59 = vadd.f32 %v6034_v61, %v2855_v11  ;;  %v3698_v10 = vpop.f32.mrb[133].mxu1  ;;  %v3075_v50 = vmax.f32 %v3073_v48, %v3074_v9  ;;  %v3131_v1 = vmul.f32 0.022222223, %v3108_v63 }
 0x5db   : > { %v3015_v19 = vadd.f32 %v2997_v14, %v6291_v38  ;;  %v3699_v31 = vadd.f32 %v3698_v10, %v3697_v46  ;;  %v3700_v26 = vpop.f32.mrb[134].mxu1 }
 0x5dc   : > { %v2998_v62 = vmax.f32 %v2960_v59, 0.0  ;;  %v3701_v22 = vpop.f32.mrb[135].mxu1  ;;  %v3134_v8 = vadd.f32 %v3131_v1, %v3075_v50 }
 0x5dd   : > { %v3033_v51 = vmax.f32 %v3015_v19, 0.0  ;;  %v2860_v15 = vadd.f32 %v3699_v31, %v6043_v39  ;;  %v3702_v23 = vadd.f32 %v3701_v22, %v3700_v26 }
 0x5de   : > { %v3016_v6 = vadd.f32 %v2998_v62, %v6292_v28  ;;  %v6295_v62 = vld [vmem:[#allocation25_spill] sm:$0xff]  ;;  %v6296_v28 = vld [vmem:[#allocation26_spill] sm:$0xff] }
 0x5df   : > { %v3078_v45 = vmax.f32 %v3076_v34, %v3033_v51  ;;  %v3112_v18 = vadd.f32 %v3111_v49, %v3033_v51  ;;  %v2965_v61 = vadd.f32 %v6036_v0, %v2860_v15  ;;  %v2863_v35 = vadd.f32 %v3702_v23, %v6043_v39  ;;  %v6294_v0 = vld [vmem:[#allocation23_spill] sm:$0xff] }
 0x5e0   : > { %v3034_v16 = vmax.f32 %v3016_v6, 0.0 }
 0x5e1   : > { %v2999_v13 = vmax.f32 %v2965_v61, 0.0  ;;  %v2968_v27 = vadd.f32 %v6038_v57, %v2863_v35  ;;  %v3703_v7 = vpop.f32.mrb[136].mxu1 }
 0x5e2   : > { %v3704_v20 = vpop.f32.mrb[137].mxu1  ;;  %v3058_v33 = vsel %vm3046_vm11, %v3034_v16, 0.0 }
 0x5e3   : > { %v3017_v44 = vadd.f32 %v2999_v13, %v6293_v29  ;;  %v3000_v60 = vmax.f32 %v2968_v27, 0.0  ;;  %v3705_v47 = vadd.f32 %v3704_v20, %v3703_v7  ;;  %v3706_v58 = vpop.f32.mrb[138].mxu1  ;;  %v3079_v41 = vmax.f32 %v3077_v24, %v3058_v33 }
 0x5e4   : > { %v3707_v2 = vpop.f32.mrb[139].mxu1  ;;  %v3113_v40 = vadd.f32 %v3112_v18, %v3058_v33 }
 0x5e5   : > { %v3018_v25 = vadd.f32 %v3000_v60, %v6294_v0  ;;  %v3708_v43 = vadd.f32 %v3707_v2, %v3706_v58  ;;  %v3080_v56 = vmax.f32 %v3078_v45, %v3079_v41  ;;  %v3035_v57 = vmax.f32 %v3017_v44, 0.0 }
 0x5e6   : > { %v3114_v32 = vrot.slane %v3113_v40, 4  ;;  %v2868_v9 = vadd.f32 %v3705_v47, %v6043_v39  ;;  %v6297_v47 = vld [vmem:[#allocation27_spill] sm:$0xff] }
 0x5e7   : > { %v3036_v21 = vmax.f32 %v3018_v25, 0.0  ;;  %v3081_v55 = vrot.slane %v3080_v56, 4  ;;  %v2871_v59 = vadd.f32 %v3708_v43, %v6043_v39 }
 0x5e8   : > { %v3115_v52 = vadd.f32 %v3114_v32, %v3113_v40  ;;  %v6298_v40 = vld [vmem:[#allocation28_spill] sm:$0xff] }
 0x5e9   : > { %v3709_v5 = vpop.f32.mrb[140].mxu1  ;;  %v3120_v30 = vadd.f32 %v3036_v21, %v3035_v57  ;;  %v3082_v37 = vmax.f32 %v3080_v56, %v3081_v55 }
 0x5ea   : > { %v3710_v42 = vpop.f32.mrb[141].mxu1  ;;  %v3116_v17 = vrot.slane %v3115_v52, 2 }
 0x5eb   : > { %v3711_v12 = vadd.f32 %v3710_v42, %v3709_v5  ;;  %v3712_v48 = vpop.f32.mrb[142].mxu1  ;;  %v3083_v34 = vrot.slane %v3082_v37, 2 }
 0x5ec   : > { %v3713_v54 = vpop.f32.mrb[143].mxu1  ;;  %v3117_v4 = vadd.f32 %v3116_v17, %v3115_v52 }
 0x5ed   : > { %v3714_v3 = vadd.f32 %v3713_v54, %v3712_v48  ;;  %v3084_v36 = vmax.f32 %v3082_v37, %v3083_v34  ;;  %v2876_v45 = vadd.f32 %v3711_v12, %v6043_v39 }
 0x5ee   : > { %v3118_v11 = vrot.slane %v3117_v4, 1 }
 0x5ef   : > { %v3085_v63 = vrot.slane %v3084_v36, 1  ;;  %v2879_v61 = vadd.f32 %v3714_v3, %v6043_v39 }
 0x5f0   : > { %v3119_v24 = vadd.f32 %v3118_v11, %v3117_v4 }
 0x5f1   : > { %v2972_v49 = vpop.f32.mrb[144].mxu1  ;;  %v3086_v10 = vmax.f32 %v3084_v36, %v3085_v63 }
 0x5f2   : > { %v2973_v14 = vadd.f32 %v2972_v49, %v2868_v9  ;;  %v3882_v46 = vpop.f32.mrb[145].mxu1  ;;  %v3132_v50 = vmul.f32 0.022222223, %v3119_v24 }
 0x5f3   : > { %v2975_v1 = vpop.f32.mrb[146].mxu1 }
 0x5f4   : > { %v3001_v38 = vmax.f32 %v2973_v14, 0.0  ;;  %v2976_v19 = vadd.f32 %v2975_v1, %v2871_v59  ;;  %v3883_v31 = vpop.f32.mrb[147].mxu1  ;;  %v3135_v26 = vadd.f32 %v3132_v50, %v3086_v10 }
 0x5f6   : > { %v3019_v22 = vadd.f32 %v3001_v38, %v6295_v62  ;;  %v3002_v51 = vmax.f32 %v2976_v19, 0.0  ;;  %v3141_v15 = vsel %vm3140_vm12, %v3135_v26, %v3134_v8 }
 0x5f8   : > { %v3037_v23 = vmax.f32 %v3019_v22, 0.0  ;;  %v3020_v6 = vadd.f32 %v3002_v51, %v6296_v28 }
 0x5f9   : > { %v2980_v18 = vpop.f32.mrb[148].mxu1 }
 0x5fa   : > { %v3087_v35 = vmax.f32 %v3035_v57, %v3037_v23  ;;  %v3121_v16 = vadd.f32 %v3120_v30, %v3037_v23  ;;  %v3038_v13 = vmax.f32 %v3020_v6, 0.0  ;;  %v2981_v27 = vadd.f32 %v2980_v18, %v2876_v45  ;;  %v3886_v7 = vpop.f32.mrb[149].mxu1 }
 0x5fb   : > { %v2983_v20 = vpop.f32.mrb[150].mxu1 }
 0x5fc   : > { %v3088_v33 = vmax.f32 %v3036_v21, %v3038_v13  ;;  %v3122_v29 = vadd.f32 %v3121_v16, %v3038_v13  ;;  %v3003_v44 = vmax.f32 %v2981_v27, 0.0  ;;  %v2984_v60 = vadd.f32 %v2983_v20, %v2879_v61  ;;  %v3887_v8 = vpop.f32.mrb[151].mxu1 }
 0x5fe   : > { %v3021_v58 = vadd.f32 %v3003_v44, %v6297_v47  ;;  %v3004_v41 = vmax.f32 %v2984_v60, 0.0 }
 0x600   : > { %v3039_v2 = vmax.f32 %v3021_v58, 0.0  ;;  %v3022_v0 = vadd.f32 %v3004_v41, %v6298_v40 }
 0x602   : > { %v3089_v39 = vmax.f32 %v3087_v35, %v3039_v2  ;;  %v3123_v25 = vadd.f32 %v3122_v29, %v3039_v2  ;;  %v3040_v43 = vmax.f32 %v3022_v0, 0.0 }
 0x604   : > { %v3064_v56 = vsel %vm3046_vm11, %v3040_v43, 0.0 }
 0x605   : > { %v3090_v32 = vmax.f32 %v3088_v33, %v3064_v56  ;;  %v3124_v21 = vadd.f32 %v3123_v25, %v3064_v56 }
 0x607   : > { %v3091_v57 = vmax.f32 %v3089_v39, %v3090_v32  ;;  %v3125_v55 = vrot.slane %v3124_v21, 4 }
 0x609   : > { %v3092_v52 = vrot.slane %v3091_v57, 4  ;;  %v3126_v5 = vadd.f32 %v3125_v55, %v3124_v21 }
 0x60b   : > { %v3093_v30 = vmax.f32 %v3091_v57, %v3092_v52  ;;  %v3127_v42 = vrot.slane %v3126_v5, 2 }
 0x60d   : > { %v3094_v37 = vrot.slane %v3093_v30, 2  ;;  %v3128_v17 = vadd.f32 %v3127_v42, %v3126_v5 }
 0x60f   : > { %v3095_v12 = vmax.f32 %v3093_v30, %v3094_v37  ;;  %v3129_v48 = vrot.slane %v3128_v17, 1 }
 0x611   : > { %v3096_v54 = vrot.slane %v3095_v12, 1  ;;  %v3130_v34 = vadd.f32 %v3129_v48, %v3128_v17 }
 0x613   : > { %v3097_v4 = vmax.f32 %v3095_v12, %v3096_v54  ;;  %v3133_v53 = vmul.f32 0.022222223, %v3130_v34 }
 0x615   : > { %v3136_v3 = vadd.f32 %v3133_v53, %v3097_v4 }
 0x617   : > { %v3143_v36 = vsel %vm3142_vm13, %v3136_v3, %v3141_v15 }
 0x618   : > { %3145 = vst [vmem:[%s435_s22] sm:$0x7] %v3143_v36 }
 0x619 PF: > { %p22_p4 = scmp.ge.s32.totalorder %s4578_s30, 4   ;;  %s6300_s13 = smov %s4369_s14 }
 0x61a   : > { %s6301_s14 = smov %s4373_s15  ;;  %s6302_s15 = smov %s4589_s23 }
 0x61b   : > { %s6303_s16 = smov %s4578_s30  ;;  %24 = sbr.rel (!%p22_p4) target bundleno = 9 (0x9), region = 116 }
 0x622   :  { %3165 = vsyncpa [#allocation3], 1 }
 0x623   :  { %3167 = vsyncpa [#allocation3 + $0x1], 1 }
 0x624   :  { %3168 = vsyncpa [#allocation5], 1 }
 0x625   :  { %3169 = vsyncpa [#allocation8], 1 }

</bundles_post_ra>
